<compile_context>
chip_gen: v6e
topology: v6e:2x2x1
jax: 0.10.0
libtpu: 0.0.40
codegen_flags: <defaults>
</compile_context>

<pallas_src>
import functools
import random

import jax
import jax.numpy as jnp
from jax.experimental import pallas as pl
from jax.experimental.pallas import tpu as pltpu  # noqa: F401  (TPU backend)

_SHIFT = (random.Random(0).random() > 0.5) * 2 - 1  # == +1

_CIN, _COUT, _H, _W = 256, 256, 14, 14
_S = _H * _W          # 196 flattened spatial (s = o*14 + n)
_K = 3                # conv taps


def _conv_kernel(xs_ref, w_ref, y0_ref, y1_ref):
    """Single invocation: 6 MXU matmuls, accumulated per l-slice in registers.

    xs_ref: (3, 256, 196)  -> [tap k, c_in, s],  s = o*14 + n
    w_ref : (256, 1536)    -> [c_out, k*512 + l*256 + c_in]  (free reshape of W)
    y*_ref: (256, 196)     -> per-l partial results (o-roll + l-sum done in glue)
    """
    accs = [None, None]
    for k in range(_K):
        xk = xs_ref[k]                                   # (256, 196)
        for l in range(2):
            lo = (k * 2 + l) * _CIN                      # 128-aligned lane offset
            d = jnp.dot(w_ref[:, lo:lo + _CIN], xk,
                        preferred_element_type=jnp.float32)
            accs[l] = d if accs[l] is None else accs[l] + d
    y0_ref[...] = accs[0]
    y1_ref[...] = accs[1]


@functools.partial(jax.jit, static_argnames=("shift",))
def kernel_generated_4_forward(x, w, shift=_SHIFT):
    """x: (1,256,14,14) f32 NCHW, w: (256,3,2,256) f32 -> (1,256,14,14) f32."""
    # ---- input glue: one small fused pass over the ~200 KB activation ----
    xt = jnp.swapaxes(x[0], 1, 2)                 # (c, w, n)   n = original h axis
    xt = jnp.roll(xt, shift, axis=2)              # fold the final roll-along-n here
    xpt = jnp.pad(xt, ((0, 0), (1, 1), (0, 0)))   # conv zero-pad along w
    # xs[k, c, o, n] = x[0, c, (n - shift) mod 14, o + k - 1]   (zero-padded)
    xs = jnp.stack([xpt[:, k:k + _W, :] for k in range(_K)], axis=0)
    xs = xs.reshape(_K, _CIN, _S)

    # Free (row-major) reshape: columns ordered as (k, l, c_in). No HBM relayout.
    w2 = w.reshape(_COUT, _K * 2 * _CIN)

    y0, y1 = pl.pallas_call(
        _conv_kernel,
        out_shape=(jax.ShapeDtypeStruct((_COUT, _S), jnp.float32),
                   jax.ShapeDtypeStruct((_COUT, _S), jnp.float32)),
    )(xs, w2)

    # ---- output glue: per-l circular roll over o, then sum over l ----
    y0 = y0.reshape(_COUT, _W, _H)                # [i, o, n]
    y1 = y1.reshape(_COUT, _W, _H)
    if shift == 1:
        y = y0 + jnp.roll(y1, 1, axis=1)          # (r_l0, r_l1) = (0, +1)
    else:
        y = jnp.roll(y0, -1, axis=1) + y1         # (r_l0, r_l1) = (-1, 0)
    return y.reshape(1, _COUT, _W, _H)


def torch_reference(x, w, shift):
    """Literal jnp transcription of the PyTorch forward (for verification)."""
    t2 = jnp.einsum('ijkl->iljk', x)
    t2 = t2.reshape(1, 1, 14, 3584)
    pad = jnp.pad(t2, ((0, 0), (0, 0), (1, 1), (0, 0)))
    # F.unfold(kernel=(3,1), padding=(1,0)) -> (1, 3, 14*3584)
    cols = jnp.stack([pad[:, 0, k:k + 14, :] for k in range(3)], axis=1)
    t2 = cols.reshape(1, 3, 14, 256, 14)
    t3 = jnp.einsum('mkojn,iklj->mioln', t2, w)
    t4 = t3.reshape(1, 256, 28, 14)
    t4 = jnp.roll(t4, shift, axis=2)
    t4 = t4.reshape(1, 256, 14, 2, 14)
    t4 = jnp.sum(t4, axis=3)
    t5 = jnp.roll(t4, shift, axis=3)
    return t5


if __name__ == "__main__":
    key = jax.random.PRNGKey(0)
    kx, kw = jax.random.split(key)
    # Shapes are forced by the module's hard-coded reshapes.
    x = jax.random.normal(kx, (1, 256, 14, 14), dtype=jnp.float32)
    w = jax.random.normal(kw, (256, 3, 2, 256), dtype=jnp.float32)

    ok = True
    for s in (+1, -1):           # verify both possible random shift directions
        y = jax.block_until_ready(kernel_generated_4_forward(x, w, shift=s))
        y_ref = torch_reference(x, w, s)
        assert y.shape == (1, 256, 14, 14), y.shape
        if not bool(jnp.allclose(y, y_ref, atol=2e-2, rtol=2e-3)):
            ok = False
            raise AssertionError(
                f"mismatch (shift={s}): max abs err = "
                f"{float(jnp.max(jnp.abs(y - y_ref)))}"
            )

    if ok:
        print("KERNEL_OK")
</pallas_src>

<mosaic_0001>
module attributes {stable_mosaic.version = 11 : i64} {
  func.func @_conv_kernel(%arg0: memref<3x256x196xf32, #tpu.memory_space<vmem>>, %arg1: memref<256x1536xf32, #tpu.memory_space<vmem>>, %arg2: memref<256x196xf32, #tpu.memory_space<vmem>>, %arg3: memref<256x196xf32, #tpu.memory_space<vmem>>) attributes {dimension_semantics = [], scalar_prefetch = 0 : i64, scratch_operands = 0 : i64, tpu.core_type = #tpu.core_type<tc>} {
    %c0 = arith.constant 0 : index
    %c0_0 = arith.constant 0 : index
    %c0_1 = arith.constant 0 : index
    %0 = vector.load %arg0[%c0, %c0_0, %c0_1] : memref<3x256x196xf32, #tpu.memory_space<vmem>>, vector<1x256x196xf32>
    %1 = vector.shape_cast %0 : vector<1x256x196xf32> to vector<256x196xf32>
    %c0_2 = arith.constant 0 : index
    %c0_3 = arith.constant 0 : index
    %2 = vector.load %arg1[%c0_2, %c0_3] : memref<256x1536xf32, #tpu.memory_space<vmem>>, vector<256x256xf32>
    %cst = arith.constant dense<0.000000e+00> : vector<256x196xf32>
    %3 = tpu.matmul %2, %1, %cst {dimension_numbers = #tpu.dot_dimension_numbers<[1], [0], [0], [1], [0, 0, 1, 1], [], []>} : vector<256x256xf32>, vector<256x196xf32>, vector<256x196xf32> -> vector<256x196xf32>
    %c0_4 = arith.constant 0 : index
    %c256 = arith.constant 256 : index
    %4 = vector.load %arg1[%c0_4, %c256] : memref<256x1536xf32, #tpu.memory_space<vmem>>, vector<256x256xf32>
    %cst_5 = arith.constant dense<0.000000e+00> : vector<256x196xf32>
    %5 = tpu.matmul %4, %1, %cst_5 {dimension_numbers = #tpu.dot_dimension_numbers<[1], [0], [0], [1], [0, 0, 1, 1], [], []>} : vector<256x256xf32>, vector<256x196xf32>, vector<256x196xf32> -> vector<256x196xf32>
    %c1 = arith.constant 1 : index
    %c0_6 = arith.constant 0 : index
    %c0_7 = arith.constant 0 : index
    %6 = vector.load %arg0[%c1, %c0_6, %c0_7] : memref<3x256x196xf32, #tpu.memory_space<vmem>>, vector<1x256x196xf32>
    %7 = vector.shape_cast %6 : vector<1x256x196xf32> to vector<256x196xf32>
    %c0_8 = arith.constant 0 : index
    %c512 = arith.constant 512 : index
    %8 = vector.load %arg1[%c0_8, %c512] : memref<256x1536xf32, #tpu.memory_space<vmem>>, vector<256x256xf32>
    %cst_9 = arith.constant dense<0.000000e+00> : vector<256x196xf32>
    %9 = tpu.matmul %8, %7, %cst_9 {dimension_numbers = #tpu.dot_dimension_numbers<[1], [0], [0], [1], [0, 0, 1, 1], [], []>} : vector<256x256xf32>, vector<256x196xf32>, vector<256x196xf32> -> vector<256x196xf32>
    %10 = arith.addf %3, %9 : vector<256x196xf32>
    %c0_10 = arith.constant 0 : index
    %c768 = arith.constant 768 : index
    %11 = vector.load %arg1[%c0_10, %c768] : memref<256x1536xf32, #tpu.memory_space<vmem>>, vector<256x256xf32>
    %cst_11 = arith.constant dense<0.000000e+00> : vector<256x196xf32>
    %12 = tpu.matmul %11, %7, %cst_11 {dimension_numbers = #tpu.dot_dimension_numbers<[1], [0], [0], [1], [0, 0, 1, 1], [], []>} : vector<256x256xf32>, vector<256x196xf32>, vector<256x196xf32> -> vector<256x196xf32>
    %13 = arith.addf %5, %12 : vector<256x196xf32>
    %c2 = arith.constant 2 : index
    %c0_12 = arith.constant 0 : index
    %c0_13 = arith.constant 0 : index
    %14 = vector.load %arg0[%c2, %c0_12, %c0_13] : memref<3x256x196xf32, #tpu.memory_space<vmem>>, vector<1x256x196xf32>
    %15 = vector.shape_cast %14 : vector<1x256x196xf32> to vector<256x196xf32>
    %c0_14 = arith.constant 0 : index
    %c1024 = arith.constant 1024 : index
    %16 = vector.load %arg1[%c0_14, %c1024] : memref<256x1536xf32, #tpu.memory_space<vmem>>, vector<256x256xf32>
    %cst_15 = arith.constant dense<0.000000e+00> : vector<256x196xf32>
    %17 = tpu.matmul %16, %15, %cst_15 {dimension_numbers = #tpu.dot_dimension_numbers<[1], [0], [0], [1], [0, 0, 1, 1], [], []>} : vector<256x256xf32>, vector<256x196xf32>, vector<256x196xf32> -> vector<256x196xf32>
    %18 = arith.addf %10, %17 : vector<256x196xf32>
    %c0_16 = arith.constant 0 : index
    %c1280 = arith.constant 1280 : index
    %19 = vector.load %arg1[%c0_16, %c1280] : memref<256x1536xf32, #tpu.memory_space<vmem>>, vector<256x256xf32>
    %cst_17 = arith.constant dense<0.000000e+00> : vector<256x196xf32>
    %20 = tpu.matmul %19, %15, %cst_17 {dimension_numbers = #tpu.dot_dimension_numbers<[1], [0], [0], [1], [0, 0, 1, 1], [], []>} : vector<256x256xf32>, vector<256x196xf32>, vector<256x196xf32> -> vector<256x196xf32>
    %21 = arith.addf %13, %20 : vector<256x196xf32>
    %c0_18 = arith.constant 0 : index
    %c0_19 = arith.constant 0 : index
    %22 = vector.load %arg2[%c0_18, %c0_19] : memref<256x196xf32, #tpu.memory_space<vmem>>, vector<256x196xf32>
    tpu.vector_store %arg2[%c0_18, %c0_19], %18 {strides = array<i32>} : memref<256x196xf32, #tpu.memory_space<vmem>>, vector<256x196xf32>,
    %c0_20 = arith.constant 0 : index
    %c0_21 = arith.constant 0 : index
    %23 = vector.load %arg3[%c0_20, %c0_21] : memref<256x196xf32, #tpu.memory_space<vmem>>, vector<256x196xf32>
    tpu.vector_store %arg3[%c0_20, %c0_21], %21 {strides = array<i32>} : memref<256x196xf32, #tpu.memory_space<vmem>>, vector<256x196xf32>,
    return
  }
}

</mosaic_0001>

<bundles_post_ra>
// kernel: kernel_generated_4_forward.1
= control target key start
LH: loop header
LB: loop body
LE: loop exit
PB: predicated region body
PF: predicated region fallthrough
CT: control target
= control target key end

     0   :  { %vm2262_vm0 = vcmask 556032   ;;  %s5618_s0 = inlined_call_operand.vmem [shape: f32[3,256,196], index: 0, kind: input, shape index: {}]   ;;  %s5619_s1 = inlined_call_operand.vmem [shape: f32[256,1536], index: 1, kind: input, shape index: {}]   ;;  %s5620_s2 = inlined_call_operand.vmem [shape: f32[256,196], index: 2, kind: output, shape index: {0}]   ;;  %s5621_s3 = inlined_call_operand.vmem [shape: f32[256,196], index: 3, kind: output, shape index: {1}]  }
   0x1   :  { %v2549_v0 = vld [vmem:[%s5618_s0 + $0x2f8] sm:$0xff]  ;;  %v2559_v2 = vld [vmem:[%s5618_s0 + $0x2f0] sm:$0xff]  ;;  %v2571_v4 = vld [vmem:[%s5618_s0 + $0x2e8] sm:$0xff] }
   0x2   :  { %v2554_v1 = vld [vmem:[%s5618_s0 + $0xf8] sm:$0xff]  ;;  %334 = vmatprep.subr.mxu0 %v2549_v0  ;;  %v2566_v3 = vld [vmem:[%s5618_s0 + $0xf0] sm:$0xff]  ;;  %v2576_v5 = vld [vmem:[%s5618_s0 + $0xe8] sm:$0xff] }
   0x3   :  { %591 = vmatprep.subr.mxu1 %v2554_v1  ;;  %335 = vmatpush1.msra.mxu0 %v2559_v2  ;;  %v2583_v6 = vld [vmem:[%s5618_s0 + $0x2e0] sm:$0xff]  ;;  %v2593_v8 = vld [vmem:[%s5618_s0 + $0x2d8] sm:$0xff]  ;;  %v2605_v10 = vld [vmem:[%s5618_s0 + $0x2d0] sm:$0xff] }
   0x4   :  { %592 = vmatpush1.msra.mxu1 %v2566_v3  ;;  %v2588_v7 = vld [vmem:[%s5618_s0 + $0xe0] sm:$0xff]  ;;  %336 = vmatprep.subr.mxu0 %v2571_v4  ;;  %v2600_v9 = vld [vmem:[%s5618_s0 + $0xd8] sm:$0xff]  ;;  %v2610_v11 = vld [vmem:[%s5618_s0 + $0xd0] sm:$0xff] }
   0x5   :  { %593 = vmatprep.subr.mxu1 %v2576_v5  ;;  %337 = vmatpush1.msra.mxu0 %v2583_v6  ;;  %v2617_v12 = vld [vmem:[%s5618_s0 + $0x2c8] sm:$0xff]  ;;  %v2629_v14 = vld [vmem:[%s5618_s0 + $0x2c0] sm:$0xff]  ;;  %v2641_v16 = vld [vmem:[%s5618_s0 + $0x2b8] sm:$0xff] }
   0x6   :  { %594 = vmatpush1.msra.mxu1 %v2588_v7  ;;  %v2622_v13 = vld [vmem:[%s5618_s0 + $0xc8] sm:$0xff]  ;;  %338 = vmatprep.subr.mxu0 %v2593_v8  ;;  %v2634_v15 = vld [vmem:[%s5618_s0 + $0xc0] sm:$0xff]  ;;  %v2646_v17 = vld [vmem:[%s5618_s0 + $0xb8] sm:$0xff] }
   0x7   :  { %595 = vmatprep.subr.mxu1 %v2600_v9  ;;  %339 = vmatpush1.msra.mxu0 %v2605_v10  ;;  %v2653_v18 = vld [vmem:[%s5618_s0 + $0x2b0] sm:$0xff]  ;;  %v2665_v20 = vld [vmem:[%s5618_s0 + $0x2a8] sm:$0xff]  ;;  %v2677_v22 = vld [vmem:[%s5618_s0 + $0x2a0] sm:$0xff] }
   0x8   :  { %596 = vmatpush1.msra.mxu1 %v2610_v11  ;;  %340 = vmatprep.subr.mxu0 %v2617_v12  ;;  %v2658_v19 = vld [vmem:[%s5618_s0 + $0xb0] sm:$0xff]  ;;  %v2670_v21 = vld [vmem:[%s5618_s0 + $0xa8] sm:$0xff]  ;;  %v2682_v23 = vld [vmem:[%s5618_s0 + $0xa0] sm:$0xff] }
   0x9   :  { %597 = vmatprep.subr.mxu1 %v2622_v13  ;;  %341 = vmatpush1.msra.mxu0 %v2629_v14  ;;  %v2689_v24 = vld [vmem:[%s5618_s0 + $0x298] sm:$0xff]  ;;  %v2701_v26 = vld [vmem:[%s5618_s0 + $0x290] sm:$0xff]  ;;  %v2713_v28 = vld [vmem:[%s5618_s0 + $0x288] sm:$0xff] }
   0xa   :  { %598 = vmatpush1.msra.mxu1 %v2634_v15  ;;  %342 = vmatprep.subr.mxu0 %v2641_v16  ;;  %v2694_v25 = vld [vmem:[%s5618_s0 + $0x98] sm:$0xff]  ;;  %v2706_v27 = vld [vmem:[%s5618_s0 + $0x90] sm:$0xff]  ;;  %v2718_v29 = vld [vmem:[%s5618_s0 + $0x88] sm:$0xff] }
   0xb   :  { %599 = vmatprep.subr.mxu1 %v2646_v17  ;;  %343 = vmatpush1.msra.mxu0 %v2653_v18  ;;  %v2725_v30 = vld [vmem:[%s5618_s0 + $0x280] sm:$0xff]  ;;  %v2737_v32 = vld [vmem:[%s5618_s0 + $0x278] sm:$0xff]  ;;  %v2749_v34 = vld [vmem:[%s5618_s0 + $0x270] sm:$0xff] }
   0xc   :  { %600 = vmatpush1.msra.mxu1 %v2658_v19  ;;  %344 = vmatprep.subr.mxu0 %v2665_v20  ;;  %v2730_v31 = vld [vmem:[%s5618_s0 + $0x80] sm:$0xff]  ;;  %v2742_v33 = vld [vmem:[%s5618_s0 + $0x78] sm:$0xff]  ;;  %v2754_v35 = vld [vmem:[%s5618_s0 + $0x70] sm:$0xff] }
   0xd   :  { %601 = vmatprep.subr.mxu1 %v2670_v21  ;;  %345 = vmatpush1.msra.mxu0 %v2677_v22  ;;  %v2761_v36 = vld [vmem:[%s5618_s0 + $0x268] sm:$0xff]  ;;  %v2773_v38 = vld [vmem:[%s5618_s0 + $0x260] sm:$0xff]  ;;  %v2785_v40 = vld [vmem:[%s5618_s0 + $0x258] sm:$0xff] }
   0xe   :  { %602 = vmatpush1.msra.mxu1 %v2682_v23  ;;  %346 = vmatprep.subr.mxu0 %v2689_v24  ;;  %v2766_v37 = vld [vmem:[%s5618_s0 + $0x68] sm:$0xff]  ;;  %v2778_v39 = vld [vmem:[%s5618_s0 + $0x60] sm:$0xff]  ;;  %v2790_v41 = vld [vmem:[%s5618_s0 + $0x58] sm:$0xff] }
   0xf   :  { %603 = vmatprep.subr.mxu1 %v2694_v25  ;;  %347 = vmatpush1.msra.mxu0 %v2701_v26  ;;  %v2797_v42 = vld [vmem:[%s5618_s0 + $0x250] sm:$0xff]  ;;  %v2809_v44 = vld [vmem:[%s5618_s0 + $0x248] sm:$0xff]  ;;  %v2821_v46 = vld [vmem:[%s5618_s0 + $0x240] sm:$0xff] }
  0x10   :  { %604 = vmatpush1.msra.mxu1 %v2706_v27  ;;  %348 = vmatprep.subr.mxu0 %v2713_v28  ;;  %v2802_v43 = vld [vmem:[%s5618_s0 + $0x50] sm:$0xff]  ;;  %v2814_v45 = vld [vmem:[%s5618_s0 + $0x48] sm:$0xff]  ;;  %v2826_v47 = vld [vmem:[%s5618_s0 + $0x40] sm:$0xff] }
  0x11   :  { %605 = vmatprep.subr.mxu1 %v2718_v29  ;;  %349 = vmatpush1.msra.mxu0 %v2725_v30  ;;  %v2833_v48 = vld [vmem:[%s5618_s0 + $0x238] sm:$0xff]  ;;  %v2845_v50 = vld [vmem:[%s5618_s0 + $0x230] sm:$0xff]  ;;  %v2857_v52 = vld [vmem:[%s5618_s0 + $0x228] sm:$0xff] }
  0x12   :  { %606 = vmatpush1.msra.mxu1 %v2730_v31  ;;  %350 = vmatprep.subr.mxu0 %v2737_v32  ;;  %v2838_v49 = vld [vmem:[%s5618_s0 + $0x38] sm:$0xff]  ;;  %v2850_v51 = vld [vmem:[%s5618_s0 + $0x30] sm:$0xff]  ;;  %v2862_v53 = vld [vmem:[%s5618_s0 + $0x28] sm:$0xff] }
  0x13   :  { %607 = vmatprep.subr.mxu1 %v2742_v33  ;;  %351 = vmatpush1.msra.mxu0 %v2749_v34  ;;  %v2869_v54 = vld [vmem:[%s5618_s0 + $0x220] sm:$0xff]  ;;  %v2881_v56 = vld [vmem:[%s5618_s0 + $0x218] sm:$0xff]  ;;  %v2893_v58 = vld [vmem:[%s5618_s0 + $0x210] sm:$0xff] }
  0x14   :  { %608 = vmatpush1.msra.mxu1 %v2754_v35  ;;  %352 = vmatprep.subr.mxu0 %v2761_v36  ;;  %v2874_v55 = vld [vmem:[%s5618_s0 + $0x20] sm:$0xff]  ;;  %5693 = vst [vmem:[#allocation3_spill] sm:$0xff] %v2881_v56  ;;  %v2886_v57 = vld [vmem:[%s5618_s0 + $0x18] sm:$0xff]  ;;  %5695 = vst [vmem:[#allocation5_spill] sm:$0xff] %v2893_v58 }
  0x15   :  { %609 = vmatprep.subr.mxu1 %v2766_v37  ;;  %353 = vmatpush1.msra.mxu0 %v2773_v38  ;;  %5692 = vst [vmem:[#allocation2_spill] sm:$0xff] %v2874_v55  ;;  %5694 = vst [vmem:[#allocation4_spill] sm:$0xff] %v2886_v57  ;;  %v2898_v59 = vld [vmem:[%s5618_s0 + $0x10] sm:$0xff]  ;;  %v2905_v60 = vld [vmem:[%s5618_s0 + $0x208] sm:$0xff] }
  0x16   :  { %610 = vmatpush1.msra.mxu1 %v2778_v39  ;;  %354 = vmatprep.subr.mxu0 %v2785_v40  ;;  %5696 = vst [vmem:[#allocation6_spill] sm:$0xff] %v2898_v59  ;;  %5697 = vst [vmem:[#allocation7_spill] sm:$0xff] %v2905_v60  ;;  %v2910_v61 = vld [vmem:[%s5618_s0 + $0x8] sm:$0xff]  ;;  %v2917_v62 = vld [vmem:[%s5618_s0 + $0x200] sm:$0xff] }
  0x17   :  { %611 = vmatprep.subr.mxu1 %v2790_v41  ;;  %355 = vmatpush1.msra.mxu0 %v2797_v42  ;;  %5698 = vst [vmem:[#allocation8_spill] sm:$0xff] %v2910_v61  ;;  %5699 = vst [vmem:[#allocation9_spill] sm:$0xff] %v2917_v62  ;;  %v2922_v63 = vld [vmem:[%s5618_s0] sm:$0xff] }
  0x18   :  { %612 = vmatpush1.msra.mxu1 %v2802_v43  ;;  %356 = vmatprep.subr.mxu0 %v2809_v44  ;;  %5700 = vst [vmem:[#allocation10_spill] sm:$0xff] %v2922_v63 }
  0x19   :  { %613 = vmatprep.subr.mxu1 %v2814_v45  ;;  %357 = vmatpush1.msra.mxu0 %v2821_v46 }
  0x1a   :  { %614 = vmatpush1.msra.mxu1 %v2826_v47  ;;  %358 = vmatprep.subr.mxu0 %v2833_v48 }
  0x1b   :  { %615 = vmatprep.subr.mxu1 %v2838_v49  ;;  %359 = vmatpush1.msra.mxu0 %v2845_v50 }
  0x1c   :  { %616 = vmatpush1.msra.mxu1 %v2850_v51  ;;  %360 = vmatprep.subr.mxu0 %v2857_v52 }
  0x1d   :  { %617 = vmatprep.subr.mxu1 %v2862_v53  ;;  %361 = vmatpush1.msra.mxu0 %v2869_v54 }
  0x1e   :  { %618 = vmatpush1.msra.mxu1 %v2874_v55  ;;  %362 = vmatprep.subr.mxu0 %v2881_v56  ;;  %v2929_v56 = vld [vmem:[%s5618_s0 + $0x3f8] sm:$0xff]  ;;  %v3311_v55 = vld [vmem:[%s5618_s0 + $0x100] sm:$0xff] }
  0x1f   :  { %619 = vmatprep.subr.mxu1 %v2886_v57  ;;  %363 = vmatpush1.msra.mxu0 %v2893_v58  ;;  %5701 = vst [vmem:[#allocation11_spill] sm:$0xff] %v2929_v56  ;;  %v2934_v57 = vld [vmem:[%s5618_s0 + $0x1f8] sm:$0xff]  ;;  %v2941_v58 = vld [vmem:[%s5618_s0 + $0x3f0] sm:$0xff] }
  0x20   :  { %620 = vmatpush1.msra.mxu1 %v2898_v59  ;;  %5702 = vst [vmem:[#allocation12_spill] sm:$0xff] %v2934_v57  ;;  %364 = vmatprep.subr.mxu0 %v2905_v60  ;;  %5703 = vst [vmem:[#allocation13_spill] sm:$0xff] %v2941_v58  ;;  %v2946_v59 = vld [vmem:[%s5618_s0 + $0x1f0] sm:$0xff]  ;;  %v2953_v60 = vld [vmem:[%s5618_s0 + $0x3e8] sm:$0xff] }
  0x21   :  { %621 = vmatprep.subr.mxu1 %v2910_v61  ;;  %5704 = vst [vmem:[#allocation14_spill] sm:$0xff] %v2946_v59  ;;  %365 = vmatpush1.msra.mxu0 %v2917_v62  ;;  %5705 = vst [vmem:[#allocation15_spill] sm:$0xff] %v2953_v60  ;;  %v2958_v61 = vld [vmem:[%s5618_s0 + $0x1e8] sm:$0xff]  ;;  %v2965_v62 = vld [vmem:[%s5618_s0 + $0x3e0] sm:$0xff] }
  0x22   :  { %622 = vmatpush1.msra.mxu1 %v2922_v63  ;;  %5706 = vst [vmem:[#allocation16_spill] sm:$0xff] %v2958_v61  ;;  %366 = vmatprep.subr.mxu0 %v2929_v56  ;;  %5707 = vst [vmem:[#allocation17_spill] sm:$0xff] %v2965_v62  ;;  %v2970_v63 = vld [vmem:[%s5618_s0 + $0x1e0] sm:$0xff]  ;;  %v2977_v56 = vld [vmem:[%s5618_s0 + $0x3d8] sm:$0xff] }
  0x23   :  { %623 = vmatprep.subr.mxu1 %v2934_v57  ;;  %5708 = vst [vmem:[#allocation18_spill] sm:$0xff] %v2970_v63  ;;  %367 = vmatpush2.msra.mxu0 %v2941_v58  ;;  %5709 = vst [vmem:[#allocation19_spill] sm:$0xff] %v2977_v56  ;;  %v2982_v57 = vld [vmem:[%s5618_s0 + $0x1d8] sm:$0xff]  ;;  %v2989_v58 = vld [vmem:[%s5618_s0 + $0x3d0] sm:$0xff] }
  0x24   :  { %624 = vmatpush2.msra.mxu1 %v2946_v59  ;;  %5710 = vst [vmem:[#allocation20_spill] sm:$0xff] %v2982_v57  ;;  %368 = vmatprep.subr.mxu0 %v2953_v60  ;;  %5711 = vst [vmem:[#allocation21_spill] sm:$0xff] %v2989_v58  ;;  %v2994_v59 = vld [vmem:[%s5618_s0 + $0x1d0] sm:$0xff]  ;;  %v3001_v60 = vld [vmem:[%s5618_s0 + $0x3c8] sm:$0xff] }
  0x25   :  { %625 = vmatprep.subr.mxu1 %v2958_v61  ;;  %5712 = vst [vmem:[#allocation22_spill] sm:$0xff] %v2994_v59  ;;  %369 = vmatpush2.msra.mxu0 %v2965_v62  ;;  %5713 = vst [vmem:[#allocation23_spill] sm:$0xff] %v3001_v60  ;;  %v3006_v61 = vld [vmem:[%s5618_s0 + $0x1c8] sm:$0xff]  ;;  %v3013_v62 = vld [vmem:[%s5618_s0 + $0x3c0] sm:$0xff] }
  0x26   :  { %626 = vmatpush2.msra.mxu1 %v2970_v63  ;;  %5714 = vst [vmem:[#allocation24_spill] sm:$0xff] %v3006_v61  ;;  %370 = vmatprep.subr.mxu0 %v2977_v56  ;;  %5715 = vst [vmem:[#allocation25_spill] sm:$0xff] %v3013_v62  ;;  %v3018_v63 = vld [vmem:[%s5618_s0 + $0x1c0] sm:$0xff]  ;;  %v3025_v56 = vld [vmem:[%s5618_s0 + $0x3b8] sm:$0xff] }
  0x27   :  { %627 = vmatprep.subr.mxu1 %v2982_v57  ;;  %5716 = vst [vmem:[#allocation26_spill] sm:$0xff] %v3018_v63  ;;  %371 = vmatpush2.msra.mxu0 %v2989_v58  ;;  %5717 = vst [vmem:[#allocation27_spill] sm:$0xff] %v3025_v56  ;;  %v3030_v57 = vld [vmem:[%s5618_s0 + $0x1b8] sm:$0xff]  ;;  %v3037_v58 = vld [vmem:[%s5618_s0 + $0x3b0] sm:$0xff] }
  0x28   :  { %628 = vmatpush2.msra.mxu1 %v2994_v59  ;;  %5718 = vst [vmem:[#allocation28_spill] sm:$0xff] %v3030_v57  ;;  %372 = vmatprep.subr.mxu0 %v3001_v60  ;;  %5719 = vst [vmem:[#allocation29_spill] sm:$0xff] %v3037_v58  ;;  %v3042_v59 = vld [vmem:[%s5618_s0 + $0x1b0] sm:$0xff]  ;;  %v3049_v60 = vld [vmem:[%s5618_s0 + $0x3a8] sm:$0xff] }
  0x29   :  { %629 = vmatprep.subr.mxu1 %v3006_v61  ;;  %5720 = vst [vmem:[#allocation30_spill] sm:$0xff] %v3042_v59  ;;  %373 = vmatpush2.msra.mxu0 %v3013_v62  ;;  %5721 = vst [vmem:[#allocation31_spill] sm:$0xff] %v3049_v60  ;;  %v3054_v61 = vld [vmem:[%s5618_s0 + $0x1a8] sm:$0xff]  ;;  %v3061_v62 = vld [vmem:[%s5618_s0 + $0x3a0] sm:$0xff] }
  0x2a   :  { %630 = vmatpush2.msra.mxu1 %v3018_v63  ;;  %5722 = vst [vmem:[#allocation32_spill] sm:$0xff] %v3054_v61  ;;  %374 = vmatprep.subr.mxu0 %v3025_v56  ;;  %5723 = vst [vmem:[#allocation33_spill] sm:$0xff] %v3061_v62  ;;  %v3066_v63 = vld [vmem:[%s5618_s0 + $0x1a0] sm:$0xff]  ;;  %v3073_v56 = vld [vmem:[%s5618_s0 + $0x398] sm:$0xff] }
  0x2b   :  { %631 = vmatprep.subr.mxu1 %v3030_v57  ;;  %5724 = vst [vmem:[#allocation34_spill] sm:$0xff] %v3066_v63  ;;  %375 = vmatpush2.msra.mxu0 %v3037_v58  ;;  %5725 = vst [vmem:[#allocation35_spill] sm:$0xff] %v3073_v56  ;;  %v3078_v57 = vld [vmem:[%s5618_s0 + $0x198] sm:$0xff]  ;;  %v3085_v58 = vld [vmem:[%s5618_s0 + $0x390] sm:$0xff] }
  0x2c   :  { %632 = vmatpush2.msra.mxu1 %v3042_v59  ;;  %5726 = vst [vmem:[#allocation36_spill] sm:$0xff] %v3078_v57  ;;  %376 = vmatprep.subr.mxu0 %v3049_v60  ;;  %5727 = vst [vmem:[#allocation37_spill] sm:$0xff] %v3085_v58  ;;  %v3090_v59 = vld [vmem:[%s5618_s0 + $0x190] sm:$0xff]  ;;  %v3097_v60 = vld [vmem:[%s5618_s0 + $0x388] sm:$0xff] }
  0x2d   :  { %633 = vmatprep.subr.mxu1 %v3054_v61  ;;  %5728 = vst [vmem:[#allocation38_spill] sm:$0xff] %v3090_v59  ;;  %377 = vmatpush2.msra.mxu0 %v3061_v62  ;;  %5729 = vst [vmem:[#allocation39_spill] sm:$0xff] %v3097_v60  ;;  %v3102_v61 = vld [vmem:[%s5618_s0 + $0x188] sm:$0xff]  ;;  %v3109_v62 = vld [vmem:[%s5618_s0 + $0x380] sm:$0xff] }
  0x2e   :  { %634 = vmatpush2.msra.mxu1 %v3066_v63  ;;  %5730 = vst [vmem:[#allocation40_spill] sm:$0xff] %v3102_v61  ;;  %378 = vmatprep.subr.mxu0 %v3073_v56  ;;  %5731 = vst [vmem:[#allocation41_spill] sm:$0xff] %v3109_v62  ;;  %v3114_v63 = vld [vmem:[%s5618_s0 + $0x180] sm:$0xff]  ;;  %v3121_v56 = vld [vmem:[%s5618_s0 + $0x378] sm:$0xff] }
  0x2f   :  { %635 = vmatprep.subr.mxu1 %v3078_v57  ;;  %5732 = vst [vmem:[#allocation42_spill] sm:$0xff] %v3114_v63  ;;  %379 = vmatpush2.msra.mxu0 %v3085_v58  ;;  %5733 = vst [vmem:[#allocation43_spill] sm:$0xff] %v3121_v56  ;;  %v3126_v57 = vld [vmem:[%s5618_s0 + $0x178] sm:$0xff]  ;;  %v3133_v58 = vld [vmem:[%s5618_s0 + $0x370] sm:$0xff] }
  0x30   :  { %636 = vmatpush2.msra.mxu1 %v3090_v59  ;;  %5734 = vst [vmem:[#allocation44_spill] sm:$0xff] %v3126_v57  ;;  %380 = vmatprep.subr.mxu0 %v3097_v60  ;;  %5735 = vst [vmem:[#allocation45_spill] sm:$0xff] %v3133_v58  ;;  %v3138_v59 = vld [vmem:[%s5618_s0 + $0x170] sm:$0xff]  ;;  %v3145_v60 = vld [vmem:[%s5618_s0 + $0x368] sm:$0xff] }
  0x31   :  { %637 = vmatprep.subr.mxu1 %v3102_v61  ;;  %5736 = vst [vmem:[#allocation46_spill] sm:$0xff] %v3138_v59  ;;  %381 = vmatpush2.msra.mxu0 %v3109_v62  ;;  %5737 = vst [vmem:[#allocation47_spill] sm:$0xff] %v3145_v60  ;;  %v3150_v61 = vld [vmem:[%s5618_s0 + $0x168] sm:$0xff]  ;;  %v3157_v62 = vld [vmem:[%s5618_s0 + $0x360] sm:$0xff] }
  0x32   :  { %638 = vmatpush2.msra.mxu1 %v3114_v63  ;;  %5738 = vst [vmem:[#allocation48_spill] sm:$0xff] %v3150_v61  ;;  %382 = vmatprep.subr.mxu0 %v3121_v56  ;;  %5739 = vst [vmem:[#allocation49_spill] sm:$0xff] %v3157_v62  ;;  %v3162_v63 = vld [vmem:[%s5618_s0 + $0x160] sm:$0xff]  ;;  %v3169_v56 = vld [vmem:[%s5618_s0 + $0x358] sm:$0xff] }
  0x33   :  { %639 = vmatprep.subr.mxu1 %v3126_v57  ;;  %5740 = vst [vmem:[#allocation50_spill] sm:$0xff] %v3162_v63  ;;  %383 = vmatpush2.msra.mxu0 %v3133_v58  ;;  %5741 = vst [vmem:[#allocation51_spill] sm:$0xff] %v3169_v56  ;;  %v3174_v57 = vld [vmem:[%s5618_s0 + $0x158] sm:$0xff]  ;;  %v3181_v58 = vld [vmem:[%s5618_s0 + $0x350] sm:$0xff] }
  0x34   :  { %640 = vmatpush2.msra.mxu1 %v3138_v59  ;;  %5742 = vst [vmem:[#allocation52_spill] sm:$0xff] %v3174_v57  ;;  %384 = vmatprep.subr.mxu0 %v3145_v60  ;;  %5743 = vst [vmem:[#allocation53_spill] sm:$0xff] %v3181_v58  ;;  %v3186_v59 = vld [vmem:[%s5618_s0 + $0x150] sm:$0xff]  ;;  %v3193_v60 = vld [vmem:[%s5618_s0 + $0x348] sm:$0xff] }
  0x35   :  { %641 = vmatprep.subr.mxu1 %v3150_v61  ;;  %5744 = vst [vmem:[#allocation54_spill] sm:$0xff] %v3186_v59  ;;  %385 = vmatpush2.msra.mxu0 %v3157_v62  ;;  %5745 = vst [vmem:[#allocation55_spill] sm:$0xff] %v3193_v60  ;;  %v3198_v61 = vld [vmem:[%s5618_s0 + $0x148] sm:$0xff]  ;;  %v3205_v62 = vld [vmem:[%s5618_s0 + $0x340] sm:$0xff] }
  0x36   :  { %642 = vmatpush2.msra.mxu1 %v3162_v63  ;;  %5746 = vst [vmem:[#allocation56_spill] sm:$0xff] %v3198_v61  ;;  %386 = vmatprep.subr.mxu0 %v3169_v56  ;;  %5747 = vst [vmem:[#allocation57_spill] sm:$0xff] %v3205_v62  ;;  %v3210_v63 = vld [vmem:[%s5618_s0 + $0x140] sm:$0xff]  ;;  %v3217_v56 = vld [vmem:[%s5618_s0 + $0x338] sm:$0xff] }
  0x37   :  { %643 = vmatprep.subr.mxu1 %v3174_v57  ;;  %5748 = vst [vmem:[#allocation58_spill] sm:$0xff] %v3210_v63  ;;  %387 = vmatpush2.msra.mxu0 %v3181_v58  ;;  %5749 = vst [vmem:[#allocation59_spill] sm:$0xff] %v3217_v56  ;;  %v3222_v57 = vld [vmem:[%s5618_s0 + $0x138] sm:$0xff]  ;;  %v3229_v58 = vld [vmem:[%s5618_s0 + $0x330] sm:$0xff] }
  0x38   :  { %644 = vmatpush2.msra.mxu1 %v3186_v59  ;;  %5750 = vst [vmem:[#allocation60_spill] sm:$0xff] %v3222_v57  ;;  %388 = vmatprep.subr.mxu0 %v3193_v60  ;;  %5751 = vst [vmem:[#allocation61_spill] sm:$0xff] %v3229_v58  ;;  %v3234_v59 = vld [vmem:[%s5618_s0 + $0x130] sm:$0xff]  ;;  %v3241_v60 = vld [vmem:[%s5618_s0 + $0x328] sm:$0xff] }
  0x39   :  { %645 = vmatprep.subr.mxu1 %v3198_v61  ;;  %5752 = vst [vmem:[#allocation62_spill] sm:$0xff] %v3234_v59  ;;  %389 = vmatpush2.msra.mxu0 %v3205_v62  ;;  %5753 = vst [vmem:[#allocation63_spill] sm:$0xff] %v3241_v60  ;;  %v3246_v61 = vld [vmem:[%s5618_s0 + $0x128] sm:$0xff]  ;;  %v3253_v62 = vld [vmem:[%s5618_s0 + $0x320] sm:$0xff] }
  0x3a   :  { %646 = vmatpush2.msra.mxu1 %v3210_v63  ;;  %5754 = vst [vmem:[#allocation64_spill] sm:$0xff] %v3246_v61  ;;  %390 = vmatprep.subr.mxu0 %v3217_v56  ;;  %5755 = vst [vmem:[#allocation65_spill] sm:$0xff] %v3253_v62  ;;  %v3258_v63 = vld [vmem:[%s5618_s0 + $0x120] sm:$0xff]  ;;  %v3265_v56 = vld [vmem:[%s5618_s0 + $0x318] sm:$0xff] }
  0x3b   :  { %647 = vmatprep.subr.mxu1 %v3222_v57  ;;  %5756 = vst [vmem:[#allocation66_spill] sm:$0xff] %v3258_v63  ;;  %391 = vmatpush2.msra.mxu0 %v3229_v58  ;;  %5757 = vst [vmem:[#allocation67_spill] sm:$0xff] %v3265_v56  ;;  %v3270_v57 = vld [vmem:[%s5618_s0 + $0x118] sm:$0xff]  ;;  %v3277_v58 = vld [vmem:[%s5618_s0 + $0x310] sm:$0xff] }
  0x3c   :  { %648 = vmatpush2.msra.mxu1 %v3234_v59  ;;  %5758 = vst [vmem:[#allocation68_spill] sm:$0xff] %v3270_v57  ;;  %392 = vmatprep.subr.mxu0 %v3241_v60  ;;  %v3282_v59 = vld [vmem:[%s5618_s0 + $0x110] sm:$0xff]  ;;  %v3289_v60 = vld [vmem:[%s5618_s0 + $0x308] sm:$0xff] }
  0x3d   :  { %649 = vmatprep.subr.mxu1 %v3246_v61  ;;  %5759 = vst [vmem:[#allocation69_spill] sm:$0xff] %v3282_v59  ;;  %393 = vmatpush2.msra.mxu0 %v3253_v62  ;;  %5760 = vst [vmem:[#allocation70_spill] sm:$0xff] %v3289_v60  ;;  %v3294_v61 = vld [vmem:[%s5618_s0 + $0x108] sm:$0xff]  ;;  %v3301_v62 = vld [vmem:[%s5618_s0 + $0x300] sm:$0xff] }
  0x3e   :  { %650 = vmatpush2.msra.mxu1 %v3258_v63  ;;  %5761 = vst [vmem:[#allocation71_spill] sm:$0xff] %v3294_v61  ;;  %394 = vmatprep.subr.mxu0 %v3265_v56  ;;  %v271_v63 = vld [vmem:[%s5619_s1 + $0x28] sm:$0xff]  ;;  %v270_v56 = vld [vmem:[%s5619_s1 + $0x20] sm:$0xff] }
  0x3f   :  { %651 = vmatprep.subr.mxu1 %v3270_v57  ;;  %395 = vmatpush2.msra.mxu0 %v3277_v58  ;;  %v78_v57 = vld [vmem:[%s5619_s1 + $0x8] sm:$0xff] }
  0x40   :  { %652 = vmatpush2.msra.mxu1 %v3282_v59  ;;  %396 = vmatprep.subr.mxu0 %v3289_v60  ;;  %v77_v59 = vld [vmem:[%s5619_s1] sm:$0xff]  ;;  %v80_v60 = vld [vmem:[%s5619_s1 + $0x68] sm:$0xff] }
  0x41   :  { %653 = vmatprep.subr.mxu1 %v3294_v61  ;;  %397 = vmatpush2.msra.mxu0 %v3301_v62  ;;  %v273_v61 = vld [vmem:[%s5619_s1 + $0x88] sm:$0xff] }
  0x42   :  { %398 = vmatprep.mubr.f32.mxu0 %v271_v63  ;;  %654 = vmatpush2.msra.mxu1 %v3311_v55  ;;  %v272_v63 = vld [vmem:[%s5619_s1 + $0x80] sm:$0xff] }
  0x43   :  { %655 = vmatprep.mubr.f32.mxu1 %v78_v57  ;;  %399 = vmatmul.mubr.f32.vlgmr.msra.gmra.mxu0 %v270_v56  ;;  %v79_v56 = vld [vmem:[%s5619_s1 + $0x60] sm:$0xff] }
  0x44   :  { %656 = vmatmul.mubr.f32.vlgmr.msra.gmra.mxu1 %v77_v59  ;;  %912 = vmatprep.subr.mxu0 %v2549_v0  ;;  %v275_v0 = vld [vmem:[%s5619_s1 + $0xe8] sm:$0xff]  ;;  %v5762_v57 = vld [vmem:[#allocation2_spill] sm:$0xff] }
  0x45   :  { %1169 = vmatprep.subr.mxu1 %v2554_v1  ;;  %913 = vmatpush1.msra.mxu0 %v2559_v2  ;;  %v82_v1 = vld [vmem:[%s5619_s1 + $0xc8] sm:$0xff]  ;;  %v274_v2 = vld [vmem:[%s5619_s1 + $0xe0] sm:$0xff] }
  0x46   :  { %1170 = vmatpush1.msra.mxu1 %v2566_v3  ;;  %404 = vmatprep.mubr.f32.mxu0 %v273_v61  ;;  %v81_v3 = vld [vmem:[%s5619_s1 + $0xc0] sm:$0xff]  ;;  %v5763_v59 = vld [vmem:[#allocation3_spill] sm:$0xff] }
  0x47   :  { %661 = vmatprep.mubr.f32.mxu1 %v80_v60  ;;  %405 = vmatmul.mubr.f32.gmra.mxu0 %v272_v63  ;;  %v5764_v60 = vld [vmem:[#allocation4_spill] sm:$0xff]  ;;  %v107_v61 = vld [vmem:[%s5619_s1 + $0x5a0] sm:$0xff]  ;;  %v5765_v63 = vld [vmem:[#allocation5_spill] sm:$0xff] }
  0x48   :  { %662 = vmatmul.mubr.f32.gmra.mxu1 %v79_v56  ;;  %914 = vmatprep.subr.mxu0 %v2571_v4  ;;  %v277_v4 = vld [vmem:[%s5619_s1 + $0x148] sm:$0xff]  ;;  %v5766_v56 = vld [vmem:[#allocation6_spill] sm:$0xff] }
  0x49   :  { %1171 = vmatprep.subr.mxu1 %v2576_v5  ;;  %915 = vmatpush1.msra.mxu0 %v2583_v6  ;;  %v84_v5 = vld [vmem:[%s5619_s1 + $0x128] sm:$0xff]  ;;  %v276_v6 = vld [vmem:[%s5619_s1 + $0x140] sm:$0xff] }
  0x4a   :  { %1172 = vmatpush1.msra.mxu1 %v2588_v7  ;;  %410 = vmatprep.mubr.f32.mxu0 %v275_v0  ;;  %v83_v7 = vld [vmem:[%s5619_s1 + $0x120] sm:$0xff]  ;;  %v303_v0 = vld [vmem:[%s5619_s1 + $0x628] sm:$0xff] }
  0x4b   :  { %667 = vmatprep.mubr.f32.mxu1 %v82_v1  ;;  %411 = vmatmul.mubr.f32.gmra.mxu0 %v274_v2  ;;  %v110_v1 = vld [vmem:[%s5619_s1 + $0x608] sm:$0xff] }
  0x4c   :  { %668 = vmatmul.mubr.f32.gmra.mxu1 %v81_v3  ;;  %916 = vmatprep.subr.mxu0 %v2593_v8  ;;  %v279_v8 = vld [vmem:[%s5619_s1 + $0x1a8] sm:$0xff]  ;;  %v5768_v3 = vld [vmem:[#allocation8_spill] sm:$0xff] }
  0x4d   :  { %1173 = vmatprep.subr.mxu1 %v2600_v9  ;;  %917 = vmatpush1.msra.mxu0 %v2605_v10  ;;  %v86_v9 = vld [vmem:[%s5619_s1 + $0x188] sm:$0xff]  ;;  %v278_v10 = vld [vmem:[%s5619_s1 + $0x1a0] sm:$0xff] }
  0x4e   :  { %1174 = vmatpush1.msra.mxu1 %v2610_v11  ;;  %416 = vmatprep.mubr.f32.mxu0 %v277_v4  ;;  %v85_v11 = vld [vmem:[%s5619_s1 + $0x180] sm:$0xff]  ;;  %v5767_v2 = vld [vmem:[#allocation7_spill] sm:$0xff] }
  0x4f   :  { %673 = vmatprep.mubr.f32.mxu1 %v84_v5  ;;  %417 = vmatmul.mubr.f32.gmra.mxu0 %v276_v6  ;;  %v302_v4 = vld [vmem:[%s5619_s1 + $0x620] sm:$0xff]  ;;  %v5769_v6 = vld [vmem:[#allocation9_spill] sm:$0xff] }
  0x50   :  { %674 = vmatmul.mubr.f32.gmra.mxu1 %v83_v7  ;;  %918 = vmatprep.subr.mxu0 %v2617_v12  ;;  %v281_v12 = vld [vmem:[%s5619_s1 + $0x208] sm:$0xff]  ;;  %v109_v5 = vld [vmem:[%s5619_s1 + $0x600] sm:$0xff] }
  0x51   :  { %1175 = vmatprep.subr.mxu1 %v2622_v13  ;;  %919 = vmatpush1.msra.mxu0 %v2629_v14  ;;  %v88_v13 = vld [vmem:[%s5619_s1 + $0x1e8] sm:$0xff]  ;;  %v280_v14 = vld [vmem:[%s5619_s1 + $0x200] sm:$0xff] }
  0x52   :  { %1176 = vmatpush1.msra.mxu1 %v2634_v15  ;;  %422 = vmatprep.mubr.f32.mxu0 %v279_v8  ;;  %v87_v15 = vld [vmem:[%s5619_s1 + $0x1e0] sm:$0xff]  ;;  %v305_v8 = vld [vmem:[%s5619_s1 + $0x688] sm:$0xff] }
  0x53   :  { %679 = vmatprep.mubr.f32.mxu1 %v86_v9  ;;  %423 = vmatmul.mubr.f32.gmra.mxu0 %v278_v10  ;;  %v5770_v7 = vld [vmem:[#allocation10_spill] sm:$0xff]  ;;  %v112_v9 = vld [vmem:[%s5619_s1 + $0x668] sm:$0xff] }
  0x54   :  { %680 = vmatmul.mubr.f32.gmra.mxu1 %v85_v11  ;;  %920 = vmatprep.subr.mxu0 %v2641_v16  ;;  %v283_v16 = vld [vmem:[%s5619_s1 + $0x268] sm:$0xff]  ;;  %v5772_v11 = vld [vmem:[#allocation12_spill] sm:$0xff] }
  0x55   :  { %1177 = vmatprep.subr.mxu1 %v2646_v17  ;;  %921 = vmatpush1.msra.mxu0 %v2653_v18  ;;  %v90_v17 = vld [vmem:[%s5619_s1 + $0x248] sm:$0xff]  ;;  %v282_v18 = vld [vmem:[%s5619_s1 + $0x260] sm:$0xff] }
  0x56   :  { %1178 = vmatpush1.msra.mxu1 %v2658_v19  ;;  %428 = vmatprep.mubr.f32.mxu0 %v281_v12  ;;  %v89_v19 = vld [vmem:[%s5619_s1 + $0x240] sm:$0xff]  ;;  %v5771_v10 = vld [vmem:[#allocation11_spill] sm:$0xff] }
  0x57   :  { %685 = vmatprep.mubr.f32.mxu1 %v88_v13  ;;  %429 = vmatmul.mubr.f32.gmra.mxu0 %v280_v14  ;;  %v304_v12 = vld [vmem:[%s5619_s1 + $0x680] sm:$0xff]  ;;  %v5773_v14 = vld [vmem:[#allocation13_spill] sm:$0xff] }
  0x58   :  { %686 = vmatmul.mubr.f32.gmra.mxu1 %v87_v15  ;;  %922 = vmatprep.subr.mxu0 %v2665_v20  ;;  %v285_v20 = vld [vmem:[%s5619_s1 + $0x2c8] sm:$0xff]  ;;  %v111_v13 = vld [vmem:[%s5619_s1 + $0x660] sm:$0xff] }
  0x59   :  { %1179 = vmatprep.subr.mxu1 %v2670_v21  ;;  %923 = vmatpush1.msra.mxu0 %v2677_v22  ;;  %v92_v21 = vld [vmem:[%s5619_s1 + $0x2a8] sm:$0xff]  ;;  %v284_v22 = vld [vmem:[%s5619_s1 + $0x2c0] sm:$0xff] }
  0x5a   :  { %1180 = vmatpush1.msra.mxu1 %v2682_v23  ;;  %434 = vmatprep.mubr.f32.mxu0 %v283_v16  ;;  %v91_v23 = vld [vmem:[%s5619_s1 + $0x2a0] sm:$0xff]  ;;  %v307_v16 = vld [vmem:[%s5619_s1 + $0x6e8] sm:$0xff] }
  0x5b   :  { %691 = vmatprep.mubr.f32.mxu1 %v90_v17  ;;  %435 = vmatmul.mubr.f32.gmra.mxu0 %v282_v18  ;;  %v5774_v15 = vld [vmem:[#allocation14_spill] sm:$0xff]  ;;  %v114_v17 = vld [vmem:[%s5619_s1 + $0x6c8] sm:$0xff] }
  0x5c   :  { %692 = vmatmul.mubr.f32.gmra.mxu1 %v89_v19  ;;  %924 = vmatprep.subr.mxu0 %v2689_v24  ;;  %v287_v24 = vld [vmem:[%s5619_s1 + $0x328] sm:$0xff]  ;;  %v5776_v19 = vld [vmem:[#allocation16_spill] sm:$0xff] }
  0x5d   :  { %1181 = vmatprep.subr.mxu1 %v2694_v25  ;;  %925 = vmatpush1.msra.mxu0 %v2701_v26  ;;  %v94_v25 = vld [vmem:[%s5619_s1 + $0x308] sm:$0xff]  ;;  %v286_v26 = vld [vmem:[%s5619_s1 + $0x320] sm:$0xff] }
  0x5e   :  { %1182 = vmatpush1.msra.mxu1 %v2706_v27  ;;  %440 = vmatprep.mubr.f32.mxu0 %v285_v20  ;;  %v93_v27 = vld [vmem:[%s5619_s1 + $0x300] sm:$0xff]  ;;  %v5775_v18 = vld [vmem:[#allocation15_spill] sm:$0xff] }
  0x5f   :  { %697 = vmatprep.mubr.f32.mxu1 %v92_v21  ;;  %441 = vmatmul.mubr.f32.gmra.mxu0 %v284_v22  ;;  %v306_v20 = vld [vmem:[%s5619_s1 + $0x6e0] sm:$0xff]  ;;  %v5777_v22 = vld [vmem:[#allocation17_spill] sm:$0xff] }
  0x60   :  { %698 = vmatmul.mubr.f32.gmra.mxu1 %v91_v23  ;;  %926 = vmatprep.subr.mxu0 %v2713_v28  ;;  %v289_v28 = vld [vmem:[%s5619_s1 + $0x388] sm:$0xff]  ;;  %v113_v21 = vld [vmem:[%s5619_s1 + $0x6c0] sm:$0xff] }
  0x61   :  { %1183 = vmatprep.subr.mxu1 %v2718_v29  ;;  %927 = vmatpush1.msra.mxu0 %v2725_v30  ;;  %v96_v29 = vld [vmem:[%s5619_s1 + $0x368] sm:$0xff]  ;;  %v288_v30 = vld [vmem:[%s5619_s1 + $0x380] sm:$0xff] }
  0x62   :  { %1184 = vmatpush1.msra.mxu1 %v2730_v31  ;;  %446 = vmatprep.mubr.f32.mxu0 %v287_v24  ;;  %v95_v31 = vld [vmem:[%s5619_s1 + $0x360] sm:$0xff]  ;;  %v309_v24 = vld [vmem:[%s5619_s1 + $0x748] sm:$0xff] }
  0x63   :  { %703 = vmatprep.mubr.f32.mxu1 %v94_v25  ;;  %447 = vmatmul.mubr.f32.gmra.mxu0 %v286_v26  ;;  %v5778_v23 = vld [vmem:[#allocation18_spill] sm:$0xff]  ;;  %v116_v25 = vld [vmem:[%s5619_s1 + $0x728] sm:$0xff] }
  0x64   :  { %704 = vmatmul.mubr.f32.gmra.mxu1 %v93_v27  ;;  %928 = vmatprep.subr.mxu0 %v2737_v32  ;;  %v291_v32 = vld [vmem:[%s5619_s1 + $0x3e8] sm:$0xff]  ;;  %v5780_v27 = vld [vmem:[#allocation20_spill] sm:$0xff] }
  0x65   :  { %1185 = vmatprep.subr.mxu1 %v2742_v33  ;;  %929 = vmatpush1.msra.mxu0 %v2749_v34  ;;  %v98_v33 = vld [vmem:[%s5619_s1 + $0x3c8] sm:$0xff]  ;;  %v290_v34 = vld [vmem:[%s5619_s1 + $0x3e0] sm:$0xff] }
  0x66   :  { %1186 = vmatpush1.msra.mxu1 %v2754_v35  ;;  %452 = vmatprep.mubr.f32.mxu0 %v289_v28  ;;  %v97_v35 = vld [vmem:[%s5619_s1 + $0x3c0] sm:$0xff]  ;;  %v5779_v26 = vld [vmem:[#allocation19_spill] sm:$0xff] }
  0x67   :  { %709 = vmatprep.mubr.f32.mxu1 %v96_v29  ;;  %453 = vmatmul.mubr.f32.gmra.mxu0 %v288_v30  ;;  %v308_v28 = vld [vmem:[%s5619_s1 + $0x740] sm:$0xff]  ;;  %v5781_v30 = vld [vmem:[#allocation21_spill] sm:$0xff] }
  0x68   :  { %710 = vmatmul.mubr.f32.gmra.mxu1 %v95_v31  ;;  %930 = vmatprep.subr.mxu0 %v2761_v36  ;;  %v293_v36 = vld [vmem:[%s5619_s1 + $0x448] sm:$0xff]  ;;  %v115_v29 = vld [vmem:[%s5619_s1 + $0x720] sm:$0xff] }
  0x69   :  { %1187 = vmatprep.subr.mxu1 %v2766_v37  ;;  %931 = vmatpush1.msra.mxu0 %v2773_v38  ;;  %v100_v37 = vld [vmem:[%s5619_s1 + $0x428] sm:$0xff]  ;;  %v292_v38 = vld [vmem:[%s5619_s1 + $0x440] sm:$0xff] }
  0x6a   :  { %1188 = vmatpush1.msra.mxu1 %v2778_v39  ;;  %458 = vmatprep.mubr.f32.mxu0 %v291_v32  ;;  %v99_v39 = vld [vmem:[%s5619_s1 + $0x420] sm:$0xff]  ;;  %v311_v32 = vld [vmem:[%s5619_s1 + $0x7a8] sm:$0xff] }
  0x6b   :  { %715 = vmatprep.mubr.f32.mxu1 %v98_v33  ;;  %459 = vmatmul.mubr.f32.gmra.mxu0 %v290_v34  ;;  %v5782_v31 = vld [vmem:[#allocation22_spill] sm:$0xff]  ;;  %v118_v33 = vld [vmem:[%s5619_s1 + $0x788] sm:$0xff] }
  0x6c   :  { %716 = vmatmul.mubr.f32.gmra.mxu1 %v97_v35  ;;  %932 = vmatprep.subr.mxu0 %v2785_v40  ;;  %v295_v40 = vld [vmem:[%s5619_s1 + $0x4a8] sm:$0xff]  ;;  %v5784_v35 = vld [vmem:[#allocation24_spill] sm:$0xff] }
  0x6d   :  { %1189 = vmatprep.subr.mxu1 %v2790_v41  ;;  %933 = vmatpush1.msra.mxu0 %v2797_v42  ;;  %v102_v41 = vld [vmem:[%s5619_s1 + $0x488] sm:$0xff]  ;;  %v294_v42 = vld [vmem:[%s5619_s1 + $0x4a0] sm:$0xff] }
  0x6e   :  { %1190 = vmatpush1.msra.mxu1 %v2802_v43  ;;  %464 = vmatprep.mubr.f32.mxu0 %v293_v36  ;;  %v101_v43 = vld [vmem:[%s5619_s1 + $0x480] sm:$0xff]  ;;  %v5783_v34 = vld [vmem:[#allocation23_spill] sm:$0xff] }
  0x6f   :  { %721 = vmatprep.mubr.f32.mxu1 %v100_v37  ;;  %465 = vmatmul.mubr.f32.gmra.mxu0 %v292_v38  ;;  %v310_v36 = vld [vmem:[%s5619_s1 + $0x7a0] sm:$0xff]  ;;  %v5785_v38 = vld [vmem:[#allocation25_spill] sm:$0xff] }
  0x70   :  { %722 = vmatmul.mubr.f32.gmra.mxu1 %v99_v39  ;;  %934 = vmatprep.subr.mxu0 %v2809_v44  ;;  %v297_v44 = vld [vmem:[%s5619_s1 + $0x508] sm:$0xff]  ;;  %v117_v37 = vld [vmem:[%s5619_s1 + $0x780] sm:$0xff] }
  0x71   :  { %1191 = vmatprep.subr.mxu1 %v2814_v45  ;;  %935 = vmatpush1.msra.mxu0 %v2821_v46  ;;  %v104_v45 = vld [vmem:[%s5619_s1 + $0x4e8] sm:$0xff]  ;;  %v296_v46 = vld [vmem:[%s5619_s1 + $0x500] sm:$0xff] }
  0x72   :  { %1192 = vmatpush1.msra.mxu1 %v2826_v47  ;;  %470 = vmatprep.mubr.f32.mxu0 %v295_v40  ;;  %v103_v47 = vld [vmem:[%s5619_s1 + $0x4e0] sm:$0xff]  ;;  %v313_v40 = vld [vmem:[%s5619_s1 + $0x808] sm:$0xff] }
  0x73   :  { %727 = vmatprep.mubr.f32.mxu1 %v102_v41  ;;  %471 = vmatmul.mubr.f32.gmra.mxu0 %v294_v42  ;;  %v5786_v39 = vld [vmem:[#allocation26_spill] sm:$0xff]  ;;  %v120_v41 = vld [vmem:[%s5619_s1 + $0x7e8] sm:$0xff] }
  0x74   :  { %728 = vmatmul.mubr.f32.gmra.mxu1 %v101_v43  ;;  %936 = vmatprep.subr.mxu0 %v2833_v48  ;;  %v299_v48 = vld [vmem:[%s5619_s1 + $0x568] sm:$0xff]  ;;  %v5788_v43 = vld [vmem:[#allocation28_spill] sm:$0xff] }
  0x75   :  { %1193 = vmatprep.subr.mxu1 %v2838_v49  ;;  %937 = vmatpush1.msra.mxu0 %v2845_v50  ;;  %v106_v49 = vld [vmem:[%s5619_s1 + $0x548] sm:$0xff]  ;;  %v298_v50 = vld [vmem:[%s5619_s1 + $0x560] sm:$0xff] }
  0x76   :  { %1194 = vmatpush1.msra.mxu1 %v2850_v51  ;;  %476 = vmatprep.mubr.f32.mxu0 %v297_v44  ;;  %v105_v51 = vld [vmem:[%s5619_s1 + $0x540] sm:$0xff]  ;;  %v5787_v42 = vld [vmem:[#allocation27_spill] sm:$0xff] }
  0x77   :  { %733 = vmatprep.mubr.f32.mxu1 %v104_v45  ;;  %477 = vmatmul.mubr.f32.gmra.mxu0 %v296_v46  ;;  %v312_v44 = vld [vmem:[%s5619_s1 + $0x800] sm:$0xff]  ;;  %v5789_v46 = vld [vmem:[#allocation29_spill] sm:$0xff] }
  0x78   :  { %734 = vmatmul.mubr.f32.gmra.mxu1 %v103_v47  ;;  %938 = vmatprep.subr.mxu0 %v2857_v52  ;;  %v301_v52 = vld [vmem:[%s5619_s1 + $0x5c8] sm:$0xff]  ;;  %v119_v45 = vld [vmem:[%s5619_s1 + $0x7e0] sm:$0xff] }
  0x79   :  { %1195 = vmatprep.subr.mxu1 %v2862_v53  ;;  %939 = vmatpush1.msra.mxu0 %v2869_v54  ;;  %v108_v53 = vld [vmem:[%s5619_s1 + $0x5a8] sm:$0xff]  ;;  %v300_v54 = vld [vmem:[%s5619_s1 + $0x5c0] sm:$0xff] }
  0x7a   :  { %1196 = vmatpush1.msra.mxu1 %v5762_v57  ;;  %482 = vmatprep.mubr.f32.mxu0 %v299_v48  ;;  %v5790_v47 = vld [vmem:[#allocation30_spill] sm:$0xff]  ;;  %v315_v48 = vld [vmem:[%s5619_s1 + $0x868] sm:$0xff] }
  0x7b   :  { %739 = vmatprep.mubr.f32.mxu1 %v106_v49  ;;  %483 = vmatmul.mubr.f32.gmra.mxu0 %v298_v50  ;;  %v122_v49 = vld [vmem:[%s5619_s1 + $0x848] sm:$0xff]  ;;  %v314_v57 = vld [vmem:[%s5619_s1 + $0x860] sm:$0xff] }
  0x7c   :  { %740 = vmatmul.mubr.f32.gmra.mxu1 %v105_v51  ;;  %940 = vmatprep.subr.mxu0 %v5763_v59  ;;  %v5791_v50 = vld [vmem:[#allocation31_spill] sm:$0xff]  ;;  %v5792_v51 = vld [vmem:[#allocation32_spill] sm:$0xff]  ;;  %v5794_v59 = vld [vmem:[#allocation34_spill] sm:$0xff] }
  0x7d   :  { %1197 = vmatprep.subr.mxu1 %v5764_v60  ;;  %941 = vmatpush1.msra.mxu0 %v5765_v63  ;;  %v317_v60 = vld [vmem:[%s5619_s1 + $0x8c8] sm:$0xff]  ;;  %v5796_v63 = vld [vmem:[#allocation36_spill] sm:$0xff] }
  0x7e   :  { %1198 = vmatpush1.msra.mxu1 %v5766_v56  ;;  %488 = vmatprep.mubr.f32.mxu0 %v301_v52  ;;  %v121_v52 = vld [vmem:[%s5619_s1 + $0x840] sm:$0xff] }
  0x7f   :  { %745 = vmatprep.mubr.f32.mxu1 %v108_v53  ;;  %489 = vmatmul.mubr.f32.gmra.mxu0 %v300_v54  ;;  %v5793_v53 = vld [vmem:[#allocation33_spill] sm:$0xff]  ;;  %v124_v54 = vld [vmem:[%s5619_s1 + $0x8a8] sm:$0xff]  ;;  %v316_v56 = vld [vmem:[%s5619_s1 + $0x8c0] sm:$0xff] }
  0x80   :  { %746 = vmatmul.mubr.f32.gmra.mxu1 %v107_v61  ;;  %942 = vmatprep.subr.mxu0 %v5767_v2  ;;  %v5795_v61 = vld [vmem:[#allocation35_spill] sm:$0xff]  ;;  %v5798_v2 = vld [vmem:[#allocation38_spill] sm:$0xff] }
  0x81   :  { %1199 = vmatprep.subr.mxu1 %v5768_v3  ;;  %943 = vmatpush1.msra.mxu0 %v5769_v6  ;;  %v319_v3 = vld [vmem:[%s5619_s1 + $0x928] sm:$0xff]  ;;  %v5800_v6 = vld [vmem:[#allocation40_spill] sm:$0xff] }
  0x82   :  { %1200 = vmatpush1.msra.mxu1 %v5770_v7  ;;  %494 = vmatprep.mubr.f32.mxu0 %v303_v0  ;;  %v123_v0 = vld [vmem:[%s5619_s1 + $0x8a0] sm:$0xff] }
  0x83   :  { %751 = vmatprep.mubr.f32.mxu1 %v110_v1  ;;  %495 = vmatmul.mubr.f32.gmra.mxu0 %v302_v4  ;;  %v5797_v1 = vld [vmem:[#allocation37_spill] sm:$0xff]  ;;  %v126_v4 = vld [vmem:[%s5619_s1 + $0x908] sm:$0xff]  ;;  %v318_v7 = vld [vmem:[%s5619_s1 + $0x920] sm:$0xff] }
  0x84   :  { %752 = vmatmul.mubr.f32.gmra.mxu1 %v109_v5  ;;  %944 = vmatprep.subr.mxu0 %v5771_v10  ;;  %v5799_v5 = vld [vmem:[#allocation39_spill] sm:$0xff]  ;;  %v5802_v10 = vld [vmem:[#allocation42_spill] sm:$0xff] }
  0x85   :  { %1201 = vmatprep.subr.mxu1 %v5772_v11  ;;  %945 = vmatpush2.msra.mxu0 %v5773_v14  ;;  %v321_v11 = vld [vmem:[%s5619_s1 + $0x988] sm:$0xff]  ;;  %v5804_v14 = vld [vmem:[#allocation44_spill] sm:$0xff] }
  0x86   :  { %1202 = vmatpush2.msra.mxu1 %v5774_v15  ;;  %500 = vmatprep.mubr.f32.mxu0 %v305_v8  ;;  %v125_v8 = vld [vmem:[%s5619_s1 + $0x900] sm:$0xff] }
  0x87   :  { %757 = vmatprep.mubr.f32.mxu1 %v112_v9  ;;  %501 = vmatmul.mubr.f32.gmra.mxu0 %v304_v12  ;;  %v5801_v9 = vld [vmem:[#allocation41_spill] sm:$0xff]  ;;  %v128_v12 = vld [vmem:[%s5619_s1 + $0x968] sm:$0xff]  ;;  %v320_v15 = vld [vmem:[%s5619_s1 + $0x980] sm:$0xff] }
  0x88   :  { %758 = vmatmul.mubr.f32.gmra.mxu1 %v111_v13  ;;  %946 = vmatprep.subr.mxu0 %v5775_v18  ;;  %v5803_v13 = vld [vmem:[#allocation43_spill] sm:$0xff]  ;;  %v5806_v18 = vld [vmem:[#allocation46_spill] sm:$0xff] }
  0x89   :  { %1203 = vmatprep.subr.mxu1 %v5776_v19  ;;  %947 = vmatpush2.msra.mxu0 %v5777_v22  ;;  %v323_v19 = vld [vmem:[%s5619_s1 + $0x9e8] sm:$0xff]  ;;  %v5808_v22 = vld [vmem:[#allocation48_spill] sm:$0xff] }
  0x8a   :  { %1204 = vmatpush2.msra.mxu1 %v5778_v23  ;;  %506 = vmatprep.mubr.f32.mxu0 %v307_v16  ;;  %v127_v16 = vld [vmem:[%s5619_s1 + $0x960] sm:$0xff] }
  0x8b   :  { %763 = vmatprep.mubr.f32.mxu1 %v114_v17  ;;  %507 = vmatmul.mubr.f32.gmra.mxu0 %v306_v20  ;;  %v5805_v17 = vld [vmem:[#allocation45_spill] sm:$0xff]  ;;  %v130_v20 = vld [vmem:[%s5619_s1 + $0x9c8] sm:$0xff]  ;;  %v322_v23 = vld [vmem:[%s5619_s1 + $0x9e0] sm:$0xff] }
  0x8c   :  { %764 = vmatmul.mubr.f32.gmra.mxu1 %v113_v21  ;;  %948 = vmatprep.subr.mxu0 %v5779_v26  ;;  %v5807_v21 = vld [vmem:[#allocation47_spill] sm:$0xff]  ;;  %v5810_v26 = vld [vmem:[#allocation50_spill] sm:$0xff] }
  0x8d   :  { %1205 = vmatprep.subr.mxu1 %v5780_v27  ;;  %949 = vmatpush2.msra.mxu0 %v5781_v30  ;;  %v325_v27 = vld [vmem:[%s5619_s1 + $0xa48] sm:$0xff]  ;;  %v5812_v30 = vld [vmem:[#allocation52_spill] sm:$0xff] }
  0x8e   :  { %1206 = vmatpush2.msra.mxu1 %v5782_v31  ;;  %512 = vmatprep.mubr.f32.mxu0 %v309_v24  ;;  %v129_v24 = vld [vmem:[%s5619_s1 + $0x9c0] sm:$0xff] }
  0x8f   :  { %769 = vmatprep.mubr.f32.mxu1 %v116_v25  ;;  %513 = vmatmul.mubr.f32.gmra.mxu0 %v308_v28  ;;  %v5809_v25 = vld [vmem:[#allocation49_spill] sm:$0xff]  ;;  %v132_v28 = vld [vmem:[%s5619_s1 + $0xa28] sm:$0xff]  ;;  %v324_v31 = vld [vmem:[%s5619_s1 + $0xa40] sm:$0xff] }
  0x90   :  { %770 = vmatmul.mubr.f32.gmra.mxu1 %v115_v29  ;;  %950 = vmatprep.subr.mxu0 %v5783_v34  ;;  %v5811_v29 = vld [vmem:[#allocation51_spill] sm:$0xff]  ;;  %v5814_v34 = vld [vmem:[#allocation54_spill] sm:$0xff] }
  0x91   :  { %1207 = vmatprep.subr.mxu1 %v5784_v35  ;;  %951 = vmatpush2.msra.mxu0 %v5785_v38  ;;  %v327_v35 = vld [vmem:[%s5619_s1 + $0xaa8] sm:$0xff]  ;;  %v5816_v38 = vld [vmem:[#allocation56_spill] sm:$0xff] }
  0x92   :  { %1208 = vmatpush2.msra.mxu1 %v5786_v39  ;;  %518 = vmatprep.mubr.f32.mxu0 %v311_v32  ;;  %v131_v32 = vld [vmem:[%s5619_s1 + $0xa20] sm:$0xff] }
  0x93   :  { %775 = vmatprep.mubr.f32.mxu1 %v118_v33  ;;  %519 = vmatmul.mubr.f32.gmra.mxu0 %v310_v36  ;;  %v5813_v33 = vld [vmem:[#allocation53_spill] sm:$0xff]  ;;  %v134_v36 = vld [vmem:[%s5619_s1 + $0xa88] sm:$0xff]  ;;  %v326_v39 = vld [vmem:[%s5619_s1 + $0xaa0] sm:$0xff] }
  0x94   :  { %776 = vmatmul.mubr.f32.gmra.mxu1 %v117_v37  ;;  %952 = vmatprep.subr.mxu0 %v5787_v42  ;;  %v5815_v37 = vld [vmem:[#allocation55_spill] sm:$0xff]  ;;  %v5818_v42 = vld [vmem:[#allocation58_spill] sm:$0xff] }
  0x95   :  { %1209 = vmatprep.subr.mxu1 %v5788_v43  ;;  %953 = vmatpush2.msra.mxu0 %v5789_v46  ;;  %v329_v43 = vld [vmem:[%s5619_s1 + $0xb08] sm:$0xff]  ;;  %v5820_v46 = vld [vmem:[#allocation60_spill] sm:$0xff] }
  0x96   :  { %1210 = vmatpush2.msra.mxu1 %v5790_v47  ;;  %524 = vmatprep.mubr.f32.mxu0 %v313_v40  ;;  %v133_v40 = vld [vmem:[%s5619_s1 + $0xa80] sm:$0xff] }
  0x97   :  { %781 = vmatprep.mubr.f32.mxu1 %v120_v41  ;;  %525 = vmatmul.mubr.f32.gmra.mxu0 %v312_v44  ;;  %v5817_v41 = vld [vmem:[#allocation57_spill] sm:$0xff]  ;;  %v136_v44 = vld [vmem:[%s5619_s1 + $0xae8] sm:$0xff]  ;;  %v328_v47 = vld [vmem:[%s5619_s1 + $0xb00] sm:$0xff] }
  0x98   :  { %782 = vmatmul.mubr.f32.gmra.mxu1 %v119_v45  ;;  %954 = vmatprep.subr.mxu0 %v5791_v50  ;;  %v5819_v45 = vld [vmem:[#allocation59_spill] sm:$0xff]  ;;  %v5822_v50 = vld [vmem:[#allocation62_spill] sm:$0xff] }
  0x99   :  { %1211 = vmatprep.subr.mxu1 %v5792_v51  ;;  %955 = vmatpush2.msra.mxu0 %v5793_v53  ;;  %v331_v51 = vld [vmem:[%s5619_s1 + $0xb68] sm:$0xff]  ;;  %v5824_v53 = vld [vmem:[#allocation64_spill] sm:$0xff] }
  0x9a   :  { %1212 = vmatpush2.msra.mxu1 %v5794_v59  ;;  %530 = vmatprep.mubr.f32.mxu0 %v315_v48  ;;  %v135_v48 = vld [vmem:[%s5619_s1 + $0xae0] sm:$0xff] }
  0x9b   :  { %787 = vmatprep.mubr.f32.mxu1 %v122_v49  ;;  %531 = vmatmul.mubr.f32.gmra.mxu0 %v314_v57  ;;  %v5821_v49 = vld [vmem:[#allocation61_spill] sm:$0xff]  ;;  %v138_v57 = vld [vmem:[%s5619_s1 + $0xb48] sm:$0xff]  ;;  %v330_v59 = vld [vmem:[%s5619_s1 + $0xb60] sm:$0xff] }
  0x9c   :  { %788 = vmatmul.mubr.f32.gmra.mxu1 %v121_v52  ;;  %956 = vmatprep.subr.mxu0 %v5795_v61  ;;  %v5823_v52 = vld [vmem:[#allocation63_spill] sm:$0xff]  ;;  %v5826_v61 = vld [vmem:[#allocation66_spill] sm:$0xff] }
  0x9d   :  { %1213 = vmatprep.subr.mxu1 %v5796_v63  ;;  %957 = vmatpush2.msra.mxu0 %v5797_v1  ;;  %v333_v63 = vld [vmem:[%s5619_s1 + $0xbc8] sm:$0xff]  ;;  %v5828_v1 = vld [vmem:[#allocation68_spill] sm:$0xff] }
  0x9e   :  { %1214 = vmatpush2.msra.mxu1 %v5798_v2  ;;  %536 = vmatprep.mubr.f32.mxu0 %v317_v60  ;;  %v137_v60 = vld [vmem:[%s5619_s1 + $0xb40] sm:$0xff] }
  0x9f   :  { %793 = vmatprep.mubr.f32.mxu1 %v124_v54  ;;  %537 = vmatmul.mubr.f32.gmra.mxu0 %v316_v56  ;;  %v5825_v54 = vld [vmem:[#allocation65_spill] sm:$0xff]  ;;  %v140_v56 = vld [vmem:[%s5619_s1 + $0xba8] sm:$0xff]  ;;  %v332_v2 = vld [vmem:[%s5619_s1 + $0xbc0] sm:$0xff] }
  0xa0   :  { %794 = vmatmul.mubr.f32.gmra.mxu1 %v123_v0  ;;  %958 = vmatprep.subr.mxu0 %v5799_v5  ;;  %v5827_v0 = vld [vmem:[#allocation67_spill] sm:$0xff]  ;;  %v849_v5 = vld [vmem:[%s5619_s1 + $0x38] sm:$0xff] }
  0xa1   :  { %1215 = vmatprep.subr.mxu1 %v5800_v6  ;;  %959 = vmatpush2.msra.mxu0 %v5801_v9  ;;  %v142_v6 = vld [vmem:[%s5619_s1 + $0x18] sm:$0xff]  ;;  %v141_v9 = vld [vmem:[%s5619_s1 + $0x10] sm:$0xff] }
  0xa2   :  { %1216 = vmatpush2.msra.mxu1 %v5802_v10  ;;  %542 = vmatprep.mubr.f32.mxu0 %v319_v3  ;;  %v139_v3 = vld [vmem:[%s5619_s1 + $0xba0] sm:$0xff]  ;;  %v2493_v10 = vld [vmem:[%s5618_s0 + $0x4f8] sm:$0xff] }
  0xa3   :  { %799 = vmatprep.mubr.f32.mxu1 %v126_v4  ;;  %543 = vmatmul.mubr.f32.gmra.mxu0 %v318_v7  ;;  %v5829_v4 = vld [vmem:[#allocation69_spill] sm:$0xff]  ;;  %v5830_v7 = vld [vmem:[#allocation70_spill] sm:$0xff] }
  0xa4   :  { %800 = vmatmul.mubr.f32.gmra.mxu1 %v125_v8  ;;  %960 = vmatprep.subr.mxu0 %v5803_v13  ;;  %v5831_v8 = vld [vmem:[#allocation71_spill] sm:$0xff]  ;;  %v143_v13 = vld [vmem:[%s5619_s1 + $0x70] sm:$0xff] }
  0xa5   :  { %1217 = vmatprep.subr.mxu1 %v5804_v14  ;;  %961 = vmatpush2.msra.mxu0 %v5805_v17  ;;  %v2491_v14 = vld [vmem:[%s5618_s0 + $0x4e8] sm:$0xff]  ;;  %v146_v17 = vld [vmem:[%s5619_s1 + $0xd8] sm:$0xff] }
  0xa6   :  { %1218 = vmatpush2.msra.mxu1 %v5806_v18  ;;  %548 = vmatprep.mubr.f32.mxu0 %v321_v11  ;;  %v2492_v11 = vld [vmem:[%s5618_s0 + $0x4f0] sm:$0xff] }
  0xa7   :  { %805 = vmatprep.mubr.f32.mxu1 %v128_v12  ;;  %549 = vmatmul.mubr.f32.gmra.mxu0 %v320_v15  ;;  %v851_v12 = vld [vmem:[%s5619_s1 + $0x98] sm:$0xff]  ;;  %v2490_v15 = vld [vmem:[%s5618_s0 + $0x4e0] sm:$0xff]  ;;  %v852_v18 = vld [vmem:[%s5619_s1 + $0xf0] sm:$0xff] }
  0xa8   :  { %806 = vmatmul.mubr.f32.gmra.mxu1 %v127_v16  ;;  %962 = vmatprep.subr.mxu0 %v5807_v21  ;;  %v853_v16 = vld [vmem:[%s5619_s1 + $0xf8] sm:$0xff]  ;;  %v2488_v21 = vld [vmem:[%s5618_s0 + $0x4d0] sm:$0xff] }
  0xa9   :  { %1219 = vmatprep.subr.mxu1 %v5808_v22  ;;  %963 = vmatpush2.msra.mxu0 %v5809_v25  ;;  %v855_v22 = vld [vmem:[%s5619_s1 + $0x158] sm:$0xff]  ;;  %v147_v25 = vld [vmem:[%s5619_s1 + $0x130] sm:$0xff] }
  0xaa   :  { %1220 = vmatpush2.msra.mxu1 %v5810_v26  ;;  %554 = vmatprep.mubr.f32.mxu0 %v323_v19  ;;  %v145_v19 = vld [vmem:[%s5619_s1 + $0xd0] sm:$0xff]  ;;  %v2487_v26 = vld [vmem:[%s5618_s0 + $0x4c8] sm:$0xff] }
  0xab   :  { %811 = vmatprep.mubr.f32.mxu1 %v130_v20  ;;  %555 = vmatmul.mubr.f32.gmra.mxu0 %v322_v23  ;;  %v2489_v20 = vld [vmem:[%s5618_s0 + $0x4d8] sm:$0xff] }
  0xac   :  { %812 = vmatmul.mubr.f32.gmra.mxu1 %v129_v24  ;;  %964 = vmatprep.subr.mxu0 %v5811_v29  ;;  %v148_v23 = vld [vmem:[%s5619_s1 + $0x138] sm:$0xff]  ;;  %v854_v24 = vld [vmem:[%s5619_s1 + $0x150] sm:$0xff] }
  0xad   :  { %1221 = vmatprep.subr.mxu1 %v5812_v30  ;;  %965 = vmatpush2.msra.mxu0 %v5813_v33  ;;  %v150_v29 = vld [vmem:[%s5619_s1 + $0x198] sm:$0xff]  ;;  %v856_v30 = vld [vmem:[%s5619_s1 + $0x1b0] sm:$0xff] }
  0xae   :  { %1222 = vmatpush2.msra.mxu1 %v5814_v34  ;;  %560 = vmatprep.mubr.f32.mxu0 %v325_v27  ;;  %v2486_v27 = vld [vmem:[%s5618_s0 + $0x4c0] sm:$0xff]  ;;  %v2484_v33 = vld [vmem:[%s5618_s0 + $0x4b0] sm:$0xff]  ;;  %v859_v34 = vld [vmem:[%s5619_s1 + $0x218] sm:$0xff] }
  0xaf   :  { %817 = vmatprep.mubr.f32.mxu1 %v132_v28  ;;  %561 = vmatmul.mubr.f32.gmra.mxu0 %v324_v31  ;;  %v857_v28 = vld [vmem:[%s5619_s1 + $0x1b8] sm:$0xff]  ;;  %v149_v31 = vld [vmem:[%s5619_s1 + $0x190] sm:$0xff] }
  0xb0   :  { %818 = vmatmul.mubr.f32.gmra.mxu1 %v131_v32  ;;  %966 = vmatprep.subr.mxu0 %v5815_v37  ;;  %v2485_v32 = vld [vmem:[%s5618_s0 + $0x4b8] sm:$0xff]  ;;  %v151_v37 = vld [vmem:[%s5619_s1 + $0x1f0] sm:$0xff] }
  0xb1   :  { %1223 = vmatprep.subr.mxu1 %v5816_v38  ;;  %967 = vmatpush2.msra.mxu0 %v5817_v41  ;;  %v2483_v38 = vld [vmem:[%s5618_s0 + $0x4a8] sm:$0xff]  ;;  %v154_v41 = vld [vmem:[%s5619_s1 + $0x258] sm:$0xff] }
  0xb2   :  { %1224 = vmatpush2.msra.mxu1 %v5818_v42  ;;  %566 = vmatprep.mubr.f32.mxu0 %v327_v35  ;;  %v152_v35 = vld [vmem:[%s5619_s1 + $0x1f8] sm:$0xff]  ;;  %v860_v42 = vld [vmem:[%s5619_s1 + $0x270] sm:$0xff] }
  0xb3   :  { %823 = vmatprep.mubr.f32.mxu1 %v134_v36  ;;  %567 = vmatmul.mubr.f32.gmra.mxu0 %v326_v39  ;;  %v858_v36 = vld [vmem:[%s5619_s1 + $0x210] sm:$0xff]  ;;  %v2482_v39 = vld [vmem:[%s5618_s0 + $0x4a0] sm:$0xff] }
  0xb4   :  { %824 = vmatmul.mubr.f32.gmra.mxu1 %v133_v40  ;;  %968 = vmatprep.subr.mxu0 %v5819_v45  ;;  %v861_v40 = vld [vmem:[%s5619_s1 + $0x278] sm:$0xff]  ;;  %v2480_v45 = vld [vmem:[%s5618_s0 + $0x490] sm:$0xff] }
  0xb5   :  { %1225 = vmatprep.subr.mxu1 %v5820_v46  ;;  %969 = vmatpush2.msra.mxu0 %v5821_v49  ;;  %v863_v46 = vld [vmem:[%s5619_s1 + $0x2d8] sm:$0xff]  ;;  %v155_v49 = vld [vmem:[%s5619_s1 + $0x2b0] sm:$0xff] }
  0xb6   :  { %1226 = vmatpush2.msra.mxu1 %v5822_v50  ;;  %572 = vmatprep.mubr.f32.mxu0 %v329_v43  ;;  %v153_v43 = vld [vmem:[%s5619_s1 + $0x250] sm:$0xff]  ;;  %v2479_v50 = vld [vmem:[%s5618_s0 + $0x488] sm:$0xff] }
  0xb7   :  { %829 = vmatprep.mubr.f32.mxu1 %v136_v44  ;;  %573 = vmatmul.mubr.f32.gmra.mxu0 %v328_v47  ;;  %v2481_v44 = vld [vmem:[%s5618_s0 + $0x498] sm:$0xff] }
  0xb8   :  { %830 = vmatmul.mubr.f32.gmra.mxu1 %v135_v48  ;;  %970 = vmatprep.subr.mxu0 %v5823_v52  ;;  %v156_v47 = vld [vmem:[%s5619_s1 + $0x2b8] sm:$0xff]  ;;  %v862_v48 = vld [vmem:[%s5619_s1 + $0x2d0] sm:$0xff] }
  0xb9   :  { %1227 = vmatprep.subr.mxu1 %v5824_v53  ;;  %971 = vmatpush2.msra.mxu0 %v5825_v54  ;;  %v158_v52 = vld [vmem:[%s5619_s1 + $0x318] sm:$0xff]  ;;  %v864_v53 = vld [vmem:[%s5619_s1 + $0x330] sm:$0xff] }
  0xba   :  { %1228 = vmatpush2.msra.mxu1 %v5826_v61  ;;  %578 = vmatprep.mubr.f32.mxu0 %v331_v51  ;;  %v2478_v51 = vld [vmem:[%s5618_s0 + $0x480] sm:$0xff]  ;;  %v2476_v54 = vld [vmem:[%s5618_s0 + $0x470] sm:$0xff]  ;;  %v867_v61 = vld [vmem:[%s5619_s1 + $0x398] sm:$0xff] }
  0xbb   :  { %835 = vmatprep.mubr.f32.mxu1 %v138_v57  ;;  %579 = vmatmul.mubr.f32.gmra.mxu0 %v330_v59  ;;  %v865_v57 = vld [vmem:[%s5619_s1 + $0x338] sm:$0xff]  ;;  %v157_v59 = vld [vmem:[%s5619_s1 + $0x310] sm:$0xff] }
  0xbc   :  { %836 = vmatmul.mubr.f32.gmra.mxu1 %v137_v60  ;;  %972 = vmatprep.subr.mxu0 %v5827_v0  ;;  %v2477_v60 = vld [vmem:[%s5618_s0 + $0x478] sm:$0xff]  ;;  %v159_v0 = vld [vmem:[%s5619_s1 + $0x370] sm:$0xff] }
  0xbd   :  { %1229 = vmatprep.subr.mxu1 %v5828_v1  ;;  %973 = vmatpush2.msra.mxu0 %v3277_v58  ;;  %v848_v58 = vld [vmem:[%s5619_s1 + $0x30] sm:$0xff]  ;;  %v2475_v1 = vld [vmem:[%s5618_s0 + $0x468] sm:$0xff] }
  0xbe   :  { %1230 = vmatpush2.msra.mxu1 %v5829_v4  ;;  %584 = vmatprep.mubr.f32.mxu0 %v333_v63  ;;  %v160_v63 = vld [vmem:[%s5619_s1 + $0x378] sm:$0xff] }
  0xbf   :  { %841 = vmatprep.mubr.f32.mxu1 %v140_v56  ;;  %585 = vmatmul.mubr.f32.gmra.mxu0 %v332_v2  ;;  %v866_v56 = vld [vmem:[%s5619_s1 + $0x390] sm:$0xff]  ;;  %v2474_v2 = vld [vmem:[%s5618_s0 + $0x460] sm:$0xff]  ;;  %v162_v4 = vld [vmem:[%s5619_s1 + $0x3d8] sm:$0xff] }
  0xc0   :  { %842 = vmatmul.mubr.f32.gmra.mxu1 %v139_v3  ;;  %974 = vmatprep.subr.mxu0 %v5830_v7  ;;  %v869_v3 = vld [vmem:[%s5619_s1 + $0x3f8] sm:$0xff] }
  0xc1   :  { %1231 = vmatprep.subr.mxu1 %v5831_v8  ;;  %975 = vmatpush2.msra.mxu0 %v3301_v62  ;;  %v850_v62 = vld [vmem:[%s5619_s1 + $0x90] sm:$0xff]  ;;  %v2473_v7 = vld [vmem:[%s5618_s0 + $0x458] sm:$0xff] }
  0xc2   :  { %1232 = vmatpush2.msra.mxu1 %v3311_v55  ;;  %976 = vmatprep.mubr.f32.mxu0 %v849_v5  ;;  %v144_v55 = vld [vmem:[%s5619_s1 + $0x78] sm:$0xff]  ;;  %v868_v5 = vld [vmem:[%s5619_s1 + $0x3f0] sm:$0xff] }
  0xc3   :  { %1233 = vmatprep.mubr.f32.mxu1 %v142_v6  ;;  %977 = vmatmul.mubr.f32.vlgmr.msra.gmra.mxu0 %v848_v58  ;;  %v161_v6 = vld [vmem:[%s5619_s1 + $0x3d0] sm:$0xff]  ;;  %v871_v58 = vld [vmem:[%s5619_s1 + $0x458] sm:$0xff] }
  0xc4   :  { %1234 = vmatmul.mubr.f32.vlgmr.msra.gmra.mxu1 %v141_v9  ;;  %1555 = vmatprep.subr.mxu0 %v2493_v10  ;;  %v2472_v8 = vld [vmem:[%s5618_s0 + $0x450] sm:$0xff]  ;;  %v164_v9 = vld [vmem:[%s5619_s1 + $0x438] sm:$0xff] }
  0xc5   :  { %1940 = vmatprep.subr.mxu1 %v2493_v10  ;;  %1556 = vmatpush1.msra.mxu0 %v2492_v11  ;;  %v870_v10 = vld [vmem:[%s5619_s1 + $0x450] sm:$0xff] }
  0xc6   :  { %1941 = vmatpush1.msra.mxu1 %v2492_v11  ;;  %982 = vmatprep.mubr.f32.mxu0 %v851_v12  ;;  %v163_v11 = vld [vmem:[%s5619_s1 + $0x430] sm:$0xff]  ;;  %v2471_v12 = vld [vmem:[%s5618_s0 + $0x448] sm:$0xff] }
  0xc7   :  { %1239 = vmatprep.mubr.f32.mxu1 %v144_v55  ;;  %983 = vmatmul.mubr.f32.gmra.mxu0 %v850_v62  ;;  %v2470_v55 = vld [vmem:[%s5618_s0 + $0x440] sm:$0xff]  ;;  %v873_v62 = vld [vmem:[%s5619_s1 + $0x4b8] sm:$0xff] }
  0xc8   :  { %1240 = vmatmul.mubr.f32.gmra.mxu1 %v143_v13  ;;  %1557 = vmatprep.subr.mxu0 %v2491_v14  ;;  %v166_v13 = vld [vmem:[%s5619_s1 + $0x498] sm:$0xff] }
  0xc9   :  { %1942 = vmatprep.subr.mxu1 %v2491_v14  ;;  %1558 = vmatpush1.msra.mxu0 %v2490_v15  ;;  %v872_v14 = vld [vmem:[%s5619_s1 + $0x4b0] sm:$0xff] }
  0xca   :  { %1943 = vmatpush1.msra.mxu1 %v2490_v15  ;;  %988 = vmatprep.mubr.f32.mxu0 %v853_v16  ;;  %v165_v15 = vld [vmem:[%s5619_s1 + $0x490] sm:$0xff]  ;;  %v2469_v16 = vld [vmem:[%s5618_s0 + $0x438] sm:$0xff] }
  0xcb   :  { %1245 = vmatprep.mubr.f32.mxu1 %v146_v17  ;;  %989 = vmatmul.mubr.f32.gmra.mxu0 %v852_v18  ;;  %v2468_v17 = vld [vmem:[%s5618_s0 + $0x430] sm:$0xff]  ;;  %v875_v18 = vld [vmem:[%s5619_s1 + $0x518] sm:$0xff] }
  0xcc   :  { %1246 = vmatmul.mubr.f32.gmra.mxu1 %v145_v19  ;;  %1559 = vmatprep.subr.mxu0 %v2489_v20  ;;  %v168_v19 = vld [vmem:[%s5619_s1 + $0x4f8] sm:$0xff] }
  0xcd   :  { %1944 = vmatprep.subr.mxu1 %v2489_v20  ;;  %1560 = vmatpush1.msra.mxu0 %v2488_v21  ;;  %v874_v20 = vld [vmem:[%s5619_s1 + $0x510] sm:$0xff] }
  0xce   :  { %1945 = vmatpush1.msra.mxu1 %v2488_v21  ;;  %994 = vmatprep.mubr.f32.mxu0 %v855_v22  ;;  %v167_v21 = vld [vmem:[%s5619_s1 + $0x4f0] sm:$0xff]  ;;  %v2467_v22 = vld [vmem:[%s5618_s0 + $0x428] sm:$0xff] }
  0xcf   :  { %1251 = vmatprep.mubr.f32.mxu1 %v148_v23  ;;  %995 = vmatmul.mubr.f32.gmra.mxu0 %v854_v24  ;;  %v2466_v23 = vld [vmem:[%s5618_s0 + $0x420] sm:$0xff]  ;;  %v877_v24 = vld [vmem:[%s5619_s1 + $0x578] sm:$0xff] }
  0xd0   :  { %1252 = vmatmul.mubr.f32.gmra.mxu1 %v147_v25  ;;  %1561 = vmatprep.subr.mxu0 %v2487_v26  ;;  %v170_v25 = vld [vmem:[%s5619_s1 + $0x558] sm:$0xff] }
  0xd1   :  { %1946 = vmatprep.subr.mxu1 %v2487_v26  ;;  %1562 = vmatpush1.msra.mxu0 %v2486_v27  ;;  %v876_v26 = vld [vmem:[%s5619_s1 + $0x570] sm:$0xff] }
  0xd2   :  { %1947 = vmatpush1.msra.mxu1 %v2486_v27  ;;  %1000 = vmatprep.mubr.f32.mxu0 %v857_v28  ;;  %v169_v27 = vld [vmem:[%s5619_s1 + $0x550] sm:$0xff]  ;;  %v2465_v28 = vld [vmem:[%s5618_s0 + $0x418] sm:$0xff] }
  0xd3   :  { %1257 = vmatprep.mubr.f32.mxu1 %v150_v29  ;;  %1001 = vmatmul.mubr.f32.gmra.mxu0 %v856_v30  ;;  %v2464_v29 = vld [vmem:[%s5618_s0 + $0x410] sm:$0xff]  ;;  %v879_v30 = vld [vmem:[%s5619_s1 + $0x5d8] sm:$0xff] }
  0xd4   :  { %1258 = vmatmul.mubr.f32.gmra.mxu1 %v149_v31  ;;  %1563 = vmatprep.subr.mxu0 %v2485_v32  ;;  %v172_v31 = vld [vmem:[%s5619_s1 + $0x5b8] sm:$0xff] }
  0xd5   :  { %1948 = vmatprep.subr.mxu1 %v2485_v32  ;;  %1564 = vmatpush1.msra.mxu0 %v2484_v33  ;;  %v878_v32 = vld [vmem:[%s5619_s1 + $0x5d0] sm:$0xff] }
  0xd6   :  { %1949 = vmatpush1.msra.mxu1 %v2484_v33  ;;  %1006 = vmatprep.mubr.f32.mxu0 %v859_v34  ;;  %v171_v33 = vld [vmem:[%s5619_s1 + $0x5b0] sm:$0xff]  ;;  %v2463_v34 = vld [vmem:[%s5618_s0 + $0x408] sm:$0xff] }
  0xd7   :  { %1263 = vmatprep.mubr.f32.mxu1 %v152_v35  ;;  %1007 = vmatmul.mubr.f32.gmra.mxu0 %v858_v36  ;;  %v2462_v35 = vld [vmem:[%s5618_s0 + $0x400] sm:$0xff]  ;;  %v881_v36 = vld [vmem:[%s5619_s1 + $0x638] sm:$0xff] }
  0xd8   :  { %1264 = vmatmul.mubr.f32.gmra.mxu1 %v151_v37  ;;  %1565 = vmatprep.subr.mxu0 %v2483_v38  ;;  %v174_v37 = vld [vmem:[%s5619_s1 + $0x618] sm:$0xff] }
  0xd9   :  { %1950 = vmatprep.subr.mxu1 %v2483_v38  ;;  %1566 = vmatpush1.msra.mxu0 %v2482_v39  ;;  %v880_v38 = vld [vmem:[%s5619_s1 + $0x630] sm:$0xff] }
  0xda   :  { %1951 = vmatpush1.msra.mxu1 %v2482_v39  ;;  %1012 = vmatprep.mubr.f32.mxu0 %v861_v40  ;;  %v173_v39 = vld [vmem:[%s5619_s1 + $0x610] sm:$0xff]  ;;  %v2525_v40 = vld [vmem:[%s5618_s0 + $0x5f8] sm:$0xff] }
  0xdb   :  { %1269 = vmatprep.mubr.f32.mxu1 %v154_v41  ;;  %1013 = vmatmul.mubr.f32.gmra.mxu0 %v860_v42  ;;  %v2524_v41 = vld [vmem:[%s5618_s0 + $0x5f0] sm:$0xff] }
  0xdc   :  { %1270 = vmatmul.mubr.f32.gmra.mxu1 %v153_v43  ;;  %1567 = vmatprep.subr.mxu0 %v2481_v44 }
  0xdd   :  { %1952 = vmatprep.subr.mxu1 %v2481_v44  ;;  %1568 = vmatpush1.msra.mxu0 %v2480_v45  ;;  %v883_v44 = vld [vmem:[%s5619_s1 + $0x698] sm:$0xff] }
  0xde   :  { %1953 = vmatpush1.msra.mxu1 %v2480_v45  ;;  %1018 = vmatprep.mubr.f32.mxu0 %v863_v46  ;;  %v176_v45 = vld [vmem:[%s5619_s1 + $0x678] sm:$0xff] }
  0xdf   :  { %1275 = vmatprep.mubr.f32.mxu1 %v156_v47  ;;  %1019 = vmatmul.mubr.f32.gmra.mxu0 %v862_v48  ;;  %v882_v47 = vld [vmem:[%s5619_s1 + $0x690] sm:$0xff] }
  0xe0   :  { %1276 = vmatmul.mubr.f32.gmra.mxu1 %v155_v49  ;;  %1569 = vmatprep.subr.mxu0 %v2479_v50  ;;  %v175_v48 = vld [vmem:[%s5619_s1 + $0x670] sm:$0xff] }
  0xe1   :  { %1954 = vmatprep.subr.mxu1 %v2479_v50  ;;  %1570 = vmatpush1.msra.mxu0 %v2478_v51 }
  0xe2   :  { %1955 = vmatpush1.msra.mxu1 %v2478_v51  ;;  %1024 = vmatprep.mubr.f32.mxu0 %v865_v57  ;;  %v2523_v51 = vld [vmem:[%s5618_s0 + $0x5e8] sm:$0xff] }
  0xe3   :  { %1281 = vmatprep.mubr.f32.mxu1 %v158_v52  ;;  %1025 = vmatmul.mubr.f32.gmra.mxu0 %v864_v53  ;;  %v2522_v52 = vld [vmem:[%s5618_s0 + $0x5e0] sm:$0xff] }
  0xe4   :  { %1282 = vmatmul.mubr.f32.gmra.mxu1 %v157_v59  ;;  %1571 = vmatprep.subr.mxu0 %v2477_v60 }
  0xe5   :  { %1956 = vmatprep.subr.mxu1 %v2477_v60  ;;  %1572 = vmatpush1.msra.mxu0 %v2476_v54  ;;  %v885_v60 = vld [vmem:[%s5619_s1 + $0x6f8] sm:$0xff] }
  0xe6   :  { %1957 = vmatpush1.msra.mxu1 %v2476_v54  ;;  %1030 = vmatprep.mubr.f32.mxu0 %v867_v61  ;;  %v178_v54 = vld [vmem:[%s5619_s1 + $0x6d8] sm:$0xff] }
  0xe7   :  { %1287 = vmatprep.mubr.f32.mxu1 %v160_v63  ;;  %1031 = vmatmul.mubr.f32.gmra.mxu0 %v866_v56  ;;  %v884_v63 = vld [vmem:[%s5619_s1 + $0x6f0] sm:$0xff] }
  0xe8   :  { %1288 = vmatmul.mubr.f32.gmra.mxu1 %v159_v0  ;;  %1573 = vmatprep.subr.mxu0 %v2475_v1  ;;  %v177_v56 = vld [vmem:[%s5619_s1 + $0x6d0] sm:$0xff] }
  0xe9   :  { %1958 = vmatprep.subr.mxu1 %v2475_v1  ;;  %1574 = vmatpush1.msra.mxu0 %v2474_v2 }
  0xea   :  { %1959 = vmatpush1.msra.mxu1 %v2474_v2  ;;  %1036 = vmatprep.mubr.f32.mxu0 %v869_v3  ;;  %v2521_v2 = vld [vmem:[%s5618_s0 + $0x5d8] sm:$0xff] }
  0xeb   :  { %1293 = vmatprep.mubr.f32.mxu1 %v162_v4  ;;  %1037 = vmatmul.mubr.f32.gmra.mxu0 %v868_v5  ;;  %v2520_v4 = vld [vmem:[%s5618_s0 + $0x5d0] sm:$0xff] }
  0xec   :  { %1294 = vmatmul.mubr.f32.gmra.mxu1 %v161_v6  ;;  %1575 = vmatprep.subr.mxu0 %v2473_v7 }
  0xed   :  { %1960 = vmatprep.subr.mxu1 %v2473_v7  ;;  %1576 = vmatpush1.msra.mxu0 %v2472_v8  ;;  %v887_v7 = vld [vmem:[%s5619_s1 + $0x758] sm:$0xff] }
  0xee   :  { %1961 = vmatpush1.msra.mxu1 %v2472_v8  ;;  %1042 = vmatprep.mubr.f32.mxu0 %v871_v58  ;;  %v180_v8 = vld [vmem:[%s5619_s1 + $0x738] sm:$0xff] }
  0xef   :  { %1299 = vmatprep.mubr.f32.mxu1 %v164_v9  ;;  %1043 = vmatmul.mubr.f32.gmra.mxu0 %v870_v10  ;;  %v886_v9 = vld [vmem:[%s5619_s1 + $0x750] sm:$0xff] }
  0xf0   :  { %1300 = vmatmul.mubr.f32.gmra.mxu1 %v163_v11  ;;  %1577 = vmatprep.subr.mxu0 %v2471_v12  ;;  %v179_v10 = vld [vmem:[%s5619_s1 + $0x730] sm:$0xff] }
  0xf1   :  { %1962 = vmatprep.subr.mxu1 %v2471_v12  ;;  %1578 = vmatpush1.msra.mxu0 %v2470_v55 }
  0xf2   :  { %1963 = vmatpush1.msra.mxu1 %v2470_v55  ;;  %1048 = vmatprep.mubr.f32.mxu0 %v873_v62  ;;  %v2519_v55 = vld [vmem:[%s5618_s0 + $0x5c8] sm:$0xff] }
  0xf3   :  { %1305 = vmatprep.mubr.f32.mxu1 %v166_v13  ;;  %1049 = vmatmul.mubr.f32.gmra.mxu0 %v872_v14  ;;  %v2518_v13 = vld [vmem:[%s5618_s0 + $0x5c0] sm:$0xff] }
  0xf4   :  { %1306 = vmatmul.mubr.f32.gmra.mxu1 %v165_v15  ;;  %1579 = vmatprep.subr.mxu0 %v2469_v16 }
  0xf5   :  { %1964 = vmatprep.subr.mxu1 %v2469_v16  ;;  %1580 = vmatpush1.msra.mxu0 %v2468_v17  ;;  %v889_v16 = vld [vmem:[%s5619_s1 + $0x7b8] sm:$0xff] }
  0xf6   :  { %1965 = vmatpush1.msra.mxu1 %v2468_v17  ;;  %1054 = vmatprep.mubr.f32.mxu0 %v875_v18  ;;  %v182_v17 = vld [vmem:[%s5619_s1 + $0x798] sm:$0xff] }
  0xf7   :  { %1311 = vmatprep.mubr.f32.mxu1 %v168_v19  ;;  %1055 = vmatmul.mubr.f32.gmra.mxu0 %v874_v20  ;;  %v888_v19 = vld [vmem:[%s5619_s1 + $0x7b0] sm:$0xff] }
  0xf8   :  { %1312 = vmatmul.mubr.f32.gmra.mxu1 %v167_v21  ;;  %1581 = vmatprep.subr.mxu0 %v2467_v22  ;;  %v181_v20 = vld [vmem:[%s5619_s1 + $0x790] sm:$0xff] }
  0xf9   :  { %1966 = vmatprep.subr.mxu1 %v2467_v22  ;;  %1582 = vmatpush1.msra.mxu0 %v2466_v23 }
  0xfa   :  { %1967 = vmatpush1.msra.mxu1 %v2466_v23  ;;  %1060 = vmatprep.mubr.f32.mxu0 %v877_v24  ;;  %v2517_v23 = vld [vmem:[%s5618_s0 + $0x5b8] sm:$0xff] }
  0xfb   :  { %1317 = vmatprep.mubr.f32.mxu1 %v170_v25  ;;  %1061 = vmatmul.mubr.f32.gmra.mxu0 %v876_v26  ;;  %v2516_v25 = vld [vmem:[%s5618_s0 + $0x5b0] sm:$0xff] }
  0xfc   :  { %1318 = vmatmul.mubr.f32.gmra.mxu1 %v169_v27  ;;  %1583 = vmatprep.subr.mxu0 %v2465_v28 }
  0xfd   :  { %1968 = vmatprep.subr.mxu1 %v2465_v28  ;;  %1584 = vmatpush1.msra.mxu0 %v2464_v29  ;;  %v891_v28 = vld [vmem:[%s5619_s1 + $0x818] sm:$0xff] }
  0xfe   :  { %1969 = vmatpush1.msra.mxu1 %v2464_v29  ;;  %1066 = vmatprep.mubr.f32.mxu0 %v879_v30  ;;  %v184_v29 = vld [vmem:[%s5619_s1 + $0x7f8] sm:$0xff] }
  0xff   :  { %1323 = vmatprep.mubr.f32.mxu1 %v172_v31  ;;  %1067 = vmatmul.mubr.f32.gmra.mxu0 %v878_v32  ;;  %v890_v31 = vld [vmem:[%s5619_s1 + $0x810] sm:$0xff] }
 0x100   :  { %1324 = vmatmul.mubr.f32.gmra.mxu1 %v171_v33  ;;  %1585 = vmatprep.subr.mxu0 %v2463_v34  ;;  %v183_v32 = vld [vmem:[%s5619_s1 + $0x7f0] sm:$0xff] }
 0x101   :  { %1970 = vmatprep.subr.mxu1 %v2463_v34  ;;  %1586 = vmatpush1.msra.mxu0 %v2462_v35 }
 0x102   :  { %1971 = vmatpush1.msra.mxu1 %v2462_v35  ;;  %1072 = vmatprep.mubr.f32.mxu0 %v881_v36  ;;  %v2515_v35 = vld [vmem:[%s5618_s0 + $0x5a8] sm:$0xff] }
 0x103   :  { %1329 = vmatprep.mubr.f32.mxu1 %v174_v37  ;;  %v400_v42 = vpop.f32.mrf.mxu0  ;;  %1073 = vmatmul.mubr.f32.gmra.mxu0 %v880_v38  ;;  %v2514_v37 = vld [vmem:[%s5618_s0 + $0x5a0] sm:$0xff] }
 0x104   :  { %v657_v43 = vpop.f32.mrf.mxu1  ;;  %1330 = vmatmul.mubr.f32.gmra.mxu1 %v173_v39  ;;  %1587 = vmatprep.subr.mxu0 %v2525_v40 }
 0x105   :  { %v4138_v46 = vadd.f32 %v657_v43, %v400_v42  ;;  %1972 = vmatprep.subr.mxu1 %v2525_v40  ;;  %1588 = vmatpush2.msra.mxu0 %v2524_v41  ;;  %v402_v49 = vpop.f32.mrf.mxu0  ;;  %v893_v40 = vld [vmem:[%s5619_s1 + $0x878] sm:$0xff]  ;;  %v892_v43 = vld [vmem:[%s5619_s1 + $0x870] sm:$0xff] }
 0x106   :  { %1973 = vmatpush2.msra.mxu1 %v2524_v41  ;;  %v659_v50 = vpop.f32.mrf.mxu1  ;;  %1078 = vmatprep.mubr.f32.mxu0 %v883_v44  ;;  %v186_v41 = vld [vmem:[%s5619_s1 + $0x858] sm:$0xff]  ;;  %v185_v44 = vld [vmem:[%s5619_s1 + $0x850] sm:$0xff] }
 0x107   :  { %v4149_v57 = vadd.f32 %v659_v50, %v402_v49  ;;  %1335 = vmatprep.mubr.f32.mxu1 %v176_v45  ;;  %v406_v53 = vpop.f32.mrf.mxu0  ;;  %1079 = vmatmul.mubr.f32.gmra.mxu0 %v882_v47  ;;  %v2512_v50 = vld [vmem:[%s5618_s0 + $0x590] sm:$0xff] }
 0x108   :  { %v663_v59 = vpop.f32.mrf.mxu1  ;;  %1336 = vmatmul.mubr.f32.gmra.mxu1 %v175_v48  ;;  %1589 = vmatprep.subr.mxu0 %v2523_v51  ;;  %v2513_v48 = vld [vmem:[%s5618_s0 + $0x598] sm:$0xff] }
 0x109   :  { %v4160_v61 = vadd.f32 %v663_v59, %v406_v53  ;;  %1974 = vmatprep.subr.mxu1 %v2523_v51  ;;  %1590 = vmatpush2.msra.mxu0 %v2522_v52  ;;  %v408_v0 = vpop.f32.mrf.mxu0  ;;  %v895_v53 = vld [vmem:[%s5619_s1 + $0x8d8] sm:$0xff] }
 0x10a   :  { %1975 = vmatpush2.msra.mxu1 %v2522_v52  ;;  %v665_v1 = vpop.f32.mrf.mxu1  ;;  %1084 = vmatprep.mubr.f32.mxu0 %v885_v60  ;;  %v188_v59 = vld [vmem:[%s5619_s1 + $0x8b8] sm:$0xff] }
 0x10b   :  { %v4171_v3 = vadd.f32 %v665_v1, %v408_v0  ;;  %1341 = vmatprep.mubr.f32.mxu1 %v178_v54  ;;  %v412_v5 = vpop.f32.mrf.mxu0  ;;  %1085 = vmatmul.mubr.f32.gmra.mxu0 %v884_v63  ;;  %v894_v54 = vld [vmem:[%s5619_s1 + $0x8d0] sm:$0xff]  ;;  %v2511_v1 = vld [vmem:[%s5618_s0 + $0x588] sm:$0xff] }
 0x10c   :  { %v669_v6 = vpop.f32.mrf.mxu1  ;;  %1342 = vmatmul.mubr.f32.gmra.mxu1 %v177_v56  ;;  %1591 = vmatprep.subr.mxu0 %v2521_v2  ;;  %v187_v63 = vld [vmem:[%s5619_s1 + $0x8b0] sm:$0xff] }
 0x10d   :  { %v4182_v58 = vadd.f32 %v669_v6, %v412_v5  ;;  %1976 = vmatprep.subr.mxu1 %v2521_v2  ;;  %1592 = vmatpush2.msra.mxu0 %v2520_v4  ;;  %v414_v11 = vpop.f32.mrf.mxu0 }
 0x10e   :  { %1977 = vmatpush2.msra.mxu1 %v2520_v4  ;;  %v671_v12 = vpop.f32.mrf.mxu1  ;;  %1090 = vmatprep.mubr.f32.mxu0 %v887_v7  ;;  %v2510_v4 = vld [vmem:[%s5618_s0 + $0x580] sm:$0xff]  ;;  %v897_v7 = vld [vmem:[%s5619_s1 + $0x938] sm:$0xff] }
 0x10f   :  { %v4193_v62 = vadd.f32 %v671_v12, %v414_v11  ;;  %1347 = vmatprep.mubr.f32.mxu1 %v180_v8  ;;  %v418_v14 = vpop.f32.mrf.mxu0  ;;  %1091 = vmatmul.mubr.f32.gmra.mxu0 %v886_v9  ;;  %v190_v8 = vld [vmem:[%s5619_s1 + $0x918] sm:$0xff]  ;;  %v189_v11 = vld [vmem:[%s5619_s1 + $0x910] sm:$0xff] }
 0x110   :  { %v675_v15 = vpop.f32.mrf.mxu1  ;;  %1348 = vmatmul.mubr.f32.gmra.mxu1 %v179_v10  ;;  %1593 = vmatprep.subr.mxu0 %v2519_v55  ;;  %v896_v10 = vld [vmem:[%s5619_s1 + $0x930] sm:$0xff] }
 0x111   :  { %v4204_v18 = vadd.f32 %v675_v15, %v418_v14  ;;  %1978 = vmatprep.subr.mxu1 %v2519_v55  ;;  %1594 = vmatpush2.msra.mxu0 %v2518_v13  ;;  %v420_v21 = vpop.f32.mrf.mxu0  ;;  %v2508_v15 = vld [vmem:[%s5618_s0 + $0x570] sm:$0xff] }
 0x112   :  { %1979 = vmatpush2.msra.mxu1 %v2518_v13  ;;  %v677_v22 = vpop.f32.mrf.mxu1  ;;  %1096 = vmatprep.mubr.f32.mxu0 %v889_v16  ;;  %v2509_v13 = vld [vmem:[%s5618_s0 + $0x578] sm:$0xff] }
 0x113   :  { %v4215_v24 = vadd.f32 %v677_v22, %v420_v21  ;;  %1353 = vmatprep.mubr.f32.mxu1 %v182_v17  ;;  %v424_v26 = vpop.f32.mrf.mxu0  ;;  %1097 = vmatmul.mubr.f32.gmra.mxu0 %v888_v19  ;;  %v899_v19 = vld [vmem:[%s5619_s1 + $0x998] sm:$0xff]  ;;  %v898_v22 = vld [vmem:[%s5619_s1 + $0x990] sm:$0xff] }
 0x114   :  { %v681_v27 = vpop.f32.mrf.mxu1  ;;  %1354 = vmatmul.mubr.f32.gmra.mxu1 %v181_v20  ;;  %1595 = vmatprep.subr.mxu0 %v2517_v23  ;;  %v192_v20 = vld [vmem:[%s5619_s1 + $0x978] sm:$0xff] }
 0x115   :  { %v4226_v30 = vadd.f32 %v681_v27, %v424_v26  ;;  %1980 = vmatprep.subr.mxu1 %v2517_v23  ;;  %1596 = vmatpush2.msra.mxu0 %v2516_v25  ;;  %v426_v33 = vpop.f32.mrf.mxu0  ;;  %v191_v23 = vld [vmem:[%s5619_s1 + $0x970] sm:$0xff]  ;;  %v2507_v27 = vld [vmem:[%s5618_s0 + $0x568] sm:$0xff] }
 0x116   :  { %1981 = vmatpush2.msra.mxu1 %v2516_v25  ;;  %v683_v34 = vpop.f32.mrf.mxu1  ;;  %1102 = vmatprep.mubr.f32.mxu0 %v891_v28 }
 0x117   :  { %v4237_v36 = vadd.f32 %v683_v34, %v426_v33  ;;  %1359 = vmatprep.mubr.f32.mxu1 %v184_v29  ;;  %v430_v38 = vpop.f32.mrf.mxu0  ;;  %1103 = vmatmul.mubr.f32.gmra.mxu0 %v890_v31  ;;  %v2506_v29 = vld [vmem:[%s5618_s0 + $0x560] sm:$0xff]  ;;  %v901_v33 = vld [vmem:[%s5619_s1 + $0x9f8] sm:$0xff] }
 0x118   :  { %v687_v39 = vpop.f32.mrf.mxu1  ;;  %1360 = vmatmul.mubr.f32.gmra.mxu1 %v183_v32  ;;  %1597 = vmatprep.subr.mxu0 %v2515_v35  ;;  %v194_v34 = vld [vmem:[%s5619_s1 + $0x9d8] sm:$0xff] }
 0x119   :  { %v4248_v42 = vadd.f32 %v687_v39, %v430_v38  ;;  %1982 = vmatprep.subr.mxu1 %v2515_v35  ;;  %1598 = vmatpush2.msra.mxu0 %v2514_v37  ;;  %v432_v45 = vpop.f32.mrf.mxu0  ;;  %v193_v38 = vld [vmem:[%s5619_s1 + $0x9d0] sm:$0xff] }
 0x11a   :  { %1983 = vmatpush2.msra.mxu1 %v2514_v37  ;;  %v689_v47 = vpop.f32.mrf.mxu1  ;;  %1108 = vmatprep.mubr.f32.mxu0 %v893_v40  ;;  %v900_v37 = vld [vmem:[%s5619_s1 + $0x9f0] sm:$0xff] }
 0x11b   :  { %v4259_v49 = vadd.f32 %v689_v47, %v432_v45  ;;  %1365 = vmatprep.mubr.f32.mxu1 %v186_v41  ;;  %v436_v51 = vpop.f32.mrf.mxu0  ;;  %1109 = vmatmul.mubr.f32.gmra.mxu0 %v892_v43  ;;  %v2505_v41 = vld [vmem:[%s5618_s0 + $0x558] sm:$0xff] }
 0x11c   :  { %v693_v52 = vpop.f32.mrf.mxu1  ;;  %1366 = vmatmul.mubr.f32.gmra.mxu1 %v185_v44  ;;  %1599 = vmatprep.subr.mxu0 %v2513_v48  ;;  %v2504_v44 = vld [vmem:[%s5618_s0 + $0x550] sm:$0xff] }
 0x11d   :  { %v4270_v60 = vadd.f32 %v693_v52, %v436_v51  ;;  %1984 = vmatprep.subr.mxu1 %v2513_v48  ;;  %1600 = vmatpush2.msra.mxu0 %v2512_v50  ;;  %v438_v56 = vpop.f32.mrf.mxu0  ;;  %v903_v48 = vld [vmem:[%s5619_s1 + $0xa58] sm:$0xff]  ;;  %v902_v52 = vld [vmem:[%s5619_s1 + $0xa50] sm:$0xff] }
 0x11e   :  { %1985 = vmatpush2.msra.mxu1 %v2512_v50  ;;  %v695_v0 = vpop.f32.mrf.mxu1  ;;  %1114 = vmatprep.mubr.f32.mxu0 %v895_v53  ;;  %v196_v50 = vld [vmem:[%s5619_s1 + $0xa38] sm:$0xff]  ;;  %v195_v53 = vld [vmem:[%s5619_s1 + $0xa30] sm:$0xff] }
 0x11f   :  { %v4281_v2 = vadd.f32 %v695_v0, %v438_v56  ;;  %1371 = vmatprep.mubr.f32.mxu1 %v188_v59  ;;  %v442_v5 = vpop.f32.mrf.mxu0  ;;  %1115 = vmatmul.mubr.f32.gmra.mxu0 %v894_v54  ;;  %v2502_v0 = vld [vmem:[%s5618_s0 + $0x540] sm:$0xff] }
 0x120   :  { %v699_v6 = vpop.f32.mrf.mxu1  ;;  %1372 = vmatmul.mubr.f32.gmra.mxu1 %v187_v63  ;;  %1601 = vmatprep.subr.mxu0 %v2511_v1  ;;  %v2503_v63 = vld [vmem:[%s5618_s0 + $0x548] sm:$0xff] }
 0x121   :  { %v4292_v9 = vadd.f32 %v699_v6, %v442_v5  ;;  %1986 = vmatprep.subr.mxu1 %v2511_v1  ;;  %1602 = vmatpush2.msra.mxu0 %v2510_v4  ;;  %v444_v12 = vpop.f32.mrf.mxu0  ;;  %v905_v5 = vld [vmem:[%s5619_s1 + $0xab8] sm:$0xff] }
 0x122   :  { %1987 = vmatpush2.msra.mxu1 %v2510_v4  ;;  %v701_v55 = vpop.f32.mrf.mxu1  ;;  %1120 = vmatprep.mubr.f32.mxu0 %v897_v7  ;;  %v198_v6 = vld [vmem:[%s5619_s1 + $0xa98] sm:$0xff] }
 0x123   :  { %v4303_v14 = vadd.f32 %v701_v55, %v444_v12  ;;  %1377 = vmatprep.mubr.f32.mxu1 %v190_v8  ;;  %v448_v16 = vpop.f32.mrf.mxu0  ;;  %1121 = vmatmul.mubr.f32.gmra.mxu0 %v896_v10  ;;  %v904_v8 = vld [vmem:[%s5619_s1 + $0xab0] sm:$0xff]  ;;  %v2501_v55 = vld [vmem:[%s5618_s0 + $0x538] sm:$0xff] }
 0x124   :  { %v705_v17 = vpop.f32.mrf.mxu1  ;;  %1378 = vmatmul.mubr.f32.gmra.mxu1 %v189_v11  ;;  %1603 = vmatprep.subr.mxu0 %v2509_v13  ;;  %v197_v10 = vld [vmem:[%s5619_s1 + $0xa90] sm:$0xff] }
 0x125   :  { %v4314_v21 = vadd.f32 %v705_v17, %v448_v16  ;;  %1988 = vmatprep.subr.mxu1 %v2509_v13  ;;  %1604 = vmatpush2.msra.mxu0 %v2508_v15  ;;  %v450_v25 = vpop.f32.mrf.mxu0 }
 0x126   :  { %1989 = vmatpush2.msra.mxu1 %v2508_v15  ;;  %v707_v26 = vpop.f32.mrf.mxu1  ;;  %1126 = vmatprep.mubr.f32.mxu0 %v899_v19  ;;  %v2500_v15 = vld [vmem:[%s5618_s0 + $0x530] sm:$0xff]  ;;  %v907_v19 = vld [vmem:[%s5619_s1 + $0xb18] sm:$0xff] }
 0x127   :  { %v4325_v28 = vadd.f32 %v707_v26, %v450_v25  ;;  %1383 = vmatprep.mubr.f32.mxu1 %v192_v20  ;;  %v454_v31 = vpop.f32.mrf.mxu0  ;;  %1127 = vmatmul.mubr.f32.gmra.mxu0 %v898_v22  ;;  %v200_v20 = vld [vmem:[%s5619_s1 + $0xaf8] sm:$0xff]  ;;  %v199_v25 = vld [vmem:[%s5619_s1 + $0xaf0] sm:$0xff] }
 0x128   :  { %v711_v32 = vpop.f32.mrf.mxu1  ;;  %1384 = vmatmul.mubr.f32.gmra.mxu1 %v191_v23  ;;  %1605 = vmatprep.subr.mxu0 %v2507_v27  ;;  %v906_v23 = vld [vmem:[%s5619_s1 + $0xb10] sm:$0xff] }
 0x129   :  { %v4336_v35 = vadd.f32 %v711_v32, %v454_v31  ;;  %1990 = vmatprep.subr.mxu1 %v2507_v27  ;;  %1606 = vmatpush2.msra.mxu0 %v2506_v29  ;;  %v456_v39 = vpop.f32.mrf.mxu0  ;;  %v2498_v32 = vld [vmem:[%s5618_s0 + $0x520] sm:$0xff] }
 0x12a   :  { %1991 = vmatpush2.msra.mxu1 %v2506_v29  ;;  %v713_v40 = vpop.f32.mrf.mxu1  ;;  %1132 = vmatprep.mubr.f32.mxu0 %v901_v33  ;;  %v2499_v29 = vld [vmem:[%s5618_s0 + $0x528] sm:$0xff] }
 0x12b   :  { %v4347_v43 = vadd.f32 %v713_v40, %v456_v39  ;;  %1389 = vmatprep.mubr.f32.mxu1 %v194_v34  ;;  %v460_v45 = vpop.f32.mrf.mxu0  ;;  %1133 = vmatmul.mubr.f32.gmra.mxu0 %v900_v37  ;;  %v909_v37 = vld [vmem:[%s5619_s1 + $0xb78] sm:$0xff]  ;;  %v908_v40 = vld [vmem:[%s5619_s1 + $0xb70] sm:$0xff] }
 0x12c   :  { %v717_v47 = vpop.f32.mrf.mxu1  ;;  %1390 = vmatmul.mubr.f32.gmra.mxu1 %v193_v38  ;;  %1607 = vmatprep.subr.mxu0 %v2505_v41  ;;  %v202_v38 = vld [vmem:[%s5619_s1 + $0xb58] sm:$0xff] }
 0x12d   :  { %v4358_v51 = vadd.f32 %v717_v47, %v460_v45  ;;  %1992 = vmatprep.subr.mxu1 %v2505_v41  ;;  %1608 = vmatpush2.msra.mxu0 %v2504_v44  ;;  %v462_v59 = vpop.f32.mrf.mxu0  ;;  %v201_v41 = vld [vmem:[%s5619_s1 + $0xb50] sm:$0xff]  ;;  %v2497_v47 = vld [vmem:[%s5618_s0 + $0x518] sm:$0xff] }
 0x12e   :  { %1993 = vmatpush2.msra.mxu1 %v2504_v44  ;;  %v719_v54 = vpop.f32.mrf.mxu1  ;;  %1138 = vmatprep.mubr.f32.mxu0 %v903_v48 }
 0x12f   :  { %v4369_v56 = vadd.f32 %v719_v54, %v462_v59  ;;  %1395 = vmatprep.mubr.f32.mxu1 %v196_v50  ;;  %v466_v1 = vpop.f32.mrf.mxu0  ;;  %1139 = vmatmul.mubr.f32.gmra.mxu0 %v902_v52  ;;  %v2496_v50 = vld [vmem:[%s5618_s0 + $0x510] sm:$0xff]  ;;  %v911_v59 = vld [vmem:[%s5619_s1 + $0xbd8] sm:$0xff] }
 0x130   :  { %v723_v4 = vpop.f32.mrf.mxu1  ;;  %1396 = vmatmul.mubr.f32.gmra.mxu1 %v195_v53  ;;  %1609 = vmatprep.subr.mxu0 %v2503_v63  ;;  %v204_v54 = vld [vmem:[%s5619_s1 + $0xbb8] sm:$0xff] }
 0x131   :  { %v4380_v7 = vadd.f32 %v723_v4, %v466_v1  ;;  %1994 = vmatprep.subr.mxu1 %v2503_v63  ;;  %1610 = vmatpush2.msra.mxu0 %v2502_v0  ;;  %v468_v11 = vpop.f32.mrf.mxu0  ;;  %v203_v1 = vld [vmem:[%s5619_s1 + $0xbb0] sm:$0xff] }
 0x132   :  { %1995 = vmatpush2.msra.mxu1 %v2502_v0  ;;  %v725_v12 = vpop.f32.mrf.mxu1  ;;  %1144 = vmatprep.mubr.f32.mxu0 %v905_v5  ;;  %v910_v0 = vld [vmem:[%s5619_s1 + $0xbd0] sm:$0xff] }
 0x133   :  { %v4391_v13 = vadd.f32 %v725_v12, %v468_v11  ;;  %1401 = vmatprep.mubr.f32.mxu1 %v198_v6  ;;  %v472_v16 = vpop.f32.mrf.mxu0  ;;  %1145 = vmatmul.mubr.f32.gmra.mxu0 %v904_v8  ;;  %v2495_v6 = vld [vmem:[%s5618_s0 + $0x508] sm:$0xff] }
 0x134   :  { %v729_v17 = vpop.f32.mrf.mxu1  ;;  %1402 = vmatmul.mubr.f32.gmra.mxu1 %v197_v10  ;;  %1611 = vmatprep.subr.mxu0 %v2501_v55  ;;  %v2494_v10 = vld [vmem:[%s5618_s0 + $0x500] sm:$0xff] }
 0x135   :  { %v4402_v22 = vadd.f32 %v729_v17, %v472_v16  ;;  %1996 = vmatprep.subr.mxu1 %v2501_v55  ;;  %1612 = vmatpush2.msra.mxu0 %v2500_v15  ;;  %v474_v26 = vpop.f32.mrf.mxu0  ;;  %v1492_v55 = vld [vmem:[%s5619_s1 + $0x48] sm:$0xff]  ;;  %v1491_v17 = vld [vmem:[%s5619_s1 + $0x40] sm:$0xff] }
 0x136   :  { %1997 = vmatpush2.msra.mxu1 %v2500_v15  ;;  %v731_v27 = vpop.f32.mrf.mxu1  ;;  %1150 = vmatprep.mubr.f32.mxu0 %v907_v19  ;;  %v1877_v15 = vld [vmem:[%s5619_s1 + $0x58] sm:$0xff]  ;;  %v1876_v19 = vld [vmem:[%s5619_s1 + $0x50] sm:$0xff] }
 0x137   :  { %5832 = vst [vmem:[#allocation2_spill] sm:$0xff] %v4402_v22  ;;  %v4413_v31 = vadd.f32 %v731_v27, %v474_v26  ;;  %1407 = vmatprep.mubr.f32.mxu1 %v200_v20  ;;  %v478_v33 = vpop.f32.mrf.mxu0  ;;  %1151 = vmatmul.mubr.f32.gmra.mxu0 %v906_v23  ;;  %v1879_v26 = vld [vmem:[%s5619_s1 + $0xb8] sm:$0xff] }
 0x138   :  { %v735_v34 = vpop.f32.mrf.mxu1  ;;  %1408 = vmatmul.mubr.f32.gmra.mxu1 %v199_v25  ;;  %1613 = vmatprep.subr.mxu0 %v2499_v29  ;;  %v1494_v25 = vld [vmem:[%s5619_s1 + $0xa8] sm:$0xff] }
 0x139   :  { %5833 = vst [vmem:[#allocation3_spill] sm:$0xff] %v4413_v31  ;;  %v4424_v39 = vadd.f32 %v735_v34, %v478_v33  ;;  %1998 = vmatprep.subr.mxu1 %v2499_v29  ;;  %1614 = vmatpush2.msra.mxu0 %v2498_v32  ;;  %v480_v44 = vpop.f32.mrf.mxu0  ;;  %v1493_v34 = vld [vmem:[%s5619_s1 + $0xa0] sm:$0xff] }
 0x13a   :  { %1999 = vmatpush2.msra.mxu1 %v2498_v32  ;;  %v737_v45 = vpop.f32.mrf.mxu1  ;;  %1156 = vmatprep.mubr.f32.mxu0 %v909_v37  ;;  %v1878_v37 = vld [vmem:[%s5619_s1 + $0xb0] sm:$0xff] }
 0x13b   :  { %5834 = vst [vmem:[#allocation4_spill] sm:$0xff] %v4424_v39  ;;  %v4435_v48 = vadd.f32 %v737_v45, %v480_v44  ;;  %1413 = vmatprep.mubr.f32.mxu1 %v202_v38  ;;  %v484_v52 = vpop.f32.mrf.mxu0  ;;  %1157 = vmatmul.mubr.f32.gmra.mxu0 %v908_v40  ;;  %v1881_v44 = vld [vmem:[%s5619_s1 + $0x118] sm:$0xff] }
 0x13c   :  { %v741_v53 = vpop.f32.mrf.mxu1  ;;  %1414 = vmatmul.mubr.f32.gmra.mxu1 %v201_v41  ;;  %1615 = vmatprep.subr.mxu0 %v2497_v47  ;;  %v1496_v41 = vld [vmem:[%s5619_s1 + $0x108] sm:$0xff] }
 0x13d   :  { %5835 = vst [vmem:[#allocation5_spill] sm:$0xff] %v4435_v48  ;;  %v4446_v63 = vadd.f32 %v741_v53, %v484_v52  ;;  %2000 = vmatprep.subr.mxu1 %v2497_v47  ;;  %1616 = vmatpush2.msra.mxu0 %v2496_v50  ;;  %v486_v4 = vpop.f32.mrf.mxu0  ;;  %v1495_v53 = vld [vmem:[%s5619_s1 + $0x100] sm:$0xff] }
 0x13e   :  { %2001 = vmatpush2.msra.mxu1 %v2496_v50  ;;  %v743_v5 = vpop.f32.mrf.mxu1  ;;  %1162 = vmatprep.mubr.f32.mxu0 %v911_v59  ;;  %v1880_v59 = vld [vmem:[%s5619_s1 + $0x110] sm:$0xff] }
 0x13f   :  { %5836 = vst [vmem:[#allocation6_spill] sm:$0xff] %v4446_v63  ;;  %v4457_v8 = vadd.f32 %v743_v5, %v486_v4  ;;  %1419 = vmatprep.mubr.f32.mxu1 %v204_v54  ;;  %v490_v11 = vpop.f32.mrf.mxu0  ;;  %1163 = vmatmul.mubr.f32.gmra.mxu0 %v910_v0  ;;  %v1883_v4 = vld [vmem:[%s5619_s1 + $0x178] sm:$0xff] }
 0x140   :  { %v747_v12 = vpop.f32.mrf.mxu1  ;;  %1420 = vmatmul.mubr.f32.gmra.mxu1 %v203_v1  ;;  %1617 = vmatprep.subr.mxu0 %v2495_v6  ;;  %v1498_v1 = vld [vmem:[%s5619_s1 + $0x168] sm:$0xff] }
 0x141   :  { %5837 = vst [vmem:[#allocation7_spill] sm:$0xff] %v4457_v8  ;;  %v4468_v16 = vadd.f32 %v747_v12, %v490_v11  ;;  %2002 = vmatprep.subr.mxu1 %v2495_v6  ;;  %1618 = vmatpush2.msra.mxu0 %v2494_v10  ;;  %v492_v20 = vpop.f32.mrf.mxu0  ;;  %v1497_v12 = vld [vmem:[%s5619_s1 + $0x160] sm:$0xff] }
 0x142   :  { %2003 = vmatpush2.msra.mxu1 %v2494_v10  ;;  %v749_v23 = vpop.f32.mrf.mxu1  ;;  %1619 = vmatprep.mubr.f32.mxu0 %v1492_v55  ;;  %v1882_v55 = vld [vmem:[%s5619_s1 + $0x170] sm:$0xff] }
 0x143   :  { %5838 = vst [vmem:[#allocation8_spill] sm:$0xff] %v4468_v16  ;;  %v4482_v27 = vadd.f32 %v749_v23, %v492_v20  ;;  %2004 = vmatprep.mubr.f32.mxu1 %v1877_v15  ;;  %v496_v29 = vpop.f32.mrf.mxu0  ;;  %1620 = vmatmul.mubr.f32.vlgmr.msra.gmra.mxu0 %v1491_v17  ;;  %v1885_v20 = vld [vmem:[%s5619_s1 + $0x1d8] sm:$0xff] }
 0x144   :  { %v753_v32 = vpop.f32.mrf.mxu1  ;;  %2005 = vmatmul.mubr.f32.vlgmr.msra.gmra.mxu1 %v1876_v19  ;;  %1625 = vmatprep.mubr.f32.mxu0 %v1494_v25  ;;  %v1500_v19 = vld [vmem:[%s5619_s1 + $0x1c8] sm:$0xff] }
 0x145   :  { %5839 = vst [vmem:[#allocation9_spill] sm:$0xff] %v4482_v27  ;;  %v4484_v33 = vadd.f32 %v753_v32, %v496_v29  ;;  %2010 = vmatprep.mubr.f32.mxu1 %v1879_v26  ;;  %v498_v38 = vpop.f32.mrf.mxu0  ;;  %v1499_v32 = vld [vmem:[%s5619_s1 + $0x1c0] sm:$0xff] }
 0x146   :  { %v755_v40 = vpop.f32.mrf.mxu1 }
 0x147   :  { %5840 = vst [vmem:[#allocation10_spill] sm:$0xff] %v4484_v33  ;;  %v4498_v45 = vadd.f32 %v755_v40, %v498_v38  ;;  %v502_v47 = vpop.f32.mrf.mxu0  ;;  %1626 = vmatmul.mubr.f32.gmra.mxu0 %v1493_v34  ;;  %v1884_v34 = vld [vmem:[%s5619_s1 + $0x1d0] sm:$0xff]  ;;  %v1502_v40 = vld [vmem:[%s5619_s1 + $0x228] sm:$0xff] }
 0x148   :  { %v759_v50 = vpop.f32.mrf.mxu1  ;;  %2011 = vmatmul.mubr.f32.gmra.mxu1 %v1878_v37  ;;  %1631 = vmatprep.mubr.f32.mxu0 %v1496_v41  ;;  %v1887_v41 = vld [vmem:[%s5619_s1 + $0x238] sm:$0xff] }
 0x149   :  { %5841 = vst [vmem:[#allocation11_spill] sm:$0xff] %v4498_v45  ;;  %v4500_v52 = vadd.f32 %v759_v50, %v502_v47  ;;  %2016 = vmatprep.mubr.f32.mxu1 %v1881_v44  ;;  %v504_v54 = vpop.f32.mrf.mxu0 }
 0x14a   :  { %v761_v0 = vpop.f32.mrf.mxu1 }
 0x14b   :  { %5842 = vst [vmem:[#allocation12_spill] sm:$0xff] %v4500_v52  ;;  %v4514_v5 = vadd.f32 %v761_v0, %v504_v54  ;;  %v508_v6 = vpop.f32.mrf.mxu0  ;;  %1632 = vmatmul.mubr.f32.gmra.mxu0 %v1495_v53  ;;  %v1886_v54 = vld [vmem:[%s5619_s1 + $0x230] sm:$0xff] }
 0x14c   :  { %v765_v10 = vpop.f32.mrf.mxu1  ;;  %2017 = vmatmul.mubr.f32.gmra.mxu1 %v1880_v59  ;;  %1637 = vmatprep.mubr.f32.mxu0 %v1498_v1  ;;  %v1501_v59 = vld [vmem:[%s5619_s1 + $0x220] sm:$0xff] }
 0x14d   :  { %5843 = vst [vmem:[#allocation13_spill] sm:$0xff] %v4514_v5  ;;  %v4516_v11 = vadd.f32 %v765_v10, %v508_v6  ;;  %2022 = vmatprep.mubr.f32.mxu1 %v1883_v4  ;;  %v510_v15 = vpop.f32.mrf.mxu0  ;;  %v1504_v4 = vld [vmem:[%s5619_s1 + $0x288] sm:$0xff]  ;;  %v1889_v6 = vld [vmem:[%s5619_s1 + $0x298] sm:$0xff] }
 0x14e   :  { %v767_v17 = vpop.f32.mrf.mxu1 }
 0x14f   :  { %5844 = vst [vmem:[#allocation14_spill] sm:$0xff] %v4516_v11  ;;  %v4530_v23 = vadd.f32 %v767_v17, %v510_v15  ;;  %v514_v25 = vpop.f32.mrf.mxu0  ;;  %1638 = vmatmul.mubr.f32.gmra.mxu0 %v1497_v12  ;;  %v1503_v17 = vld [vmem:[%s5619_s1 + $0x280] sm:$0xff] }
 0x150   :  { %v771_v26 = vpop.f32.mrf.mxu1  ;;  %2023 = vmatmul.mubr.f32.gmra.mxu1 %v1882_v55  ;;  %1643 = vmatprep.mubr.f32.mxu0 %v1500_v19  ;;  %v1888_v19 = vld [vmem:[%s5619_s1 + $0x290] sm:$0xff] }
 0x151   :  { %5845 = vst [vmem:[#allocation15_spill] sm:$0xff] %v4530_v23  ;;  %v4532_v29 = vadd.f32 %v771_v26, %v514_v25  ;;  %2028 = vmatprep.mubr.f32.mxu1 %v1885_v20  ;;  %v516_v37 = vpop.f32.mrf.mxu0  ;;  %v1506_v26 = vld [vmem:[%s5619_s1 + $0x2e8] sm:$0xff] }
 0x152   :  { %v773_v38 = vpop.f32.mrf.mxu1 }
 0x153   :  { %5846 = vst [vmem:[#allocation16_spill] sm:$0xff] %v4532_v29  ;;  %v4546_v44 = vadd.f32 %v773_v38, %v516_v37  ;;  %v520_v47 = vpop.f32.mrf.mxu0  ;;  %1644 = vmatmul.mubr.f32.gmra.mxu0 %v1499_v32  ;;  %v1891_v32 = vld [vmem:[%s5619_s1 + $0x2f8] sm:$0xff] }
 0x154   :  { %v777_v50 = vpop.f32.mrf.mxu1  ;;  %2029 = vmatmul.mubr.f32.gmra.mxu1 %v1884_v34  ;;  %1649 = vmatprep.mubr.f32.mxu0 %v1502_v40 }
 0x155   :  { %5847 = vst [vmem:[#allocation17_spill] sm:$0xff] %v4546_v44  ;;  %v4548_v53 = vadd.f32 %v777_v50, %v520_v47  ;;  %2034 = vmatprep.mubr.f32.mxu1 %v1887_v41  ;;  %v522_v0 = vpop.f32.mrf.mxu0  ;;  %v1505_v41 = vld [vmem:[%s5619_s1 + $0x2e0] sm:$0xff]  ;;  %v1890_v47 = vld [vmem:[%s5619_s1 + $0x2f0] sm:$0xff] }
 0x156   :  { %v779_v1 = vpop.f32.mrf.mxu1 }
 0x157   :  { %5848 = vst [vmem:[#allocation18_spill] sm:$0xff] %v4548_v53  ;;  %v4562_v10 = vadd.f32 %v779_v1, %v522_v0  ;;  %v526_v12 = vpop.f32.mrf.mxu0  ;;  %1650 = vmatmul.mubr.f32.gmra.mxu0 %v1501_v59  ;;  %v1893_v0 = vld [vmem:[%s5619_s1 + $0x358] sm:$0xff] }
 0x158   :  { %v783_v55 = vpop.f32.mrf.mxu1  ;;  %2035 = vmatmul.mubr.f32.gmra.mxu1 %v1886_v54  ;;  %1655 = vmatprep.mubr.f32.mxu0 %v1504_v4  ;;  %v1508_v54 = vld [vmem:[%s5619_s1 + $0x348] sm:$0xff] }
 0x159   :  { %5849 = vst [vmem:[#allocation19_spill] sm:$0xff] %v4562_v10  ;;  %v4564_v15 = vadd.f32 %v783_v55, %v526_v12  ;;  %2040 = vmatprep.mubr.f32.mxu1 %v1889_v6  ;;  %v528_v20 = vpop.f32.mrf.mxu0  ;;  %v1507_v55 = vld [vmem:[%s5619_s1 + $0x340] sm:$0xff] }
 0x15a   :  { %v785_v25 = vpop.f32.mrf.mxu1 }
 0x15b   :  { %5850 = vst [vmem:[#allocation20_spill] sm:$0xff] %v4564_v15  ;;  %v4578_v34 = vadd.f32 %v785_v25, %v528_v20  ;;  %v532_v37 = vpop.f32.mrf.mxu0  ;;  %1656 = vmatmul.mubr.f32.gmra.mxu0 %v1503_v17  ;;  %v1892_v17 = vld [vmem:[%s5619_s1 + $0x350] sm:$0xff]  ;;  %v1510_v25 = vld [vmem:[%s5619_s1 + $0x3a8] sm:$0xff] }
 0x15c   :  { %v789_v38 = vpop.f32.mrf.mxu1  ;;  %2041 = vmatmul.mubr.f32.gmra.mxu1 %v1888_v19  ;;  %1661 = vmatprep.mubr.f32.mxu0 %v1506_v26  ;;  %v1895_v26 = vld [vmem:[%s5619_s1 + $0x3b8] sm:$0xff] }
 0x15d   :  { %5851 = vst [vmem:[#allocation21_spill] sm:$0xff] %v4578_v34  ;;  %v4580_v40 = vadd.f32 %v789_v38, %v532_v37  ;;  %2046 = vmatprep.mubr.f32.mxu1 %v1891_v32  ;;  %v534_v50 = vpop.f32.mrf.mxu0 }
 0x15e   :  { %v791_v59 = vpop.f32.mrf.mxu1 }
 0x15f   :  { %5852 = vst [vmem:[#allocation22_spill] sm:$0xff] %v4580_v40  ;;  %v4594_v1 = vadd.f32 %v791_v59, %v534_v50  ;;  %v538_v4 = vpop.f32.mrf.mxu0  ;;  %1662 = vmatmul.mubr.f32.gmra.mxu0 %v1505_v41  ;;  %v1894_v50 = vld [vmem:[%s5619_s1 + $0x3b0] sm:$0xff] }
 0x160   :  { %v795_v6 = vpop.f32.mrf.mxu1  ;;  %2047 = vmatmul.mubr.f32.gmra.mxu1 %v1890_v47  ;;  %1667 = vmatprep.mubr.f32.mxu0 %v1508_v54  ;;  %v1509_v47 = vld [vmem:[%s5619_s1 + $0x3a0] sm:$0xff] }
 0x161   :  { %5853 = vst [vmem:[#allocation23_spill] sm:$0xff] %v4594_v1  ;;  %v4596_v12 = vadd.f32 %v795_v6, %v538_v4  ;;  %2052 = vmatprep.mubr.f32.mxu1 %v1893_v0  ;;  %v540_v19 = vpop.f32.mrf.mxu0  ;;  %v1512_v0 = vld [vmem:[%s5619_s1 + $0x408] sm:$0xff]  ;;  %v1897_v4 = vld [vmem:[%s5619_s1 + $0x418] sm:$0xff] }
 0x162   :  { %v797_v20 = vpop.f32.mrf.mxu1 }
 0x163   :  { %5854 = vst [vmem:[#allocation24_spill] sm:$0xff] %v4596_v12  ;;  %v4610_v32 = vadd.f32 %v797_v20, %v540_v19  ;;  %v544_v37 = vpop.f32.mrf.mxu0  ;;  %1668 = vmatmul.mubr.f32.gmra.mxu0 %v1507_v55  ;;  %v1511_v20 = vld [vmem:[%s5619_s1 + $0x400] sm:$0xff] }
 0x164   :  { %v801_v38 = vpop.f32.mrf.mxu1  ;;  %2053 = vmatmul.mubr.f32.gmra.mxu1 %v1892_v17  ;;  %1673 = vmatprep.mubr.f32.mxu0 %v1510_v25  ;;  %v1896_v25 = vld [vmem:[%s5619_s1 + $0x410] sm:$0xff] }
 0x165   :  { %5855 = vst [vmem:[#allocation25_spill] sm:$0xff] %v4610_v32  ;;  %v4612_v41 = vadd.f32 %v801_v38, %v544_v37  ;;  %2058 = vmatprep.mubr.f32.mxu1 %v1895_v26  ;;  %v546_v59 = vpop.f32.mrf.mxu0  ;;  %v1514_v38 = vld [vmem:[%s5619_s1 + $0x468] sm:$0xff] }
 0x166   :  { %v803_v54 = vpop.f32.mrf.mxu1 }
 0x167   :  { %5856 = vst [vmem:[#allocation26_spill] sm:$0xff] %v4612_v41  ;;  %v4626_v6 = vadd.f32 %v803_v54, %v546_v59  ;;  %v550_v55 = vpop.f32.mrf.mxu0  ;;  %1674 = vmatmul.mubr.f32.gmra.mxu0 %v1509_v47  ;;  %v1899_v47 = vld [vmem:[%s5619_s1 + $0x478] sm:$0xff] }
 0x168   :  { %v807_v17 = vpop.f32.mrf.mxu1  ;;  %2059 = vmatmul.mubr.f32.gmra.mxu1 %v1894_v50  ;;  %1679 = vmatprep.mubr.f32.mxu0 %v1512_v0 }
 0x169   :  { %5857 = vst [vmem:[#allocation27_spill] sm:$0xff] %v4626_v6  ;;  %v4628_v19 = vadd.f32 %v807_v17, %v550_v55  ;;  %2064 = vmatprep.mubr.f32.mxu1 %v1897_v4  ;;  %v552_v26 = vpop.f32.mrf.mxu0  ;;  %v1513_v4 = vld [vmem:[%s5619_s1 + $0x460] sm:$0xff]  ;;  %v1898_v55 = vld [vmem:[%s5619_s1 + $0x470] sm:$0xff] }
 0x16a   :  { %v809_v37 = vpop.f32.mrf.mxu1 }
 0x16b   :  { %5858 = vst [vmem:[#allocation28_spill] sm:$0xff] %v4628_v19  ;;  %v4642_v50 = vadd.f32 %v809_v37, %v552_v26  ;;  %v556_v59 = vpop.f32.mrf.mxu0  ;;  %1680 = vmatmul.mubr.f32.gmra.mxu0 %v1511_v20  ;;  %v1516_v26 = vld [vmem:[%s5619_s1 + $0x4c8] sm:$0xff]  ;;  %v1901_v20 = vld [vmem:[%s5619_s1 + $0x4d8] sm:$0xff] }
 0x16c   :  { %v813_v54 = vpop.f32.mrf.mxu1  ;;  %2065 = vmatmul.mubr.f32.gmra.mxu1 %v1896_v25  ;;  %1685 = vmatprep.mubr.f32.mxu0 %v1514_v38 }
 0x16d   :  { %5859 = vst [vmem:[#allocation29_spill] sm:$0xff] %v4642_v50  ;;  %v4644_v0 = vadd.f32 %v813_v54, %v556_v59  ;;  %2070 = vmatprep.mubr.f32.mxu1 %v1899_v47  ;;  %v558_v17 = vpop.f32.mrf.mxu0  ;;  %v1515_v59 = vld [vmem:[%s5619_s1 + $0x4c0] sm:$0xff]  ;;  %v1900_v54 = vld [vmem:[%s5619_s1 + $0x4d0] sm:$0xff] }
 0x16e   :  { %v815_v19 = vpop.f32.mrf.mxu1 }
 0x16f   :  { %5860 = vst [vmem:[#allocation30_spill] sm:$0xff] %v4644_v0  ;;  %v4658_v25 = vadd.f32 %v815_v19, %v558_v17  ;;  %v562_v37 = vpop.f32.mrf.mxu0  ;;  %1686 = vmatmul.mubr.f32.gmra.mxu0 %v1513_v4  ;;  %v1518_v19 = vld [vmem:[%s5619_s1 + $0x528] sm:$0xff]  ;;  %v1903_v4 = vld [vmem:[%s5619_s1 + $0x538] sm:$0xff] }
 0x170   :  { %v819_v38 = vpop.f32.mrf.mxu1  ;;  %2071 = vmatmul.mubr.f32.gmra.mxu1 %v1898_v55  ;;  %1691 = vmatprep.mubr.f32.mxu0 %v1516_v26 }
 0x171   :  { %5861 = vst [vmem:[#allocation31_spill] sm:$0xff] %v4658_v25  ;;  %v4660_v47 = vadd.f32 %v819_v38, %v562_v37  ;;  %2076 = vmatprep.mubr.f32.mxu1 %v1901_v20  ;;  %v564_v0 = vpop.f32.mrf.mxu0  ;;  %v1517_v37 = vld [vmem:[%s5619_s1 + $0x520] sm:$0xff]  ;;  %v1902_v38 = vld [vmem:[%s5619_s1 + $0x530] sm:$0xff] }
 0x172   :  { %v821_v50 = vpop.f32.mrf.mxu1 }
 0x173   :  { %5862 = vst [vmem:[#allocation32_spill] sm:$0xff] %v4660_v47  ;;  %v4674_v55 = vadd.f32 %v821_v50, %v564_v0  ;;  %v568_v17 = vpop.f32.mrf.mxu0  ;;  %1692 = vmatmul.mubr.f32.gmra.mxu0 %v1515_v59  ;;  %v1520_v50 = vld [vmem:[%s5619_s1 + $0x588] sm:$0xff]  ;;  %v1905_v0 = vld [vmem:[%s5619_s1 + $0x598] sm:$0xff] }
 0x174   :  { %v825_v26 = vpop.f32.mrf.mxu1  ;;  %2077 = vmatmul.mubr.f32.gmra.mxu1 %v1900_v54  ;;  %1697 = vmatprep.mubr.f32.mxu0 %v1518_v19 }
 0x175   :  { %5863 = vst [vmem:[#allocation33_spill] sm:$0xff] %v4674_v55  ;;  %v4676_v20 = vadd.f32 %v825_v26, %v568_v17  ;;  %2082 = vmatprep.mubr.f32.mxu1 %v1903_v4  ;;  %v570_v47 = vpop.f32.mrf.mxu0  ;;  %v1519_v17 = vld [vmem:[%s5619_s1 + $0x580] sm:$0xff]  ;;  %v1904_v26 = vld [vmem:[%s5619_s1 + $0x590] sm:$0xff] }
 0x176   :  { %v827_v25 = vpop.f32.mrf.mxu1 }
 0x177   :  { %5864 = vst [vmem:[#allocation34_spill] sm:$0xff] %v4676_v20  ;;  %v4690_v59 = vadd.f32 %v827_v25, %v570_v47  ;;  %v574_v54 = vpop.f32.mrf.mxu0  ;;  %1698 = vmatmul.mubr.f32.gmra.mxu0 %v1517_v37  ;;  %v1522_v25 = vld [vmem:[%s5619_s1 + $0x5e8] sm:$0xff]  ;;  %v1907_v47 = vld [vmem:[%s5619_s1 + $0x5f8] sm:$0xff] }
 0x178   :  { %v831_v19 = vpop.f32.mrf.mxu1  ;;  %2083 = vmatmul.mubr.f32.gmra.mxu1 %v1902_v38  ;;  %1703 = vmatprep.mubr.f32.mxu0 %v1520_v50 }
 0x179   :  { %5865 = vst [vmem:[#allocation35_spill] sm:$0xff] %v4690_v59  ;;  %v4692_v4 = vadd.f32 %v831_v19, %v574_v54  ;;  %2088 = vmatprep.mubr.f32.mxu1 %v1905_v0  ;;  %v576_v20 = vpop.f32.mrf.mxu0  ;;  %v1521_v54 = vld [vmem:[%s5619_s1 + $0x5e0] sm:$0xff]  ;;  %v1906_v19 = vld [vmem:[%s5619_s1 + $0x5f0] sm:$0xff] }
 0x17a   :  { %v833_v55 = vpop.f32.mrf.mxu1 }
 0x17b   :  { %5866 = vst [vmem:[#allocation36_spill] sm:$0xff] %v4692_v4  ;;  %v4706_v37 = vadd.f32 %v833_v55, %v576_v20  ;;  %v580_v38 = vpop.f32.mrf.mxu0  ;;  %1704 = vmatmul.mubr.f32.gmra.mxu0 %v1519_v17  ;;  %v1524_v55 = vld [vmem:[%s5619_s1 + $0x648] sm:$0xff]  ;;  %v1909_v20 = vld [vmem:[%s5619_s1 + $0x658] sm:$0xff] }
 0x17c   :  { %v837_v50 = vpop.f32.mrf.mxu1  ;;  %2089 = vmatmul.mubr.f32.gmra.mxu1 %v1904_v26  ;;  %1709 = vmatprep.mubr.f32.mxu0 %v1522_v25 }
 0x17d   :  { %5867 = vst [vmem:[#allocation37_spill] sm:$0xff] %v4706_v37  ;;  %v4708_v0 = vadd.f32 %v837_v50, %v580_v38  ;;  %2094 = vmatprep.mubr.f32.mxu1 %v1907_v47  ;;  %v582_v4 = vpop.f32.mrf.mxu0  ;;  %v1523_v38 = vld [vmem:[%s5619_s1 + $0x640] sm:$0xff]  ;;  %v1908_v50 = vld [vmem:[%s5619_s1 + $0x650] sm:$0xff] }
 0x17e   :  { %v839_v59 = vpop.f32.mrf.mxu1 }
 0x17f   :  { %5868 = vst [vmem:[#allocation38_spill] sm:$0xff] %v4708_v0  ;;  %v4722_v17 = vadd.f32 %v839_v59, %v582_v4  ;;  %v586_v26 = vpop.f32.mrf.mxu0  ;;  %1710 = vmatmul.mubr.f32.gmra.mxu0 %v1521_v54  ;;  %v1526_v59 = vld [vmem:[%s5619_s1 + $0x6a8] sm:$0xff]  ;;  %v1911_v4 = vld [vmem:[%s5619_s1 + $0x6b8] sm:$0xff] }
 0x180   :  { %v843_v25 = vpop.f32.mrf.mxu1  ;;  %2095 = vmatmul.mubr.f32.gmra.mxu1 %v1906_v19  ;;  %1715 = vmatprep.mubr.f32.mxu0 %v1524_v55 }
 0x181   :  { %5869 = vst [vmem:[#allocation39_spill] sm:$0xff] %v4722_v17  ;;  %v4724_v47 = vadd.f32 %v843_v25, %v586_v26  ;;  %2100 = vmatprep.mubr.f32.mxu1 %v1909_v20  ;;  %v588_v0 = vpop.f32.mrf.mxu0  ;;  %v1525_v26 = vld [vmem:[%s5619_s1 + $0x6a0] sm:$0xff]  ;;  %v1910_v25 = vld [vmem:[%s5619_s1 + $0x6b0] sm:$0xff] }
 0x182   :  { %v845_v37 = vpop.f32.mrf.mxu1 }
 0x183   :  { %5870 = vst [vmem:[#allocation40_spill] sm:$0xff] %v4724_v47  ;;  %v4738_v54 = vadd.f32 %v845_v37, %v588_v0  ;;  %v978_v19 = vpop.f32.mrf.mxu0  ;;  %1716 = vmatmul.mubr.f32.gmra.mxu0 %v1523_v38  ;;  %v1528_v37 = vld [vmem:[%s5619_s1 + $0x708] sm:$0xff]  ;;  %v1913_v0 = vld [vmem:[%s5619_s1 + $0x718] sm:$0xff] }
 0x184   :  { %v1235_v55 = vpop.f32.mrf.mxu1  ;;  %2101 = vmatmul.mubr.f32.gmra.mxu1 %v1908_v50  ;;  %1721 = vmatprep.mubr.f32.mxu0 %v1526_v59 }
 0x185   :  { %5871 = vst [vmem:[#allocation41_spill] sm:$0xff] %v4738_v54  ;;  %v4740_v20 = vadd.f32 %v1235_v55, %v978_v19  ;;  %2106 = vmatprep.mubr.f32.mxu1 %v1911_v4  ;;  %v980_v47 = vpop.f32.mrf.mxu0  ;;  %v1527_v19 = vld [vmem:[%s5619_s1 + $0x700] sm:$0xff]  ;;  %v1912_v55 = vld [vmem:[%s5619_s1 + $0x710] sm:$0xff] }
 0x186   :  { %v1237_v17 = vpop.f32.mrf.mxu1 }
 0x187   :  { %v4754_v38 = vadd.f32 %v1237_v17, %v980_v47  ;;  %v984_v50 = vpop.f32.mrf.mxu0  ;;  %1722 = vmatmul.mubr.f32.gmra.mxu0 %v1525_v26  ;;  %v1530_v17 = vld [vmem:[%s5619_s1 + $0x768] sm:$0xff]  ;;  %v1915_v47 = vld [vmem:[%s5619_s1 + $0x778] sm:$0xff] }
 0x188   :  { %v1241_v59 = vpop.f32.mrf.mxu1  ;;  %2107 = vmatmul.mubr.f32.gmra.mxu1 %v1910_v25  ;;  %1727 = vmatprep.mubr.f32.mxu0 %v1528_v37 }
 0x189   :  { %v4756_v4 = vadd.f32 %v1241_v59, %v984_v50  ;;  %2112 = vmatprep.mubr.f32.mxu1 %v1913_v0  ;;  %v986_v54 = vpop.f32.mrf.mxu0  ;;  %v1529_v50 = vld [vmem:[%s5619_s1 + $0x760] sm:$0xff]  ;;  %v1914_v59 = vld [vmem:[%s5619_s1 + $0x770] sm:$0xff] }
 0x18a   :  { %v1243_v6 = vpop.f32.mrf.mxu1 }
 0x18b   :  { %v4770_v26 = vadd.f32 %v1243_v6, %v986_v54  ;;  %v990_v25 = vpop.f32.mrf.mxu0  ;;  %1728 = vmatmul.mubr.f32.gmra.mxu0 %v1527_v19  ;;  %v1532_v6 = vld [vmem:[%s5619_s1 + $0x7c8] sm:$0xff]  ;;  %v1917_v54 = vld [vmem:[%s5619_s1 + $0x7d8] sm:$0xff] }
 0x18c   :  { %v1247_v37 = vpop.f32.mrf.mxu1  ;;  %2113 = vmatmul.mubr.f32.gmra.mxu1 %v1912_v55  ;;  %1733 = vmatprep.mubr.f32.mxu0 %v1530_v17 }
 0x18d   :  { %v4772_v0 = vadd.f32 %v1247_v37, %v990_v25  ;;  %2118 = vmatprep.mubr.f32.mxu1 %v1915_v47  ;;  %v992_v41 = vpop.f32.mrf.mxu0  ;;  %v1531_v25 = vld [vmem:[%s5619_s1 + $0x7c0] sm:$0xff]  ;;  %v1916_v37 = vld [vmem:[%s5619_s1 + $0x7d0] sm:$0xff] }
 0x18e   :  { %v1249_v32 = vpop.f32.mrf.mxu1 }
 0x18f   :  { %v4786_v19 = vadd.f32 %v1249_v32, %v992_v41  ;;  %v996_v55 = vpop.f32.mrf.mxu0  ;;  %1734 = vmatmul.mubr.f32.gmra.mxu0 %v1529_v50  ;;  %v1534_v32 = vld [vmem:[%s5619_s1 + $0x828] sm:$0xff]  ;;  %v1919_v41 = vld [vmem:[%s5619_s1 + $0x838] sm:$0xff] }
 0x190   :  { %v1253_v17 = vpop.f32.mrf.mxu1  ;;  %2119 = vmatmul.mubr.f32.gmra.mxu1 %v1914_v59  ;;  %1739 = vmatprep.mubr.f32.mxu0 %v1532_v6 }
 0x191   :  { %v4788_v47 = vadd.f32 %v1253_v17, %v996_v55  ;;  %2124 = vmatprep.mubr.f32.mxu1 %v1917_v54  ;;  %v998_v12 = vpop.f32.mrf.mxu0  ;;  %v1533_v55 = vld [vmem:[%s5619_s1 + $0x820] sm:$0xff]  ;;  %v1918_v17 = vld [vmem:[%s5619_s1 + $0x830] sm:$0xff] }
 0x192   :  { %v1255_v1 = vpop.f32.mrf.mxu1 }
 0x193   :  { %v4802_v50 = vadd.f32 %v1255_v1, %v998_v12  ;;  %v1002_v59 = vpop.f32.mrf.mxu0  ;;  %1740 = vmatmul.mubr.f32.gmra.mxu0 %v1531_v25  ;;  %v1536_v1 = vld [vmem:[%s5619_s1 + $0x888] sm:$0xff]  ;;  %v1921_v12 = vld [vmem:[%s5619_s1 + $0x898] sm:$0xff] }
 0x194   :  { %v1259_v6 = vpop.f32.mrf.mxu1  ;;  %2125 = vmatmul.mubr.f32.gmra.mxu1 %v1916_v37  ;;  %1745 = vmatprep.mubr.f32.mxu0 %v1534_v32 }
 0x195   :  { %v4804_v54 = vadd.f32 %v1259_v6, %v1002_v59  ;;  %2130 = vmatprep.mubr.f32.mxu1 %v1919_v41  ;;  %v1004_v40 = vpop.f32.mrf.mxu0  ;;  %v1535_v59 = vld [vmem:[%s5619_s1 + $0x880] sm:$0xff]  ;;  %v1920_v6 = vld [vmem:[%s5619_s1 + $0x890] sm:$0xff] }
 0x196   :  { %v1261_v34 = vpop.f32.mrf.mxu1 }
 0x197   :  { %v4818_v25 = vadd.f32 %v1261_v34, %v1004_v40  ;;  %v1008_v37 = vpop.f32.mrf.mxu0  ;;  %1746 = vmatmul.mubr.f32.gmra.mxu0 %v1533_v55  ;;  %v1538_v34 = vld [vmem:[%s5619_s1 + $0x8e8] sm:$0xff]  ;;  %v1923_v40 = vld [vmem:[%s5619_s1 + $0x8f8] sm:$0xff] }
 0x198   :  { %v1265_v32 = vpop.f32.mrf.mxu1  ;;  %2131 = vmatmul.mubr.f32.gmra.mxu1 %v1918_v17  ;;  %1751 = vmatprep.mubr.f32.mxu0 %v1536_v1 }
 0x199   :  { %v4820_v41 = vadd.f32 %v1265_v32, %v1008_v37  ;;  %2136 = vmatprep.mubr.f32.mxu1 %v1921_v12  ;;  %v1010_v15 = vpop.f32.mrf.mxu0  ;;  %v1537_v37 = vld [vmem:[%s5619_s1 + $0x8e0] sm:$0xff]  ;;  %v1922_v32 = vld [vmem:[%s5619_s1 + $0x8f0] sm:$0xff] }
 0x19a   :  { %v1267_v10 = vpop.f32.mrf.mxu1 }
 0x19b   :  { %v4834_v55 = vadd.f32 %v1267_v10, %v1010_v15  ;;  %v1014_v17 = vpop.f32.mrf.mxu0  ;;  %1752 = vmatmul.mubr.f32.gmra.mxu0 %v1535_v59  ;;  %v1540_v10 = vld [vmem:[%s5619_s1 + $0x948] sm:$0xff]  ;;  %v1925_v15 = vld [vmem:[%s5619_s1 + $0x958] sm:$0xff] }
 0x19c   :  { %v1271_v1 = vpop.f32.mrf.mxu1  ;;  %2137 = vmatmul.mubr.f32.gmra.mxu1 %v1920_v6  ;;  %1757 = vmatprep.mubr.f32.mxu0 %v1538_v34 }
 0x19d   :  { %v4836_v12 = vadd.f32 %v1271_v1, %v1014_v17  ;;  %2142 = vmatprep.mubr.f32.mxu1 %v1923_v40  ;;  %v1016_v53 = vpop.f32.mrf.mxu0  ;;  %v1539_v17 = vld [vmem:[%s5619_s1 + $0x940] sm:$0xff]  ;;  %v1924_v1 = vld [vmem:[%s5619_s1 + $0x950] sm:$0xff] }
 0x19e   :  { %v1273_v44 = vpop.f32.mrf.mxu1 }
 0x19f   :  { %v4850_v59 = vadd.f32 %v1273_v44, %v1016_v53  ;;  %v1020_v6 = vpop.f32.mrf.mxu0  ;;  %1758 = vmatmul.mubr.f32.gmra.mxu0 %v1537_v37  ;;  %v1542_v44 = vld [vmem:[%s5619_s1 + $0x9a8] sm:$0xff]  ;;  %v1927_v53 = vld [vmem:[%s5619_s1 + $0x9b8] sm:$0xff] }
 0x1a0   :  { %v1277_v34 = vpop.f32.mrf.mxu1  ;;  %2143 = vmatmul.mubr.f32.gmra.mxu1 %v1922_v32  ;;  %1763 = vmatprep.mubr.f32.mxu0 %v1540_v10 }
 0x1a1   :  { %v4852_v40 = vadd.f32 %v1277_v34, %v1020_v6  ;;  %2148 = vmatprep.mubr.f32.mxu1 %v1925_v15  ;;  %v1022_v29 = vpop.f32.mrf.mxu0  ;;  %v1541_v6 = vld [vmem:[%s5619_s1 + $0x9a0] sm:$0xff]  ;;  %v1926_v34 = vld [vmem:[%s5619_s1 + $0x9b0] sm:$0xff] }
 0x1a2   :  { %v1279_v23 = vpop.f32.mrf.mxu1 }
 0x1a3   :  { %v4866_v37 = vadd.f32 %v1279_v23, %v1022_v29  ;;  %v1026_v32 = vpop.f32.mrf.mxu0  ;;  %1764 = vmatmul.mubr.f32.gmra.mxu0 %v1539_v17  ;;  %v1544_v23 = vld [vmem:[%s5619_s1 + $0xa08] sm:$0xff]  ;;  %v1929_v29 = vld [vmem:[%s5619_s1 + $0xa18] sm:$0xff] }
 0x1a4   :  { %v1283_v10 = vpop.f32.mrf.mxu1  ;;  %2149 = vmatmul.mubr.f32.gmra.mxu1 %v1924_v1  ;;  %1769 = vmatprep.mubr.f32.mxu0 %v1542_v44 }
 0x1a5   :  { %v4868_v15 = vadd.f32 %v1283_v10, %v1026_v32  ;;  %2154 = vmatprep.mubr.f32.mxu1 %v1927_v53  ;;  %v1028_v11 = vpop.f32.mrf.mxu0  ;;  %v1543_v32 = vld [vmem:[%s5619_s1 + $0xa00] sm:$0xff]  ;;  %v1928_v10 = vld [vmem:[%s5619_s1 + $0xa10] sm:$0xff] }
 0x1a6   :  { %v1285_v5 = vpop.f32.mrf.mxu1 }
 0x1a7   :  { %v4882_v17 = vadd.f32 %v1285_v5, %v1028_v11  ;;  %v1032_v1 = vpop.f32.mrf.mxu0  ;;  %1770 = vmatmul.mubr.f32.gmra.mxu0 %v1541_v6  ;;  %v1546_v5 = vld [vmem:[%s5619_s1 + $0xa68] sm:$0xff]  ;;  %v1931_v11 = vld [vmem:[%s5619_s1 + $0xa78] sm:$0xff] }
 0x1a8   :  { %v1289_v44 = vpop.f32.mrf.mxu1  ;;  %2155 = vmatmul.mubr.f32.gmra.mxu1 %v1926_v34  ;;  %1775 = vmatprep.mubr.f32.mxu0 %v1544_v23 }
 0x1a9   :  { %v4884_v53 = vadd.f32 %v1289_v44, %v1032_v1  ;;  %2160 = vmatprep.mubr.f32.mxu1 %v1929_v29  ;;  %v1034_v52 = vpop.f32.mrf.mxu0  ;;  %v1545_v1 = vld [vmem:[%s5619_s1 + $0xa60] sm:$0xff]  ;;  %v1930_v44 = vld [vmem:[%s5619_s1 + $0xa70] sm:$0xff] }
 0x1aa   :  { %v1291_v45 = vpop.f32.mrf.mxu1 }
 0x1ab   :  { %v4898_v6 = vadd.f32 %v1291_v45, %v1034_v52  ;;  %v1038_v34 = vpop.f32.mrf.mxu0  ;;  %1776 = vmatmul.mubr.f32.gmra.mxu0 %v1543_v32  ;;  %v1548_v45 = vld [vmem:[%s5619_s1 + $0xac8] sm:$0xff]  ;;  %v1933_v52 = vld [vmem:[%s5619_s1 + $0xad8] sm:$0xff] }
 0x1ac   :  { %v1295_v23 = vpop.f32.mrf.mxu1  ;;  %2161 = vmatmul.mubr.f32.gmra.mxu1 %v1928_v10  ;;  %1781 = vmatprep.mubr.f32.mxu0 %v1546_v5 }
 0x1ad   :  { %v4900_v29 = vadd.f32 %v1295_v23, %v1038_v34  ;;  %2166 = vmatprep.mubr.f32.mxu1 %v1931_v11  ;;  %v1040_v33 = vpop.f32.mrf.mxu0  ;;  %v1547_v34 = vld [vmem:[%s5619_s1 + $0xac0] sm:$0xff]  ;;  %v1932_v23 = vld [vmem:[%s5619_s1 + $0xad0] sm:$0xff] }
 0x1ae   :  { %v1297_v27 = vpop.f32.mrf.mxu1 }
 0x1af   :  { %v4914_v32 = vadd.f32 %v1297_v27, %v1040_v33  ;;  %v1044_v10 = vpop.f32.mrf.mxu0  ;;  %1782 = vmatmul.mubr.f32.gmra.mxu0 %v1545_v1  ;;  %v1550_v27 = vld [vmem:[%s5619_s1 + $0xb28] sm:$0xff]  ;;  %v1935_v33 = vld [vmem:[%s5619_s1 + $0xb38] sm:$0xff] }
 0x1b0   :  { %v1301_v5 = vpop.f32.mrf.mxu1  ;;  %2167 = vmatmul.mubr.f32.gmra.mxu1 %v1930_v44  ;;  %1787 = vmatprep.mubr.f32.mxu0 %v1548_v45 }
 0x1b1   :  { %v4916_v11 = vadd.f32 %v1301_v5, %v1044_v10  ;;  %2172 = vmatprep.mubr.f32.mxu1 %v1933_v52  ;;  %v1046_v16 = vpop.f32.mrf.mxu0  ;;  %v1549_v10 = vld [vmem:[%s5619_s1 + $0xb20] sm:$0xff]  ;;  %v1934_v5 = vld [vmem:[%s5619_s1 + $0xb30] sm:$0xff] }
 0x1b2   :  { %v1303_v8 = vpop.f32.mrf.mxu1 }
 0x1b3   :  { %v4930_v1 = vadd.f32 %v1303_v8, %v1046_v16  ;;  %v1050_v44 = vpop.f32.mrf.mxu0  ;;  %1788 = vmatmul.mubr.f32.gmra.mxu0 %v1547_v34  ;;  %v1552_v8 = vld [vmem:[%s5619_s1 + $0xb88] sm:$0xff]  ;;  %v1937_v16 = vld [vmem:[%s5619_s1 + $0xb98] sm:$0xff] }
 0x1b4   :  { %v1307_v45 = vpop.f32.mrf.mxu1  ;;  %2173 = vmatmul.mubr.f32.gmra.mxu1 %v1932_v23  ;;  %1793 = vmatprep.mubr.f32.mxu0 %v1550_v27 }
 0x1b5   :  { %5872 = vst [vmem:[#allocation42_spill] sm:$0xff] %v4930_v1  ;;  %v4932_v52 = vadd.f32 %v1307_v45, %v1050_v44  ;;  %2178 = vmatprep.mubr.f32.mxu1 %v1935_v33  ;;  %v1052_v63 = vpop.f32.mrf.mxu0  ;;  %v1551_v44 = vld [vmem:[%s5619_s1 + $0xb80] sm:$0xff]  ;;  %v1936_v45 = vld [vmem:[%s5619_s1 + $0xb90] sm:$0xff] }
 0x1b6   :  { %v1309_v48 = vpop.f32.mrf.mxu1 }
 0x1b7   :  { %5873 = vst [vmem:[#allocation43_spill] sm:$0xff] %v4932_v52  ;;  %v4946_v34 = vadd.f32 %v1309_v48, %v1052_v63  ;;  %v1056_v23 = vpop.f32.mrf.mxu0  ;;  %1794 = vmatmul.mubr.f32.gmra.mxu0 %v1549_v10  ;;  %v1554_v48 = vld [vmem:[%s5619_s1 + $0xbe8] sm:$0xff]  ;;  %v1939_v63 = vld [vmem:[%s5619_s1 + $0xbf8] sm:$0xff] }
 0x1b8   :  { %v1313_v27 = vpop.f32.mrf.mxu1  ;;  %2179 = vmatmul.mubr.f32.gmra.mxu1 %v1934_v5  ;;  %1799 = vmatprep.mubr.f32.mxu0 %v1552_v8 }
 0x1b9   :  { %5874 = vst [vmem:[#allocation44_spill] sm:$0xff] %v4946_v34  ;;  %v4948_v33 = vadd.f32 %v1313_v27, %v1056_v23  ;;  %2184 = vmatprep.mubr.f32.mxu1 %v1937_v16  ;;  %v1058_v39 = vpop.f32.mrf.mxu0  ;;  %v1553_v23 = vld [vmem:[%s5619_s1 + $0xbe0] sm:$0xff]  ;;  %v1938_v27 = vld [vmem:[%s5619_s1 + $0xbf0] sm:$0xff] }
 0x1ba   :  { %v1315_v31 = vpop.f32.mrf.mxu1 }
 0x1bb   :  { %5875 = vst [vmem:[#allocation45_spill] sm:$0xff] %v4948_v33  ;;  %v4962_v10 = vadd.f32 %v1315_v31, %v1058_v39  ;;  %v1062_v5 = vpop.f32.mrf.mxu0  ;;  %1800 = vmatmul.mubr.f32.gmra.mxu0 %v1551_v44 }
 0x1bc   :  { %v1319_v8 = vpop.f32.mrf.mxu1  ;;  %2185 = vmatmul.mubr.f32.gmra.mxu1 %v1936_v45  ;;  %1805 = vmatprep.mubr.f32.mxu0 %v1554_v48 }
 0x1bd   :  { %5876 = vst [vmem:[#allocation46_spill] sm:$0xff] %v4962_v10  ;;  %v4964_v16 = vadd.f32 %v1319_v8, %v1062_v5  ;;  %2190 = vmatprep.mubr.f32.mxu1 %v1939_v63  ;;  %v1064_v33 = vpop.f32.mrf.mxu0 }
 0x1be   :  { %v1321_v34 = vpop.f32.mrf.mxu1 }
 0x1bf   :  { %5877 = vst [vmem:[#allocation47_spill] sm:$0xff] %v4964_v16  ;;  %v4972_v31 = vadd.f32 %v1321_v34, %v1064_v33  ;;  %v1068_v39 = vpop.f32.mrf.mxu0  ;;  %1806 = vmatmul.mubr.f32.gmra.mxu0 %v1553_v23 }
 0x1c0   :  { %v1325_v10 = vpop.f32.mrf.mxu1  ;;  %2191 = vmatmul.mubr.f32.gmra.mxu1 %v1938_v27 }
 0x1c1   :  { %5878 = vst [vmem:[#allocation48_spill] sm:$0xff] %v4972_v31  ;;  %v4974_v44 = vadd.f32 %v1325_v10, %v1068_v39  ;;  %v1070_v45 = vpop.f32.mrf.mxu0 }
 0x1c2   :  { %v1327_v48 = vpop.f32.mrf.mxu1 }
 0x1c3   :  { %5879 = vst [vmem:[#allocation49_spill] sm:$0xff] %v4974_v44  ;;  %v4976_v63 = vadd.f32 %v1327_v48, %v1070_v45  ;;  %v1074_v5 = vpop.f32.mrf.mxu0 }
 0x1c4   :  { %v1331_v8 = vpop.f32.mrf.mxu1 }
 0x1c5   :  { %5880 = vst [vmem:[#allocation50_spill] sm:$0xff] %v4976_v63  ;;  %v4978_v16 = vadd.f32 %v1331_v8, %v1074_v5  ;;  %v1076_v52 = vpop.f32.mrf.mxu0 }
 0x1c6   :  { %v1333_v22 = vpop.f32.mrf.mxu1 }
 0x1c7   :  { %5881 = vst [vmem:[#allocation51_spill] sm:$0xff] %v4978_v16  ;;  %v4980_v1 = vadd.f32 %v1333_v22, %v1076_v52  ;;  %v1080_v34 = vpop.f32.mrf.mxu0 }
 0x1c8   :  { %v1337_v33 = vpop.f32.mrf.mxu1 }
 0x1c9   :  { %5882 = vst [vmem:[#allocation52_spill] sm:$0xff] %v4980_v1  ;;  %v4982_v31 = vadd.f32 %v1337_v33, %v1080_v34  ;;  %v1082_v23 = vpop.f32.mrf.mxu0 }
 0x1ca   :  { %v1339_v27 = vpop.f32.mrf.mxu1 }
 0x1cb   :  { %5883 = vst [vmem:[#allocation53_spill] sm:$0xff] %v4982_v31  ;;  %v4984_v10 = vadd.f32 %v1339_v27, %v1082_v23  ;;  %v1086_v39 = vpop.f32.mrf.mxu0 }
 0x1cc   :  { %v1343_v44 = vpop.f32.mrf.mxu1 }
 0x1cd   :  { %5884 = vst [vmem:[#allocation54_spill] sm:$0xff] %v4984_v10  ;;  %v4986_v45 = vadd.f32 %v1343_v44, %v1086_v39  ;;  %v1088_v48 = vpop.f32.mrf.mxu0 }
 0x1ce   :  { %v1345_v63 = vpop.f32.mrf.mxu1 }
 0x1cf   :  { %5885 = vst [vmem:[#allocation55_spill] sm:$0xff] %v4986_v45  ;;  %v4988_v5 = vadd.f32 %v1345_v63, %v1088_v48  ;;  %v1092_v8 = vpop.f32.mrf.mxu0 }
 0x1d0   :  { %v1349_v16 = vpop.f32.mrf.mxu1 }
 0x1d1   :  { %5886 = vst [vmem:[#allocation56_spill] sm:$0xff] %v4988_v5  ;;  %v4990_v22 = vadd.f32 %v1349_v16, %v1092_v8  ;;  %v1094_v52 = vpop.f32.mrf.mxu0 }
 0x1d2   :  { %v1351_v1 = vpop.f32.mrf.mxu1 }
 0x1d3   :  { %5887 = vst [vmem:[#allocation57_spill] sm:$0xff] %v4990_v22  ;;  %v4992_v34 = vadd.f32 %v1351_v1, %v1094_v52  ;;  %v1098_v33 = vpop.f32.mrf.mxu0 }
 0x1d4   :  { %v1355_v31 = vpop.f32.mrf.mxu1 }
 0x1d5   :  { %5888 = vst [vmem:[#allocation58_spill] sm:$0xff] %v4992_v34  ;;  %v4994_v23 = vadd.f32 %v1355_v31, %v1098_v33  ;;  %v1100_v27 = vpop.f32.mrf.mxu0 }
 0x1d6   :  { %v1357_v10 = vpop.f32.mrf.mxu1 }
 0x1d7   :  { %5889 = vst [vmem:[#allocation59_spill] sm:$0xff] %v4994_v23  ;;  %v4996_v44 = vadd.f32 %v1357_v10, %v1100_v27  ;;  %v1104_v39 = vpop.f32.mrf.mxu0 }
 0x1d8   :  { %v1361_v45 = vpop.f32.mrf.mxu1 }
 0x1d9   :  { %5890 = vst [vmem:[#allocation60_spill] sm:$0xff] %v4996_v44  ;;  %v4998_v63 = vadd.f32 %v1361_v45, %v1104_v39  ;;  %v1106_v48 = vpop.f32.mrf.mxu0 }
 0x1da   :  { %v1363_v5 = vpop.f32.mrf.mxu1 }
 0x1db   :  { %5891 = vst [vmem:[#allocation61_spill] sm:$0xff] %v4998_v63  ;;  %v5000_v16 = vadd.f32 %v1363_v5, %v1106_v48  ;;  %v1110_v8 = vpop.f32.mrf.mxu0 }
 0x1dc   :  { %v1367_v22 = vpop.f32.mrf.mxu1 }
 0x1dd   :  { %5892 = vst [vmem:[#allocation62_spill] sm:$0xff] %v5000_v16  ;;  %v5002_v1 = vadd.f32 %v1367_v22, %v1110_v8  ;;  %v1112_v52 = vpop.f32.mrf.mxu0 }
 0x1de   :  { %v1369_v34 = vpop.f32.mrf.mxu1 }
 0x1df   :  { %5893 = vst [vmem:[#allocation63_spill] sm:$0xff] %v5002_v1  ;;  %v5004_v31 = vadd.f32 %v1369_v34, %v1112_v52  ;;  %v1116_v33 = vpop.f32.mrf.mxu0 }
 0x1e0   :  { %v1373_v23 = vpop.f32.mrf.mxu1 }
 0x1e1   :  { %5894 = vst [vmem:[#allocation64_spill] sm:$0xff] %v5004_v31  ;;  %v5006_v10 = vadd.f32 %v1373_v23, %v1116_v33  ;;  %v1118_v27 = vpop.f32.mrf.mxu0 }
 0x1e2   :  { %v1375_v44 = vpop.f32.mrf.mxu1 }
 0x1e3   :  { %5895 = vst [vmem:[#allocation65_spill] sm:$0xff] %v5006_v10  ;;  %v5008_v45 = vadd.f32 %v1375_v44, %v1118_v27  ;;  %v1122_v39 = vpop.f32.mrf.mxu0 }
 0x1e4   :  { %v1379_v63 = vpop.f32.mrf.mxu1 }
 0x1e5   :  { %5896 = vst [vmem:[#allocation66_spill] sm:$0xff] %v5008_v45  ;;  %v5010_v5 = vadd.f32 %v1379_v63, %v1122_v39  ;;  %v1124_v48 = vpop.f32.mrf.mxu0 }
 0x1e6   :  { %v1381_v16 = vpop.f32.mrf.mxu1 }
 0x1e7   :  { %5897 = vst [vmem:[#allocation67_spill] sm:$0xff] %v5010_v5  ;;  %v5012_v22 = vadd.f32 %v1381_v16, %v1124_v48  ;;  %v1128_v8 = vpop.f32.mrf.mxu0 }
 0x1e8   :  { %v1385_v1 = vpop.f32.mrf.mxu1 }
 0x1e9   :  { %5898 = vst [vmem:[#allocation68_spill] sm:$0xff] %v5012_v22  ;;  %v5014_v34 = vadd.f32 %v1385_v1, %v1128_v8  ;;  %v1130_v52 = vpop.f32.mrf.mxu0 }
 0x1ea   :  { %v1387_v31 = vpop.f32.mrf.mxu1 }
 0x1eb   :  { %5899 = vst [vmem:[#allocation69_spill] sm:$0xff] %v5014_v34  ;;  %v5016_v23 = vadd.f32 %v1387_v31, %v1130_v52  ;;  %v1134_v33 = vpop.f32.mrf.mxu0 }
 0x1ec   :  { %v1391_v10 = vpop.f32.mrf.mxu1 }
 0x1ed   :  { %5900 = vst [vmem:[#allocation70_spill] sm:$0xff] %v5016_v23  ;;  %v5018_v44 = vadd.f32 %v1391_v10, %v1134_v33  ;;  %v1136_v27 = vpop.f32.mrf.mxu0 }
 0x1ee   :  { %v1393_v45 = vpop.f32.mrf.mxu1 }
 0x1ef   :  { %5901 = vst [vmem:[#allocation71_spill] sm:$0xff] %v5018_v44  ;;  %v5020_v63 = vadd.f32 %v1393_v45, %v1136_v27  ;;  %v1140_v39 = vpop.f32.mrf.mxu0 }
 0x1f0   :  { %v1397_v5 = vpop.f32.mrf.mxu1 }
 0x1f1   :  { %5902 = vst [vmem:[#allocation72_spill] sm:$0xff] %v5020_v63  ;;  %v5022_v16 = vadd.f32 %v1397_v5, %v1140_v39  ;;  %v1142_v48 = vpop.f32.mrf.mxu0 }
 0x1f2   :  { %v1399_v22 = vpop.f32.mrf.mxu1 }
 0x1f3   :  { %5903 = vst [vmem:[#allocation73_spill] sm:$0xff] %v5022_v16  ;;  %v5024_v1 = vadd.f32 %v1399_v22, %v1142_v48  ;;  %v1146_v8 = vpop.f32.mrf.mxu0 }
 0x1f4   :  { %v1403_v34 = vpop.f32.mrf.mxu1 }
 0x1f5   :  { %5904 = vst [vmem:[#allocation74_spill] sm:$0xff] %v5024_v1  ;;  %v5026_v31 = vadd.f32 %v1403_v34, %v1146_v8  ;;  %v1148_v52 = vpop.f32.mrf.mxu0 }
 0x1f6   :  { %v1405_v23 = vpop.f32.mrf.mxu1 }
 0x1f7   :  { %5905 = vst [vmem:[#allocation75_spill] sm:$0xff] %v5026_v31  ;;  %v5028_v10 = vadd.f32 %v1405_v23, %v1148_v52  ;;  %v1152_v33 = vpop.f32.mrf.mxu0 }
 0x1f8   :  { %v1409_v44 = vpop.f32.mrf.mxu1 }
 0x1f9   :  { %5906 = vst [vmem:[#allocation76_spill] sm:$0xff] %v5028_v10  ;;  %v5030_v45 = vadd.f32 %v1409_v44, %v1152_v33  ;;  %v1154_v27 = vpop.f32.mrf.mxu0 }
 0x1fa   :  { %v1411_v63 = vpop.f32.mrf.mxu1 }
 0x1fb   :  { %5907 = vst [vmem:[#allocation77_spill] sm:$0xff] %v5030_v45  ;;  %v5032_v5 = vadd.f32 %v1411_v63, %v1154_v27  ;;  %v1158_v39 = vpop.f32.mrf.mxu0 }
 0x1fc   :  { %v1415_v16 = vpop.f32.mrf.mxu1 }
 0x1fd   :  { %v5034_v22 = vadd.f32 %v1415_v16, %v1158_v39  ;;  %v1160_v48 = vpop.f32.mrf.mxu0 }
 0x1fe   :  { %v1417_v1 = vpop.f32.mrf.mxu1 }
 0x1ff   :  { %v5036_v34 = vadd.f32 %v1417_v1, %v1160_v48  ;;  %v1164_v8 = vpop.f32.mrf.mxu0 }
 0x200   :  { %v1421_v31 = vpop.f32.mrf.mxu1 }
 0x201   :  { %v5038_v23 = vadd.f32 %v1421_v31, %v1164_v8  ;;  %v1166_v52 = vpop.f32.mrf.mxu0 }
 0x202   :  { %v1423_v10 = vpop.f32.mrf.mxu1 }
 0x203   :  { %v5040_v44 = vadd.f32 %v1423_v10, %v1166_v52  ;;  %v1621_v33 = vpop.f32.mrf.mxu0 }
 0x204   :  { %v2006_v45 = vpop.f32.mrf.mxu1  ;;  %v1812_v63 = vadd.f32 %v1621_v33, %v4138_v46 }
 0x205   :  { %v2197_v27 = vadd.f32 %v2006_v45, %v4740_v20  ;;  %v1623_v16 = vpop.f32.mrf.mxu0 }
 0x206   :  { %v2008_v39 = vpop.f32.mrf.mxu1  ;;  %2261 = vst [vmem:[%s5620_s2] sm:$0xff] %v1812_v63  ;;  %v1813_v1 = vadd.f32 %v1623_v16, %v4149_v57 }
 0x207   :  { %2326 = vst [vmem:[%s5621_s3] sm:$0xff] %v2197_v27  ;;  %v2198_v31 = vadd.f32 %v2008_v39, %v4754_v38  ;;  %v1627_v10 = vpop.f32.mrf.mxu0 }
 0x208   :  { %v2012_v48 = vpop.f32.mrf.mxu1  ;;  %2263 = vst.msk [vmem:[%s5620_s2 + $0x8] sm:$0xff] %vm2262_vm0, %v1813_v1  ;;  %v1814_v46 = vadd.f32 %v1627_v10, %v4160_v61 }
 0x209   :  { %2327 = vst.msk [vmem:[%s5621_s3 + $0x8] sm:$0xff] %vm2262_vm0, %v2198_v31  ;;  %v2199_v20 = vadd.f32 %v2012_v48, %v4756_v4  ;;  %v1629_v45 = vpop.f32.mrf.mxu0 }
 0x20a   :  { %v2014_v57 = vpop.f32.mrf.mxu1  ;;  %2264 = vst [vmem:[%s5620_s2 + $0x10] sm:$0xff] %v1814_v46  ;;  %v1815_v38 = vadd.f32 %v1629_v45, %v4171_v3 }
 0x20b   :  { %2328 = vst [vmem:[%s5621_s3 + $0x10] sm:$0xff] %v2199_v20  ;;  %v2200_v8 = vadd.f32 %v2014_v57, %v4770_v26  ;;  %v1633_v52 = vpop.f32.mrf.mxu0 }
 0x20c   :  { %v2018_v33 = vpop.f32.mrf.mxu1  ;;  %2265 = vst.msk [vmem:[%s5620_s2 + $0x18] sm:$0xff] %vm2262_vm0, %v1815_v38  ;;  %v1816_v61 = vadd.f32 %v1633_v52, %v4182_v58 }
 0x20d   :  { %2329 = vst.msk [vmem:[%s5621_s3 + $0x18] sm:$0xff] %vm2262_vm0, %v2200_v8  ;;  %v2201_v4 = vadd.f32 %v2018_v33, %v4772_v0  ;;  %v1635_v63 = vpop.f32.mrf.mxu0 }
 0x20e   :  { %v2020_v3 = vpop.f32.mrf.mxu1  ;;  %2266 = vst [vmem:[%s5620_s2 + $0x20] sm:$0xff] %v1816_v61  ;;  %v1817_v26 = vadd.f32 %v1635_v63, %v4193_v62 }
 0x20f   :  { %2330 = vst [vmem:[%s5621_s3 + $0x20] sm:$0xff] %v2201_v4  ;;  %v2202_v27 = vadd.f32 %v2020_v3, %v4786_v19  ;;  %v1639_v16 = vpop.f32.mrf.mxu0 }
 0x210   :  { %v2024_v39 = vpop.f32.mrf.mxu1  ;;  %2267 = vst.msk [vmem:[%s5620_s2 + $0x28] sm:$0xff] %vm2262_vm0, %v1817_v26  ;;  %v1818_v58 = vadd.f32 %v1639_v16, %v4204_v18 }
 0x211   :  { %2331 = vst.msk [vmem:[%s5621_s3 + $0x28] sm:$0xff] %vm2262_vm0, %v2202_v27  ;;  %v2203_v0 = vadd.f32 %v2024_v39, %v4788_v47  ;;  %v1641_v1 = vpop.f32.mrf.mxu0 }
 0x212   :  { %v2026_v62 = vpop.f32.mrf.mxu1  ;;  %2268 = vst [vmem:[%s5620_s2 + $0x30] sm:$0xff] %v1818_v58  ;;  %v1819_v19 = vadd.f32 %v1641_v1, %v4215_v24 }
 0x213   :  { %2332 = vst [vmem:[%s5621_s3 + $0x30] sm:$0xff] %v2203_v0  ;;  %v2204_v31 = vadd.f32 %v2026_v62, %v4802_v50  ;;  %v1645_v10 = vpop.f32.mrf.mxu0 }
 0x214   :  { %v2030_v48 = vpop.f32.mrf.mxu1  ;;  %2269 = vst.msk [vmem:[%s5620_s2 + $0x38] sm:$0xff] %vm2262_vm0, %v1819_v19  ;;  %v1820_v18 = vadd.f32 %v1645_v10, %v4226_v30 }
 0x215   :  { %2333 = vst.msk [vmem:[%s5621_s3 + $0x38] sm:$0xff] %vm2262_vm0, %v2204_v31  ;;  %v2205_v47 = vadd.f32 %v2030_v48, %v4804_v54  ;;  %v1647_v46 = vpop.f32.mrf.mxu0 }
 0x216   :  { %v2032_v24 = vpop.f32.mrf.mxu1  ;;  %2270 = vst [vmem:[%s5620_s2 + $0x40] sm:$0xff] %v1820_v18  ;;  %v1821_v50 = vadd.f32 %v1647_v46, %v4237_v36 }
 0x217   :  { %2334 = vst [vmem:[%s5621_s3 + $0x40] sm:$0xff] %v2205_v47  ;;  %v2206_v20 = vadd.f32 %v2032_v24, %v4818_v25  ;;  %v1651_v45 = vpop.f32.mrf.mxu0 }
 0x218   :  { %v2036_v57 = vpop.f32.mrf.mxu1  ;;  %2271 = vst.msk [vmem:[%s5620_s2 + $0x48] sm:$0xff] %vm2262_vm0, %v1821_v50  ;;  %v1822_v30 = vadd.f32 %v1651_v45, %v4248_v42 }
 0x219   :  { %2335 = vst.msk [vmem:[%s5621_s3 + $0x48] sm:$0xff] %vm2262_vm0, %v2206_v20  ;;  %v2207_v54 = vadd.f32 %v2036_v57, %v4820_v41  ;;  %v1653_v38 = vpop.f32.mrf.mxu0  ;;  %v5908_v20 = vld [vmem:[#allocation42_spill] sm:$0xff] }
 0x21a   :  { %v2038_v36 = vpop.f32.mrf.mxu1  ;;  %2272 = vst [vmem:[%s5620_s2 + $0x50] sm:$0xff] %v1822_v30  ;;  %v1823_v25 = vadd.f32 %v1653_v38, %v4259_v49 }
 0x21b   :  { %2336 = vst [vmem:[%s5621_s3 + $0x50] sm:$0xff] %v2207_v54  ;;  %v2208_v8 = vadd.f32 %v2038_v36, %v4834_v55  ;;  %v1657_v52 = vpop.f32.mrf.mxu0  ;;  %v5910_v54 = vld [vmem:[#allocation43_spill] sm:$0xff] }
 0x21c   :  { %v2042_v33 = vpop.f32.mrf.mxu1  ;;  %2273 = vst.msk [vmem:[%s5620_s2 + $0x58] sm:$0xff] %vm2262_vm0, %v1823_v25  ;;  %v1824_v42 = vadd.f32 %v1657_v52, %v4270_v60  ;;  %v5911_v25 = vld [vmem:[#allocation3_spill] sm:$0xff]  ;;  %v5912_v52 = vld [vmem:[#allocation44_spill] sm:$0xff] }
 0x21d   :  { %2337 = vst.msk [vmem:[%s5621_s3 + $0x58] sm:$0xff] %vm2262_vm0, %v2208_v8  ;;  %v2209_v41 = vadd.f32 %v2042_v33, %v4836_v12  ;;  %v1659_v61 = vpop.f32.mrf.mxu0 }
 0x21e   :  { %v2044_v49 = vpop.f32.mrf.mxu1  ;;  %2274 = vst [vmem:[%s5620_s2 + $0x60] sm:$0xff] %v1824_v42  ;;  %v1825_v55 = vadd.f32 %v1659_v61, %v4281_v2  ;;  %v5913_v61 = vld [vmem:[#allocation4_spill] sm:$0xff] }
 0x21f   :  { %2338 = vst [vmem:[%s5621_s3 + $0x60] sm:$0xff] %v2209_v41  ;;  %v2210_v4 = vadd.f32 %v2044_v49, %v4850_v59  ;;  %v1663_v63 = vpop.f32.mrf.mxu0 }
 0x220   :  { %v2048_v3 = vpop.f32.mrf.mxu1  ;;  %2275 = vst.msk [vmem:[%s5620_s2 + $0x68] sm:$0xff] %vm2262_vm0, %v1825_v55  ;;  %v1826_v60 = vadd.f32 %v1663_v63, %v4292_v9  ;;  %v5914_v55 = vld [vmem:[#allocation45_spill] sm:$0xff] }
 0x221   :  { %2339 = vst.msk [vmem:[%s5621_s3 + $0x68] sm:$0xff] %vm2262_vm0, %v2210_v4  ;;  %v2211_v12 = vadd.f32 %v2048_v3, %v4852_v40  ;;  %v1665_v26 = vpop.f32.mrf.mxu0 }
 0x222   :  { %v2050_v2 = vpop.f32.mrf.mxu1  ;;  %2276 = vst [vmem:[%s5620_s2 + $0x70] sm:$0xff] %v1826_v60  ;;  %v1827_v59 = vadd.f32 %v1665_v26, %v4303_v14  ;;  %v5915_v60 = vld [vmem:[#allocation5_spill] sm:$0xff]  ;;  %v5916_v26 = vld [vmem:[#allocation46_spill] sm:$0xff] }
 0x223   :  { %2340 = vst [vmem:[%s5621_s3 + $0x70] sm:$0xff] %v2211_v12  ;;  %v2212_v27 = vadd.f32 %v2050_v2, %v4866_v37  ;;  %v1669_v16 = vpop.f32.mrf.mxu0 }
 0x224   :  { %v2054_v39 = vpop.f32.mrf.mxu1  ;;  %2277 = vst.msk [vmem:[%s5620_s2 + $0x78] sm:$0xff] %vm2262_vm0, %v1827_v59  ;;  %v1828_v9 = vadd.f32 %v1669_v16, %v4314_v21  ;;  %v5917_v16 = vld [vmem:[#allocation6_spill] sm:$0xff] }
 0x225   :  { %2341 = vst.msk [vmem:[%s5621_s3 + $0x78] sm:$0xff] %vm2262_vm0, %v2212_v27  ;;  %v2213_v40 = vadd.f32 %v2054_v39, %v4868_v15  ;;  %v1671_v58 = vpop.f32.mrf.mxu0 }
 0x226   :  { %v2056_v14 = vpop.f32.mrf.mxu1  ;;  %2278 = vst [vmem:[%s5620_s2 + $0x80] sm:$0xff] %v1828_v9  ;;  %v1829_v37 = vadd.f32 %v1671_v58, %v4325_v28  ;;  %v5918_v9 = vld [vmem:[#allocation47_spill] sm:$0xff] }
 0x227   :  { %2342 = vst [vmem:[%s5621_s3 + $0x80] sm:$0xff] %v2213_v40  ;;  %v2214_v0 = vadd.f32 %v2056_v14, %v4882_v17  ;;  %v1675_v1 = vpop.f32.mrf.mxu0 }
 0x228   :  { %v2060_v62 = vpop.f32.mrf.mxu1  ;;  %2279 = vst.msk [vmem:[%s5620_s2 + $0x88] sm:$0xff] %vm2262_vm0, %v1829_v37  ;;  %v1830_v21 = vadd.f32 %v1675_v1, %v4336_v35  ;;  %v5919_v37 = vld [vmem:[#allocation7_spill] sm:$0xff]  ;;  %v5920_v1 = vld [vmem:[#allocation48_spill] sm:$0xff] }
 0x229   :  { %2343 = vst.msk [vmem:[%s5621_s3 + $0x88] sm:$0xff] %vm2262_vm0, %v2214_v0  ;;  %v2215_v15 = vadd.f32 %v2060_v62, %v4884_v53  ;;  %v1677_v19 = vpop.f32.mrf.mxu0 }
 0x22a   :  { %v2062_v28 = vpop.f32.mrf.mxu1  ;;  %2280 = vst [vmem:[%s5620_s2 + $0x90] sm:$0xff] %v1830_v21  ;;  %v1831_v17 = vadd.f32 %v1677_v19, %v4347_v43  ;;  %v5921_v19 = vld [vmem:[#allocation8_spill] sm:$0xff] }
 0x22b   :  { %2344 = vst [vmem:[%s5621_s3 + $0x90] sm:$0xff] %v2215_v15  ;;  %v2216_v31 = vadd.f32 %v2062_v28, %v4898_v6  ;;  %v1681_v10 = vpop.f32.mrf.mxu0 }
 0x22c   :  { %v2066_v48 = vpop.f32.mrf.mxu1  ;;  %2281 = vst.msk [vmem:[%s5620_s2 + $0x98] sm:$0xff] %vm2262_vm0, %v1831_v17  ;;  %v1832_v35 = vadd.f32 %v1681_v10, %v4358_v51  ;;  %v5922_v17 = vld [vmem:[#allocation49_spill] sm:$0xff] }
 0x22d   :  { %2345 = vst.msk [vmem:[%s5621_s3 + $0x98] sm:$0xff] %vm2262_vm0, %v2216_v31  ;;  %v2217_v53 = vadd.f32 %v2066_v48, %v4900_v29  ;;  %v1683_v18 = vpop.f32.mrf.mxu0 }
 0x22e   :  { %v2068_v43 = vpop.f32.mrf.mxu1  ;;  %2282 = vst [vmem:[%s5620_s2 + $0xa0] sm:$0xff] %v1832_v35  ;;  %v1833_v6 = vadd.f32 %v1683_v18, %v4369_v56  ;;  %v5923_v35 = vld [vmem:[#allocation9_spill] sm:$0xff]  ;;  %v5924_v18 = vld [vmem:[#allocation50_spill] sm:$0xff] }
 0x22f   :  { %2346 = vst [vmem:[%s5621_s3 + $0xa0] sm:$0xff] %v2217_v53  ;;  %v2218_v47 = vadd.f32 %v2068_v43, %v4914_v32  ;;  %v1687_v46 = vpop.f32.mrf.mxu0 }
 0x230   :  { %v2072_v24 = vpop.f32.mrf.mxu1  ;;  %2283 = vst.msk [vmem:[%s5620_s2 + $0xa8] sm:$0xff] %vm2262_vm0, %v1833_v6  ;;  %v1834_v51 = vadd.f32 %v1687_v46, %v4380_v7  ;;  %v5909_v7 = vld [vmem:[#allocation2_spill] sm:$0xff] }
 0x231   :  { %2347 = vst.msk [vmem:[%s5621_s3 + $0xa8] sm:$0xff] %vm2262_vm0, %v2218_v47  ;;  %v2219_v29 = vadd.f32 %v2072_v24, %v4916_v11  ;;  %v1689_v50 = vpop.f32.mrf.mxu0  ;;  %v5925_v46 = vld [vmem:[#allocation10_spill] sm:$0xff] }
 0x232   :  { %v2074_v56 = vpop.f32.mrf.mxu1  ;;  %2284 = vst [vmem:[%s5620_s2 + $0xb0] sm:$0xff] %v1834_v51  ;;  %v1835_v32 = vadd.f32 %v1689_v50, %v4391_v13  ;;  %v5926_v51 = vld [vmem:[#allocation51_spill] sm:$0xff] }
 0x233   :  { %2348 = vst [vmem:[%s5621_s3 + $0xb0] sm:$0xff] %v2219_v29  ;;  %v2220_v45 = vadd.f32 %v2074_v56, %v5908_v20  ;;  %v1693_v57 = vpop.f32.mrf.mxu0 }
 0x234   :  { %v2078_v30 = vpop.f32.mrf.mxu1  ;;  %2285 = vst.msk [vmem:[%s5620_s2 + $0xb8] sm:$0xff] %vm2262_vm0, %v1835_v32  ;;  %v1836_v11 = vadd.f32 %v1693_v57, %v5909_v7  ;;  %v5927_v32 = vld [vmem:[#allocation11_spill] sm:$0xff] }
 0x235   :  { %2349 = vst.msk [vmem:[%s5621_s3 + $0xb8] sm:$0xff] %vm2262_vm0, %v2220_v45  ;;  %v2221_v38 = vadd.f32 %v2078_v30, %v5910_v54  ;;  %v1695_v36 = vpop.f32.mrf.mxu0  ;;  %v5928_v45 = vld [vmem:[#allocation52_spill] sm:$0xff] }
 0x236   :  { %v2080_v13 = vpop.f32.mrf.mxu1  ;;  %2286 = vst [vmem:[%s5620_s2 + $0xc0] sm:$0xff] %v1836_v11  ;;  %v1837_v8 = vadd.f32 %v1695_v36, %v5911_v25  ;;  %v5929_v11 = vld [vmem:[#allocation12_spill] sm:$0xff] }
 0x237   :  { %2350 = vst [vmem:[%s5621_s3 + $0xc0] sm:$0xff] %v2221_v38  ;;  %v2222_v33 = vadd.f32 %v2080_v13, %v5912_v52  ;;  %v1699_v42 = vpop.f32.mrf.mxu0  ;;  %v5930_v38 = vld [vmem:[#allocation53_spill] sm:$0xff] }
 0x238   :  { %v2084_v41 = vpop.f32.mrf.mxu1  ;;  %2287 = vst.msk [vmem:[%s5620_s2 + $0xc8] sm:$0xff] %vm2262_vm0, %v1837_v8  ;;  %v1838_v49 = vadd.f32 %v1699_v42, %v5913_v61  ;;  %v5931_v8 = vld [vmem:[#allocation13_spill] sm:$0xff] }
 0x239   :  { %2351 = vst.msk [vmem:[%s5621_s3 + $0xc8] sm:$0xff] %vm2262_vm0, %v2222_v33  ;;  %v2223_v4 = vadd.f32 %v2084_v41, %v5914_v55  ;;  %v1701_v63 = vpop.f32.mrf.mxu0  ;;  %v5932_v33 = vld [vmem:[#allocation54_spill] sm:$0xff] }
 0x23a   :  { %v2086_v3 = vpop.f32.mrf.mxu1  ;;  %2288 = vst [vmem:[%s5620_s2 + $0xd0] sm:$0xff] %v1838_v49  ;;  %v1839_v12 = vadd.f32 %v1701_v63, %v5915_v60  ;;  %v5933_v49 = vld [vmem:[#allocation14_spill] sm:$0xff] }
 0x23b   :  { %2352 = vst [vmem:[%s5621_s3 + $0xd0] sm:$0xff] %v2223_v4  ;;  %v2224_v2 = vadd.f32 %v2086_v3, %v5916_v26  ;;  %v1705_v59 = vpop.f32.mrf.mxu0  ;;  %v5934_v4 = vld [vmem:[#allocation55_spill] sm:$0xff] }
 0x23c   :  { %v2090_v27 = vpop.f32.mrf.mxu1  ;;  %2289 = vst.msk [vmem:[%s5620_s2 + $0xd8] sm:$0xff] %vm2262_vm0, %v1839_v12  ;;  %v1840_v39 = vadd.f32 %v1705_v59, %v5917_v16  ;;  %v5935_v12 = vld [vmem:[#allocation15_spill] sm:$0xff] }
 0x23d   :  { %2353 = vst.msk [vmem:[%s5621_s3 + $0xd8] sm:$0xff] %vm2262_vm0, %v2224_v2  ;;  %v2225_v40 = vadd.f32 %v2090_v27, %v5918_v9  ;;  %v1707_v58 = vpop.f32.mrf.mxu0  ;;  %v5936_v2 = vld [vmem:[#allocation56_spill] sm:$0xff] }
 0x23e   :  { %v2092_v14 = vpop.f32.mrf.mxu1  ;;  %2290 = vst [vmem:[%s5620_s2 + $0xe0] sm:$0xff] %v1840_v39  ;;  %v1841_v0 = vadd.f32 %v1707_v58, %v5919_v37  ;;  %v5937_v39 = vld [vmem:[#allocation16_spill] sm:$0xff] }
 0x23f   :  { %2354 = vst [vmem:[%s5621_s3 + $0xe0] sm:$0xff] %v2225_v40  ;;  %v2226_v62 = vadd.f32 %v2092_v14, %v5920_v1  ;;  %v1711_v21 = vpop.f32.mrf.mxu0  ;;  %v5938_v40 = vld [vmem:[#allocation57_spill] sm:$0xff] }
 0x240   :  { %v2096_v15 = vpop.f32.mrf.mxu1  ;;  %2291 = vst.msk [vmem:[%s5620_s2 + $0xe8] sm:$0xff] %vm2262_vm0, %v1841_v0  ;;  %v1842_v28 = vadd.f32 %v1711_v21, %v5921_v19  ;;  %v5939_v0 = vld [vmem:[#allocation17_spill] sm:$0xff] }
 0x241   :  { %2355 = vst.msk [vmem:[%s5621_s3 + $0xe8] sm:$0xff] %vm2262_vm0, %v2226_v62  ;;  %v2227_v31 = vadd.f32 %v2096_v15, %v5922_v17  ;;  %v1713_v10 = vpop.f32.mrf.mxu0  ;;  %v5940_v62 = vld [vmem:[#allocation58_spill] sm:$0xff] }
 0x242   :  { %v2098_v48 = vpop.f32.mrf.mxu1  ;;  %2292 = vst [vmem:[%s5620_s2 + $0xf0] sm:$0xff] %v1842_v28  ;;  %v1843_v53 = vadd.f32 %v1713_v10, %v5923_v35  ;;  %v5941_v28 = vld [vmem:[#allocation18_spill] sm:$0xff] }
 0x243   :  { %2356 = vst [vmem:[%s5621_s3 + $0xf0] sm:$0xff] %v2227_v31  ;;  %v2228_v43 = vadd.f32 %v2098_v48, %v5924_v18  ;;  %v1717_v6 = vpop.f32.mrf.mxu0  ;;  %v5942_v31 = vld [vmem:[#allocation59_spill] sm:$0xff] }
 0x244   :  { %v2102_v47 = vpop.f32.mrf.mxu1  ;;  %2293 = vst.msk [vmem:[%s5620_s2 + $0xf8] sm:$0xff] %vm2262_vm0, %v1843_v53  ;;  %v1844_v24 = vadd.f32 %v1717_v6, %v5925_v46  ;;  %v5943_v53 = vld [vmem:[#allocation19_spill] sm:$0xff] }
 0x245   :  { %2357 = vst.msk [vmem:[%s5621_s3 + $0xf8] sm:$0xff] %vm2262_vm0, %v2228_v43  ;;  %v2229_v29 = vadd.f32 %v2102_v47, %v5926_v51  ;;  %v1719_v50 = vpop.f32.mrf.mxu0  ;;  %v5944_v43 = vld [vmem:[#allocation60_spill] sm:$0xff] }
 0x246   :  { %v2104_v56 = vpop.f32.mrf.mxu1  ;;  %2294 = vst [vmem:[%s5620_s2 + $0x100] sm:$0xff] %v1844_v24  ;;  %v1845_v20 = vadd.f32 %v1719_v50, %v5927_v32  ;;  %v5945_v24 = vld [vmem:[#allocation20_spill] sm:$0xff] }
 0x247   :  { %2358 = vst [vmem:[%s5621_s3 + $0x100] sm:$0xff] %v2229_v29  ;;  %v2230_v57 = vadd.f32 %v2104_v56, %v5928_v45  ;;  %v1723_v30 = vpop.f32.mrf.mxu0  ;;  %v5946_v29 = vld [vmem:[#allocation61_spill] sm:$0xff] }
 0x248   :  { %v2108_v7 = vpop.f32.mrf.mxu1  ;;  %2295 = vst.msk [vmem:[%s5620_s2 + $0x108] sm:$0xff] %vm2262_vm0, %v1845_v20  ;;  %v1846_v54 = vadd.f32 %v1723_v30, %v5929_v11  ;;  %v5947_v20 = vld [vmem:[#allocation21_spill] sm:$0xff] }
 0x249   :  { %2359 = vst.msk [vmem:[%s5621_s3 + $0x108] sm:$0xff] %vm2262_vm0, %v2230_v57  ;;  %v2231_v36 = vadd.f32 %v2108_v7, %v5930_v38  ;;  %v1725_v13 = vpop.f32.mrf.mxu0  ;;  %v5948_v57 = vld [vmem:[#allocation62_spill] sm:$0xff] }
 0x24a   :  { %v2110_v25 = vpop.f32.mrf.mxu1  ;;  %2296 = vst [vmem:[%s5620_s2 + $0x110] sm:$0xff] %v1846_v54  ;;  %v1847_v52 = vadd.f32 %v1725_v13, %v5931_v8  ;;  %v5949_v54 = vld [vmem:[#allocation22_spill] sm:$0xff] }
 0x24b   :  { %2360 = vst [vmem:[%s5621_s3 + $0x110] sm:$0xff] %v2231_v36  ;;  %v2232_v42 = vadd.f32 %v2110_v25, %v5932_v33  ;;  %v1729_v41 = vpop.f32.mrf.mxu0  ;;  %v5950_v36 = vld [vmem:[#allocation63_spill] sm:$0xff] }
 0x24c   :  { %v2114_v61 = vpop.f32.mrf.mxu1  ;;  %2297 = vst.msk [vmem:[%s5620_s2 + $0x118] sm:$0xff] %vm2262_vm0, %v1847_v52  ;;  %v1848_v55 = vadd.f32 %v1729_v41, %v5933_v49  ;;  %v5951_v52 = vld [vmem:[#allocation23_spill] sm:$0xff] }
 0x24d   :  { %2361 = vst.msk [vmem:[%s5621_s3 + $0x118] sm:$0xff] %vm2262_vm0, %v2232_v42  ;;  %v2233_v63 = vadd.f32 %v2114_v61, %v5934_v4  ;;  %v1731_v3 = vpop.f32.mrf.mxu0  ;;  %v5952_v42 = vld [vmem:[#allocation64_spill] sm:$0xff] }
 0x24e   :  { %v2116_v60 = vpop.f32.mrf.mxu1  ;;  %2298 = vst [vmem:[%s5620_s2 + $0x120] sm:$0xff] %v1848_v55  ;;  %v1849_v26 = vadd.f32 %v1731_v3, %v5935_v12  ;;  %v5953_v55 = vld [vmem:[#allocation24_spill] sm:$0xff] }
 0x24f   :  { %2362 = vst [vmem:[%s5621_s3 + $0x120] sm:$0xff] %v2233_v63  ;;  %v2234_v59 = vadd.f32 %v2116_v60, %v5936_v2  ;;  %v1735_v27 = vpop.f32.mrf.mxu0  ;;  %v5954_v63 = vld [vmem:[#allocation65_spill] sm:$0xff] }
 0x250   :  { %v2120_v16 = vpop.f32.mrf.mxu1  ;;  %2299 = vst.msk [vmem:[%s5620_s2 + $0x128] sm:$0xff] %vm2262_vm0, %v1849_v26  ;;  %v1850_v9 = vadd.f32 %v1735_v27, %v5937_v39  ;;  %v5955_v26 = vld [vmem:[#allocation25_spill] sm:$0xff] }
 0x251   :  { %2363 = vst.msk [vmem:[%s5621_s3 + $0x128] sm:$0xff] %vm2262_vm0, %v2234_v59  ;;  %v2235_v58 = vadd.f32 %v2120_v16, %v5938_v40  ;;  %v1737_v14 = vpop.f32.mrf.mxu0  ;;  %v5956_v59 = vld [vmem:[#allocation66_spill] sm:$0xff] }
 0x252   :  { %v2122_v37 = vpop.f32.mrf.mxu1  ;;  %2300 = vst [vmem:[%s5620_s2 + $0x130] sm:$0xff] %v1850_v9  ;;  %v1851_v1 = vadd.f32 %v1737_v14, %v5939_v0  ;;  %v5957_v9 = vld [vmem:[#allocation26_spill] sm:$0xff] }
 0x253   :  { %2364 = vst [vmem:[%s5621_s3 + $0x130] sm:$0xff] %v2235_v58  ;;  %v2236_v21 = vadd.f32 %v2122_v37, %v5940_v62  ;;  %v1741_v15 = vpop.f32.mrf.mxu0  ;;  %v5958_v58 = vld [vmem:[#allocation67_spill] sm:$0xff] }
 0x254   :  { %v2126_v19 = vpop.f32.mrf.mxu1  ;;  %2301 = vst.msk [vmem:[%s5620_s2 + $0x138] sm:$0xff] %vm2262_vm0, %v1851_v1  ;;  %v1852_v17 = vadd.f32 %v1741_v15, %v5941_v28  ;;  %v5959_v1 = vld [vmem:[#allocation27_spill] sm:$0xff] }
 0x255   :  { %2365 = vst.msk [vmem:[%s5621_s3 + $0x138] sm:$0xff] %vm2262_vm0, %v2236_v21  ;;  %v2237_v10 = vadd.f32 %v2126_v19, %v5942_v31  ;;  %v1743_v48 = vpop.f32.mrf.mxu0  ;;  %v5960_v21 = vld [vmem:[#allocation68_spill] sm:$0xff] }
 0x256   :  { %v2128_v35 = vpop.f32.mrf.mxu1  ;;  %2302 = vst [vmem:[%s5620_s2 + $0x140] sm:$0xff] %v1852_v17  ;;  %v1853_v18 = vadd.f32 %v1743_v48, %v5943_v53  ;;  %v5961_v17 = vld [vmem:[#allocation28_spill] sm:$0xff] }
 0x257   :  { %2366 = vst [vmem:[%s5621_s3 + $0x140] sm:$0xff] %v2237_v10  ;;  %v2238_v6 = vadd.f32 %v2128_v35, %v5944_v43  ;;  %v1747_v47 = vpop.f32.mrf.mxu0  ;;  %v5962_v10 = vld [vmem:[#allocation69_spill] sm:$0xff] }
 0x258   :  { %v2132_v46 = vpop.f32.mrf.mxu1  ;;  %2303 = vst.msk [vmem:[%s5620_s2 + $0x148] sm:$0xff] %vm2262_vm0, %v1853_v18  ;;  %v1854_v51 = vadd.f32 %v1747_v47, %v5945_v24  ;;  %v5963_v18 = vld [vmem:[#allocation29_spill] sm:$0xff] }
 0x259   :  { %2367 = vst.msk [vmem:[%s5621_s3 + $0x148] sm:$0xff] %vm2262_vm0, %v2238_v6  ;;  %v2239_v50 = vadd.f32 %v2132_v46, %v5946_v29  ;;  %v1749_v56 = vpop.f32.mrf.mxu0  ;;  %v5964_v6 = vld [vmem:[#allocation70_spill] sm:$0xff] }
 0x25a   :  { %v2134_v32 = vpop.f32.mrf.mxu1  ;;  %2304 = vst [vmem:[%s5620_s2 + $0x150] sm:$0xff] %v1854_v51  ;;  %v1855_v45 = vadd.f32 %v1749_v56, %v5947_v20  ;;  %v5965_v51 = vld [vmem:[#allocation30_spill] sm:$0xff] }
 0x25b   :  { %2368 = vst [vmem:[%s5621_s3 + $0x150] sm:$0xff] %v2239_v50  ;;  %v2240_v30 = vadd.f32 %v2134_v32, %v5948_v57  ;;  %v1753_v7 = vpop.f32.mrf.mxu0  ;;  %v5966_v50 = vld [vmem:[#allocation71_spill] sm:$0xff] }
 0x25c   :  { %v2138_v11 = vpop.f32.mrf.mxu1  ;;  %2305 = vst.msk [vmem:[%s5620_s2 + $0x158] sm:$0xff] %vm2262_vm0, %v1855_v45  ;;  %v1856_v38 = vadd.f32 %v1753_v7, %v5949_v54  ;;  %v5967_v45 = vld [vmem:[#allocation31_spill] sm:$0xff] }
 0x25d   :  { %2369 = vst.msk [vmem:[%s5621_s3 + $0x158] sm:$0xff] %vm2262_vm0, %v2240_v30  ;;  %v2241_v13 = vadd.f32 %v2138_v11, %v5950_v36  ;;  %v1755_v25 = vpop.f32.mrf.mxu0  ;;  %v5968_v30 = vld [vmem:[#allocation72_spill] sm:$0xff] }
 0x25e   :  { %v2140_v8 = vpop.f32.mrf.mxu1  ;;  %2306 = vst [vmem:[%s5620_s2 + $0x160] sm:$0xff] %v1856_v38  ;;  %v1857_v33 = vadd.f32 %v1755_v25, %v5951_v52  ;;  %v5969_v38 = vld [vmem:[#allocation32_spill] sm:$0xff] }
 0x25f   :  { %2370 = vst [vmem:[%s5621_s3 + $0x160] sm:$0xff] %v2241_v13  ;;  %v2242_v41 = vadd.f32 %v2140_v8, %v5952_v42  ;;  %v1759_v61 = vpop.f32.mrf.mxu0  ;;  %v5970_v13 = vld [vmem:[#allocation73_spill] sm:$0xff] }
 0x260   :  { %v2144_v49 = vpop.f32.mrf.mxu1  ;;  %2307 = vst.msk [vmem:[%s5620_s2 + $0x168] sm:$0xff] %vm2262_vm0, %v1857_v33  ;;  %v1858_v4 = vadd.f32 %v1759_v61, %v5953_v55  ;;  %v5971_v33 = vld [vmem:[#allocation33_spill] sm:$0xff] }
 0x261   :  { %2371 = vst.msk [vmem:[%s5621_s3 + $0x168] sm:$0xff] %vm2262_vm0, %v2242_v41  ;;  %v2243_v3 = vadd.f32 %v2144_v49, %v5954_v63  ;;  %v1761_v60 = vpop.f32.mrf.mxu0  ;;  %v5972_v41 = vld [vmem:[#allocation74_spill] sm:$0xff] }
 0x262   :  { %v2146_v12 = vpop.f32.mrf.mxu1  ;;  %2308 = vst [vmem:[%s5620_s2 + $0x170] sm:$0xff] %v1858_v4  ;;  %v1859_v2 = vadd.f32 %v1761_v60, %v5955_v26  ;;  %v5973_v4 = vld [vmem:[#allocation34_spill] sm:$0xff] }
 0x263   :  { %2372 = vst [vmem:[%s5621_s3 + $0x170] sm:$0xff] %v2243_v3  ;;  %v2244_v27 = vadd.f32 %v2146_v12, %v5956_v59  ;;  %v1765_v16 = vpop.f32.mrf.mxu0  ;;  %v5974_v3 = vld [vmem:[#allocation75_spill] sm:$0xff] }
 0x264   :  { %v2150_v39 = vpop.f32.mrf.mxu1  ;;  %2309 = vst.msk [vmem:[%s5620_s2 + $0x178] sm:$0xff] %vm2262_vm0, %v1859_v2  ;;  %v1860_v40 = vadd.f32 %v1765_v16, %v5957_v9  ;;  %v5975_v2 = vld [vmem:[#allocation35_spill] sm:$0xff] }
 0x265   :  { %2373 = vst.msk [vmem:[%s5621_s3 + $0x178] sm:$0xff] %vm2262_vm0, %v2244_v27  ;;  %v2245_v14 = vadd.f32 %v2150_v39, %v5958_v58  ;;  %v1767_v37 = vpop.f32.mrf.mxu0  ;;  %v5976_v27 = vld [vmem:[#allocation76_spill] sm:$0xff] }
 0x266   :  { %v2152_v0 = vpop.f32.mrf.mxu1  ;;  %2310 = vst [vmem:[%s5620_s2 + $0x180] sm:$0xff] %v1860_v40  ;;  %v1861_v62 = vadd.f32 %v1767_v37, %v5959_v1  ;;  %v5977_v40 = vld [vmem:[#allocation36_spill] sm:$0xff] }
 0x267   :  { %2374 = vst [vmem:[%s5621_s3 + $0x180] sm:$0xff] %v2245_v14  ;;  %v2246_v15 = vadd.f32 %v2152_v0, %v5960_v21  ;;  %v1771_v19 = vpop.f32.mrf.mxu0  ;;  %v5978_v14 = vld [vmem:[#allocation77_spill] sm:$0xff] }
 0x268   :  { %v2156_v28 = vpop.f32.mrf.mxu1  ;;  %2311 = vst.msk [vmem:[%s5620_s2 + $0x188] sm:$0xff] %vm2262_vm0, %v1861_v62  ;;  %v1862_v31 = vadd.f32 %v1771_v19, %v5961_v17  ;;  %v5979_v62 = vld [vmem:[#allocation37_spill] sm:$0xff]  ;;  %v5980_v17 = vld [vmem:[#allocation38_spill] sm:$0xff] }
 0x269   :  { %2375 = vst.msk [vmem:[%s5621_s3 + $0x188] sm:$0xff] %vm2262_vm0, %v2246_v15  ;;  %v2247_v48 = vadd.f32 %v2156_v28, %v5962_v10  ;;  %v1773_v35 = vpop.f32.mrf.mxu0 }
 0x26a   :  { %v2158_v53 = vpop.f32.mrf.mxu1  ;;  %2312 = vst [vmem:[%s5620_s2 + $0x190] sm:$0xff] %v1862_v31  ;;  %v1863_v43 = vadd.f32 %v1773_v35, %v5963_v18 }
 0x26b   :  { %2376 = vst [vmem:[%s5621_s3 + $0x190] sm:$0xff] %v2247_v48  ;;  %v2248_v47 = vadd.f32 %v2158_v53, %v5964_v6  ;;  %v1777_v46 = vpop.f32.mrf.mxu0 }
 0x26c   :  { %v2162_v24 = vpop.f32.mrf.mxu1  ;;  %2313 = vst.msk [vmem:[%s5620_s2 + $0x198] sm:$0xff] %vm2262_vm0, %v1863_v43  ;;  %v1864_v29 = vadd.f32 %v1777_v46, %v5965_v51 }
 0x26d   :  { %2377 = vst.msk [vmem:[%s5621_s3 + $0x198] sm:$0xff] %vm2262_vm0, %v2248_v47  ;;  %v2249_v56 = vadd.f32 %v2162_v24, %v5966_v50  ;;  %v1779_v32 = vpop.f32.mrf.mxu0 }
 0x26e   :  { %v2164_v20 = vpop.f32.mrf.mxu1  ;;  %2314 = vst [vmem:[%s5620_s2 + $0x1a0] sm:$0xff] %v1864_v29  ;;  %v1865_v57 = vadd.f32 %v1779_v32, %v5967_v45 }
 0x26f   :  { %2378 = vst [vmem:[%s5621_s3 + $0x1a0] sm:$0xff] %v2249_v56  ;;  %v2250_v7 = vadd.f32 %v2164_v20, %v5968_v30  ;;  %v1783_v11 = vpop.f32.mrf.mxu0 }
 0x270   :  { %v2168_v54 = vpop.f32.mrf.mxu1  ;;  %2315 = vst.msk [vmem:[%s5620_s2 + $0x1a8] sm:$0xff] %vm2262_vm0, %v1865_v57  ;;  %v1866_v36 = vadd.f32 %v1783_v11, %v5969_v38 }
 0x271   :  { %2379 = vst.msk [vmem:[%s5621_s3 + $0x1a8] sm:$0xff] %vm2262_vm0, %v2250_v7  ;;  %v2251_v25 = vadd.f32 %v2168_v54, %v5970_v13  ;;  %v1785_v8 = vpop.f32.mrf.mxu0 }
 0x272   :  { %v2170_v52 = vpop.f32.mrf.mxu1  ;;  %2316 = vst [vmem:[%s5620_s2 + $0x1b0] sm:$0xff] %v1866_v36  ;;  %v1867_v42 = vadd.f32 %v1785_v8, %v5971_v33 }
 0x273   :  { %2380 = vst [vmem:[%s5621_s3 + $0x1b0] sm:$0xff] %v2251_v25  ;;  %v2252_v61 = vadd.f32 %v2170_v52, %v5972_v41  ;;  %v1789_v49 = vpop.f32.mrf.mxu0 }
 0x274   :  { %v2174_v55 = vpop.f32.mrf.mxu1  ;;  %2317 = vst.msk [vmem:[%s5620_s2 + $0x1b8] sm:$0xff] %vm2262_vm0, %v1867_v42  ;;  %v1868_v63 = vadd.f32 %v1789_v49, %v5973_v4 }
 0x275   :  { %2381 = vst.msk [vmem:[%s5621_s3 + $0x1b8] sm:$0xff] %vm2262_vm0, %v2252_v61  ;;  %v2253_v60 = vadd.f32 %v2174_v55, %v5974_v3  ;;  %v1791_v12 = vpop.f32.mrf.mxu0 }
 0x276   :  { %v2176_v26 = vpop.f32.mrf.mxu1  ;;  %2318 = vst [vmem:[%s5620_s2 + $0x1c0] sm:$0xff] %v1868_v63  ;;  %v1869_v59 = vadd.f32 %v1791_v12, %v5975_v2 }
 0x277   :  { %2382 = vst [vmem:[%s5621_s3 + $0x1c0] sm:$0xff] %v2253_v60  ;;  %v2254_v16 = vadd.f32 %v2176_v26, %v5976_v27  ;;  %v1795_v39 = vpop.f32.mrf.mxu0 }
 0x278   :  { %v2180_v9 = vpop.f32.mrf.mxu1  ;;  %2319 = vst.msk [vmem:[%s5620_s2 + $0x1c8] sm:$0xff] %vm2262_vm0, %v1869_v59  ;;  %v1870_v58 = vadd.f32 %v1795_v39, %v5977_v40 }
 0x279   :  { %2383 = vst.msk [vmem:[%s5621_s3 + $0x1c8] sm:$0xff] %vm2262_vm0, %v2254_v16  ;;  %v2255_v37 = vadd.f32 %v2180_v9, %v5978_v14  ;;  %v1797_v0 = vpop.f32.mrf.mxu0 }
 0x27a   :  { %v2182_v1 = vpop.f32.mrf.mxu1  ;;  %2320 = vst [vmem:[%s5620_s2 + $0x1d0] sm:$0xff] %v1870_v58  ;;  %v1871_v21 = vadd.f32 %v1797_v0, %v5979_v62 }
 0x27b   :  { %2384 = vst [vmem:[%s5621_s3 + $0x1d0] sm:$0xff] %v2255_v37  ;;  %v2256_v15 = vadd.f32 %v2182_v1, %v5032_v5  ;;  %v1801_v19 = vpop.f32.mrf.mxu0  ;;  %v5981_v5 = vld [vmem:[#allocation39_spill] sm:$0xff] }
 0x27c   :  { %v2186_v28 = vpop.f32.mrf.mxu1  ;;  %2321 = vst.msk [vmem:[%s5620_s2 + $0x1d8] sm:$0xff] %vm2262_vm0, %v1871_v21  ;;  %v1872_v31 = vadd.f32 %v1801_v19, %v5980_v17 }
 0x27d   :  { %2385 = vst.msk [vmem:[%s5621_s3 + $0x1d8] sm:$0xff] %vm2262_vm0, %v2256_v15  ;;  %v2257_v10 = vadd.f32 %v2186_v28, %v5034_v22  ;;  %v1803_v48 = vpop.f32.mrf.mxu0  ;;  %v5982_v22 = vld [vmem:[#allocation40_spill] sm:$0xff] }
 0x27e   :  { %v2188_v35 = vpop.f32.mrf.mxu1  ;;  %2322 = vst [vmem:[%s5620_s2 + $0x1e0] sm:$0xff] %v1872_v31  ;;  %v1873_v53 = vadd.f32 %v1803_v48, %v5981_v5 }
 0x27f   :  { %2386 = vst [vmem:[%s5621_s3 + $0x1e0] sm:$0xff] %v2257_v10  ;;  %v2258_v18 = vadd.f32 %v2188_v35, %v5036_v34  ;;  %v1807_v43 = vpop.f32.mrf.mxu0  ;;  %v5983_v34 = vld [vmem:[#allocation41_spill] sm:$0xff] }
 0x280   :  { %v2192_v6 = vpop.f32.mrf.mxu1  ;;  %2323 = vst.msk [vmem:[%s5620_s2 + $0x1e8] sm:$0xff] %vm2262_vm0, %v1873_v53  ;;  %v1874_v47 = vadd.f32 %v1807_v43, %v5982_v22 }
 0x281   :  { %2387 = vst.msk [vmem:[%s5621_s3 + $0x1e8] sm:$0xff] %vm2262_vm0, %v2258_v18  ;;  %v2259_v46 = vadd.f32 %v2192_v6, %v5038_v23  ;;  %v1809_v24 = vpop.f32.mrf.mxu0 }
 0x282   :  { %v2194_v51 = vpop.f32.mrf.mxu1  ;;  %2324 = vst [vmem:[%s5620_s2 + $0x1f0] sm:$0xff] %v1874_v47  ;;  %v1875_v29 = vadd.f32 %v1809_v24, %v5983_v34 }
 0x283   :  { %2388 = vst [vmem:[%s5621_s3 + $0x1f0] sm:$0xff] %v2259_v46  ;;  %v2260_v50 = vadd.f32 %v2194_v51, %v5040_v44 }
 0x284   :  { %2325 = vst.msk [vmem:[%s5620_s2 + $0x1f8] sm:$0xff] %vm2262_vm0, %v1875_v29 }
 0x285   :  { %2389 = vst.msk [vmem:[%s5621_s3 + $0x1f8] sm:$0xff] %vm2262_vm0, %v2260_v50 }

</bundles_post_ra>
